<compile_context>
chip_gen: v7x
topology: tpu7x:2x2x1
jax: 0.10.0
libtpu: 0.0.40
codegen_flags: <defaults>
</compile_context>

<pallas_src>
import functools

import jax
import jax.numpy as jnp
from jax.experimental import pallas as pl
from jax.experimental.pallas import tpu as pltpu


# --------------------------- fused BiGRU layer kernel --------------------------- #

def _bigru_layer_kernel(gi_ref, whh_ref, bhh_ref, out_ref, hfin_ref, h_scr, *, seq_len):
    """One GRU direction per grid step (grid=(2,): 0 = forward, 1 = backward).

    gi_ref : (3, T, B, H)  precomputed x_t @ W_ih^T + b_ih, gate-major [r|z|n]
    whh_ref: (3, H, H)     W_hh^T per gate
    bhh_ref: (3, 1, H)     b_hh per gate
    out_ref: (T, B, H)     per-timestep hidden states (time-aligned)
    hfin_ref: (B, H)       final hidden state of this direction
    h_scr  : (B, H) VMEM   carried hidden state
    """
    d = pl.program_id(0)          # 0 = forward, 1 = backward
    T = seq_len

    h_scr[...] = jnp.zeros_like(h_scr)

    def step(t, carry):
        # forward walks t = 0..T-1, backward walks T-1..0
        tt = t + d * (T - 1 - 2 * t)
        h = h_scr[...]
        # sequential critical path: only the h @ W_hh^T gate matmuls remain here
        gh_r = jnp.dot(h, whh_ref[0], preferred_element_type=jnp.float32) + bhh_ref[0]
        gh_z = jnp.dot(h, whh_ref[1], preferred_element_type=jnp.float32) + bhh_ref[1]
        gh_n = jnp.dot(h, whh_ref[2], preferred_element_type=jnp.float32) + bhh_ref[2]
        r = jax.nn.sigmoid(gi_ref[0, tt] + gh_r)
        z = jax.nn.sigmoid(gi_ref[1, tt] + gh_z)
        n = jnp.tanh(gi_ref[2, tt] + r * gh_n)
        h_new = (1.0 - z) * n + z * h
        h_scr[...] = h_new
        out_ref[tt] = h_new       # VMEM-resident store; single HBM writeback per direction
        return carry

    jax.lax.fori_loop(0, T, step, 0, unroll=True)
    hfin_ref[...] = h_scr[...]


def bigru_layer(x_tm, params, hidden):
    """One bidirectional GRU layer.

    x_tm: (T, B, F) time-major input (B already contains the batched x1/x2 rows).
    Returns out_f, out_b: (T, B, H) each, and hfin: (2, B, H) = [fwd final, bwd final].
    """
    T, B, F = x_tm.shape
    H = hidden

    # Hoisted input projection: one large (T*B, F) @ (F, 3H) matmul per direction.
    x2d = x_tm.reshape(T * B, F)
    gi = jnp.einsum("nf,dfg->dng", x2d, params["wih"],
                    preferred_element_type=jnp.float32) + params["bih"]     # (2, T*B, 3H)
    # Rearrange to per-(direction, gate) tiles so the kernel never lane-slices gates.
    gi = gi.reshape(2, T, B, 3, H).transpose(0, 3, 1, 2, 4).reshape(6, T, B, H)

    out, hfin = pl.pallas_call(
        functools.partial(_bigru_layer_kernel, seq_len=T),
        grid=(2,),                                                # direction axis
        in_specs=[
            pl.BlockSpec((3, T, B, H), lambda d: (d, 0, 0, 0)),   # gi   (per direction)
            pl.BlockSpec((3, H, H), lambda d: (d, 0, 0)),         # W_hh^T per gate
            pl.BlockSpec((3, 1, H), lambda d: (d, 0, 0)),         # b_hh   per gate
        ],
        out_specs=[
            pl.BlockSpec((None, T, B, H), lambda d: (d, 0, 0, 0)),  # per-step hiddens
            pl.BlockSpec((None, B, H), lambda d: (d, 0, 0)),        # final hidden
        ],
        out_shape=[
            jax.ShapeDtypeStruct((2, T, B, H), jnp.float32),
            jax.ShapeDtypeStruct((2, B, H), jnp.float32),
        ],
        scratch_shapes=[pltpu.VMEM((B, H), jnp.float32)],
        compiler_params=pltpu.CompilerParams(dimension_semantics=("parallel",)),
    )(gi, params["whh_g"], params["bhh_g"])
    return out[0], out[1], hfin


# --------------------------------- full forward --------------------------------- #

def rnn_encoder_forward(x1, x2, emb_weights, gru_params, lin_w_t, lin_b,
                        num_layers, hidden):
    B, T = x1.shape
    # x1 and x2 run through the *same* GRU -> batch them together (2B sequences).
    ids = jnp.concatenate([x1, x2], axis=0)                       # (2B, T)
    # Embedding gather produced directly in time-major order (no materialized transpose).
    x_tm = emb_weights[ids.T].astype(jnp.float32)                 # (T, 2B, E)

    h_first_fwd = None
    h_last_bwd = None
    x_in = x_tm
    for l in range(num_layers):
        out_f, out_b, hfin = bigru_layer(x_in, gru_params[l], hidden)
        if l == 0:
            h_first_fwd = hfin[0]                                 # h_n[0]   (layer0 fwd)
        if l == num_layers - 1:
            h_last_bwd = hfin[1]                                  # h_n[-1]  (last bwd)
        if l + 1 < num_layers:
            x_in = jnp.concatenate([out_f, out_b], axis=-1)       # (T, 2B, 2H)

    # Final concat + linear epilogue: tiny (B,4H)x(4H,C); kept in plain XLA on purpose
    # (a dedicated pallas_call here is pure launch overhead with a fully masked store).
    h1f, h2f = h_first_fwd[:B], h_first_fwd[B:]
    h1b, h2b = h_last_bwd[:B], h_last_bwd[B:]
    outputs = jnp.concatenate([h1f, h1b, h2f, h2b], axis=1)       # (B, 4H)
    return outputs @ lin_w_t + lin_b                              # (B, C)


# --------------------------------- param init ----------------------------------- #

def init_params(key, num_emb, emb_size, hidden, num_layers, num_classes):
    keys = iter(jax.random.split(key, 8 + 4 * num_layers))
    scale = 1.0 / jnp.sqrt(jnp.float32(hidden))
    H = hidden

    def unif(k, shape):
        return jax.random.uniform(k, shape, jnp.float32, -scale, scale)

    emb_weights = jax.random.normal(next(keys), (num_emb, emb_size), jnp.float32)

    gru_params = []
    for l in range(num_layers):
        in_dim = emb_size if l == 0 else 2 * H
        # Canonical (PyTorch-transposed) layouts, stacked over direction [fwd, bwd];
        # gate order along the 3H axis is [r | z | n] as in torch.nn.GRU.
        wih = unif(next(keys), (2, in_dim, 3 * H))   # W_ih^T
        whh = unif(next(keys), (2, H, 3 * H))        # W_hh^T
        bih = unif(next(keys), (2, 1, 3 * H))
        bhh = unif(next(keys), (2, 1, 3 * H))
        # Kernel layouts: per-(direction, gate) tiles, flat index = direction*3 + gate.
        whh_g = whh.reshape(2, H, 3, H).transpose(0, 2, 1, 3).reshape(6, H, H)
        bhh_g = bhh.reshape(2, 1, 3, H).transpose(0, 2, 1, 3).reshape(6, 1, H)
        gru_params.append({"wih": wih, "bih": bih, "whh": whh, "bhh": bhh,
                           "whh_g": whh_g, "bhh_g": bhh_g})

    lin_scale = 1.0 / jnp.sqrt(jnp.float32(4 * H))
    lin_w_t = jax.random.uniform(next(keys), (4 * H, num_classes), jnp.float32,
                                 -lin_scale, lin_scale)
    lin_b = jax.random.uniform(next(keys), (num_classes,), jnp.float32,
                               -lin_scale, lin_scale)
    return emb_weights, gru_params, lin_w_t, lin_b


# ------------------------- pure-JAX reference (validation) ---------------------- #

def _reference_forward(x1, x2, emb_weights, gru_params, lin_w_t, lin_b,
                       num_layers, hidden):
    H = hidden

    def gru_dir(x_tm, wih, bih, whh, bhh, reverse):
        T, B, _ = x_tm.shape
        h = jnp.zeros((B, H), jnp.float32)
        outs = [None] * T
        order = range(T - 1, -1, -1) if reverse else range(T)
        for t in order:
            gi = x_tm[t] @ wih + bih
            gh = h @ whh + bhh
            r = jax.nn.sigmoid(gi[:, :H] + gh[:, :H])
            z = jax.nn.sigmoid(gi[:, H:2 * H] + gh[:, H:2 * H])
            n = jnp.tanh(gi[:, 2 * H:] + r * gh[:, 2 * H:])
            h = (1.0 - z) * n + z * h
            outs[t] = h
        return jnp.stack(outs, 0), h

    feats = []
    for ids in (x1, x2):
        inp = jnp.transpose(emb_weights[ids].astype(jnp.float32), (1, 0, 2))
        h_first = h_lastb = None
        for l in range(num_layers):
            p = gru_params[l]
            of, hf = gru_dir(inp, p["wih"][0], p["bih"][0], p["whh"][0], p["bhh"][0], False)
            ob, hb = gru_dir(inp, p["wih"][1], p["bih"][1], p["whh"][1], p["bhh"][1], True)
            if l == 0:
                h_first = hf
            if l == num_layers - 1:
                h_lastb = hb
            inp = jnp.concatenate([of, ob], axis=-1)
        feats.append(jnp.concatenate([h_first, h_lastb], axis=1))
    outputs = jnp.concatenate(feats, axis=1)
    return outputs @ lin_w_t + lin_b


# ------------------------------------- main -------------------------------------- #

if __name__ == "__main__":
    B, T = 2, 8
    num_emb, emb_size = 20, 16
    hidden_size = 32            # PARAMS['hidden_size']
    num_layers = 2
    num_classes = 3

    key = jax.random.PRNGKey(0)
    k_param, k_x1, k_x2 = jax.random.split(key, 3)

    emb_weights, gru_params, lin_w_t, lin_b = init_params(
        k_param, num_emb, emb_size, hidden_size, num_layers, num_classes)

    x1 = jax.random.randint(k_x1, (B, T), 0, num_emb, dtype=jnp.int32)
    x2 = jax.random.randint(k_x2, (B, T), 0, num_emb, dtype=jnp.int32)

    fwd = jax.jit(rnn_encoder_forward, static_argnums=(6, 7))
    logits = jax.block_until_ready(
        fwd(x1, x2, emb_weights, gru_params, lin_w_t, lin_b, num_layers, hidden_size))
    assert logits.shape == (B, num_classes)

    ref = jax.block_until_ready(_reference_forward(
        x1, x2, emb_weights, gru_params, lin_w_t, lin_b, num_layers, hidden_size))
    max_err = float(jnp.max(jnp.abs(logits - ref)))
    assert max_err < 1e-3, f"mismatch vs pure-JAX reference: {max_err}"

    print("KERNEL_OK")
</pallas_src>

<mosaic_0001>
module attributes {stable_mosaic.version = 11 : i64} {
  func.func @_bigru_layer_kernel(%arg0: i32, %arg1: memref<3x8x4x32xf32, #tpu.memory_space<vmem>>, %arg2: memref<3x32x32xf32, #tpu.memory_space<vmem>>, %arg3: memref<3x1x32xf32, #tpu.memory_space<vmem>>, %arg4: memref<1x8x4x32xf32, #tpu.memory_space<vmem>>, %arg5: memref<1x4x32xf32, #tpu.memory_space<vmem>>, %arg6: memref<4x32xf32, #tpu.memory_space<vmem>>) attributes {dimension_semantics = [#tpu.dimension_semantics<parallel>], iteration_bounds = array<i64: 2>, scalar_prefetch = 0 : i64, scratch_operands = 1 : i64, tpu.core_type = #tpu.core_type<tc>, window_params = [{transform_indices = @transform_0, window_bounds = array<i64: 3, 8, 4, 32>}, {transform_indices = @transform_1, window_bounds = array<i64: 3, 32, 32>}, {transform_indices = @transform_2, window_bounds = array<i64: 3, 1, 32>}, {transform_indices = @transform_3, window_bounds = array<i64: 1, 8, 4, 32>}, {transform_indices = @transform_4, window_bounds = array<i64: 1, 4, 32>}]} {
    %cst = arith.constant 0.000000e+00 : f32
    %0 = vector.broadcast %cst : f32 to vector<4x32xf32>
    %c0 = arith.constant 0 : index
    %c0_0 = arith.constant 0 : index
    %1 = vector.load %arg6[%c0, %c0_0] : memref<4x32xf32, #tpu.memory_space<vmem>>, vector<4x32xf32>
    tpu.vector_store %arg6[%c0, %c0_0], %0 {strides = array<i32>} : memref<4x32xf32, #tpu.memory_space<vmem>>, vector<4x32xf32>,
    %c0_i32 = arith.constant 0 : i32
    %c2_i32 = arith.constant 2 : i32
    %2 = arith.muli %c2_i32, %c0_i32 : i32
    %c7_i32 = arith.constant 7 : i32
    %3 = arith.subi %c7_i32, %2 : i32
    %4 = arith.muli %arg0, %3 : i32
    %5 = arith.addi %c0_i32, %4 : i32
    %c0_1 = arith.constant 0 : index
    %c0_2 = arith.constant 0 : index
    %6 = vector.load %arg6[%c0_1, %c0_2] : memref<4x32xf32, #tpu.memory_space<vmem>>, vector<4x32xf32>
    %c0_3 = arith.constant 0 : index
    %c0_4 = arith.constant 0 : index
    %c0_5 = arith.constant 0 : index
    %7 = vector.load %arg2[%c0_3, %c0_4, %c0_5] : memref<3x32x32xf32, #tpu.memory_space<vmem>>, vector<1x32x32xf32>
    %8 = vector.shape_cast %7 : vector<1x32x32xf32> to vector<32x32xf32>
    %cst_6 = arith.constant dense<0.000000e+00> : vector<4x32xf32>
    %9 = tpu.matmul %6, %8, %cst_6 {dimension_numbers = #tpu.dot_dimension_numbers<[1], [0], [0], [1], [0, 0, 1, 1], [], []>} : vector<4x32xf32>, vector<32x32xf32>, vector<4x32xf32> -> vector<4x32xf32>
    %c0_7 = arith.constant 0 : index
    %c0_8 = arith.constant 0 : index
    %c0_9 = arith.constant 0 : index
    %10 = vector.load %arg3[%c0_7, %c0_8, %c0_9] : memref<3x1x32xf32, #tpu.memory_space<vmem>>, vector<1x1x32xf32>
    %11 = vector.shape_cast %10 : vector<1x1x32xf32> to vector<1x32xf32>
    %12 = vector.broadcast %11 : vector<1x32xf32> to vector<4x32xf32>
    %13 = arith.addf %9, %12 : vector<4x32xf32>
    %c1 = arith.constant 1 : index
    %c0_10 = arith.constant 0 : index
    %c0_11 = arith.constant 0 : index
    %14 = vector.load %arg2[%c1, %c0_10, %c0_11] : memref<3x32x32xf32, #tpu.memory_space<vmem>>, vector<1x32x32xf32>
    %15 = vector.shape_cast %14 : vector<1x32x32xf32> to vector<32x32xf32>
    %cst_12 = arith.constant dense<0.000000e+00> : vector<4x32xf32>
    %16 = tpu.matmul %6, %15, %cst_12 {dimension_numbers = #tpu.dot_dimension_numbers<[1], [0], [0], [1], [0, 0, 1, 1], [], []>} : vector<4x32xf32>, vector<32x32xf32>, vector<4x32xf32> -> vector<4x32xf32>
    %c1_13 = arith.constant 1 : index
    %c0_14 = arith.constant 0 : index
    %c0_15 = arith.constant 0 : index
    %17 = vector.load %arg3[%c1_13, %c0_14, %c0_15] : memref<3x1x32xf32, #tpu.memory_space<vmem>>, vector<1x1x32xf32>
    %18 = vector.shape_cast %17 : vector<1x1x32xf32> to vector<1x32xf32>
    %19 = vector.broadcast %18 : vector<1x32xf32> to vector<4x32xf32>
    %20 = arith.addf %16, %19 : vector<4x32xf32>
    %c2 = arith.constant 2 : index
    %c0_16 = arith.constant 0 : index
    %c0_17 = arith.constant 0 : index
    %21 = vector.load %arg2[%c2, %c0_16, %c0_17] : memref<3x32x32xf32, #tpu.memory_space<vmem>>, vector<1x32x32xf32>
    %22 = vector.shape_cast %21 : vector<1x32x32xf32> to vector<32x32xf32>
    %cst_18 = arith.constant dense<0.000000e+00> : vector<4x32xf32>
    %23 = tpu.matmul %6, %22, %cst_18 {dimension_numbers = #tpu.dot_dimension_numbers<[1], [0], [0], [1], [0, 0, 1, 1], [], []>} : vector<4x32xf32>, vector<32x32xf32>, vector<4x32xf32> -> vector<4x32xf32>
    %c2_19 = arith.constant 2 : index
    %c0_20 = arith.constant 0 : index
    %c0_21 = arith.constant 0 : index
    %24 = vector.load %arg3[%c2_19, %c0_20, %c0_21] : memref<3x1x32xf32, #tpu.memory_space<vmem>>, vector<1x1x32xf32>
    %25 = vector.shape_cast %24 : vector<1x1x32xf32> to vector<1x32xf32>
    %26 = vector.broadcast %25 : vector<1x32xf32> to vector<4x32xf32>
    %27 = arith.addf %23, %26 : vector<4x32xf32>
    %c0_22 = arith.constant 0 : index
    %28 = arith.index_cast %5 : i32 to index
    %c0_23 = arith.constant 0 : index
    %c0_24 = arith.constant 0 : index
    %29 = vector.load %arg1[%c0_22, %28, %c0_23, %c0_24] : memref<3x8x4x32xf32, #tpu.memory_space<vmem>>, vector<1x1x4x32xf32>
    %30 = vector.shape_cast %29 : vector<1x1x4x32xf32> to vector<4x32xf32>
    %31 = arith.addf %30, %13 : vector<4x32xf32>
    %32 = arith.negf %31 : vector<4x32xf32>
    %33 = math.exp %32 : vector<4x32xf32>
    %cst_25 = arith.constant 1.000000e+00 : f32
    %34 = vector.broadcast %cst_25 : f32 to vector<4x32xf32>
    %35 = arith.addf %34, %33 : vector<4x32xf32>
    %36 = arith.divf %34, %35 : vector<4x32xf32>
    %c1_26 = arith.constant 1 : index
    %37 = arith.index_cast %5 : i32 to index
    %c0_27 = arith.constant 0 : index
    %c0_28 = arith.constant 0 : index
    %38 = vector.load %arg1[%c1_26, %37, %c0_27, %c0_28] : memref<3x8x4x32xf32, #tpu.memory_space<vmem>>, vector<1x1x4x32xf32>
    %39 = vector.shape_cast %38 : vector<1x1x4x32xf32> to vector<4x32xf32>
    %40 = arith.addf %39, %20 : vector<4x32xf32>
    %41 = arith.negf %40 : vector<4x32xf32>
    %42 = math.exp %41 : vector<4x32xf32>
    %cst_29 = arith.constant 1.000000e+00 : f32
    %43 = vector.broadcast %cst_29 : f32 to vector<4x32xf32>
    %44 = arith.addf %43, %42 : vector<4x32xf32>
    %45 = arith.divf %43, %44 : vector<4x32xf32>
    %c2_30 = arith.constant 2 : index
    %46 = arith.index_cast %5 : i32 to index
    %c0_31 = arith.constant 0 : index
    %c0_32 = arith.constant 0 : index
    %47 = vector.load %arg1[%c2_30, %46, %c0_31, %c0_32] : memref<3x8x4x32xf32, #tpu.memory_space<vmem>>, vector<1x1x4x32xf32>
    %48 = vector.shape_cast %47 : vector<1x1x4x32xf32> to vector<4x32xf32>
    %49 = arith.mulf %36, %27 : vector<4x32xf32>
    %50 = arith.addf %48, %49 : vector<4x32xf32>
    %51 = math.tanh %50 : vector<4x32xf32>
    %cst_33 = arith.constant 1.000000e+00 : f32
    %52 = vector.broadcast %cst_33 : f32 to vector<4x32xf32>
    %53 = arith.subf %52, %45 : vector<4x32xf32>
    %54 = arith.mulf %53, %51 : vector<4x32xf32>
    %55 = arith.mulf %45, %6 : vector<4x32xf32>
    %56 = arith.addf %54, %55 : vector<4x32xf32>
    %c0_34 = arith.constant 0 : index
    %c0_35 = arith.constant 0 : index
    %57 = vector.load %arg6[%c0_34, %c0_35] : memref<4x32xf32, #tpu.memory_space<vmem>>, vector<4x32xf32>
    tpu.vector_store %arg6[%c0_34, %c0_35], %56 {strides = array<i32>} : memref<4x32xf32, #tpu.memory_space<vmem>>, vector<4x32xf32>,
    %c0_36 = arith.constant 0 : index
    %58 = arith.index_cast %5 : i32 to index
    %c0_37 = arith.constant 0 : index
    %c0_38 = arith.constant 0 : index
    %59 = vector.load %arg4[%c0_36, %58, %c0_37, %c0_38] : memref<1x8x4x32xf32, #tpu.memory_space<vmem>>, vector<1x1x4x32xf32>
    %60 = vector.shape_cast %59 : vector<1x1x4x32xf32> to vector<4x32xf32>
    %61 = vector.shape_cast %56 : vector<4x32xf32> to vector<1x1x4x32xf32>
    tpu.vector_store %arg4[%c0_36, %58, %c0_37, %c0_38], %61 {strides = array<i32>} : memref<1x8x4x32xf32, #tpu.memory_space<vmem>>, vector<1x1x4x32xf32>,
    %c1_i32 = arith.constant 1 : i32
    %c2_i32_39 = arith.constant 2 : i32
    %62 = arith.muli %c2_i32_39, %c1_i32 : i32
    %c7_i32_40 = arith.constant 7 : i32
    %63 = arith.subi %c7_i32_40, %62 : i32
    %64 = arith.muli %arg0, %63 : i32
    %65 = arith.addi %c1_i32, %64 : i32
    %c0_41 = arith.constant 0 : index
    %c0_42 = arith.constant 0 : index
    %66 = vector.load %arg6[%c0_41, %c0_42] : memref<4x32xf32, #tpu.memory_space<vmem>>, vector<4x32xf32>
    %c0_43 = arith.constant 0 : index
    %c0_44 = arith.constant 0 : index
    %c0_45 = arith.constant 0 : index
    %67 = vector.load %arg2[%c0_43, %c0_44, %c0_45] : memref<3x32x32xf32, #tpu.memory_space<vmem>>, vector<1x32x32xf32>
    %68 = vector.shape_cast %67 : vector<1x32x32xf32> to vector<32x32xf32>
    %cst_46 = arith.constant dense<0.000000e+00> : vector<4x32xf32>
    %69 = tpu.matmul %66, %68, %cst_46 {dimension_numbers = #tpu.dot_dimension_numbers<[1], [0], [0], [1], [0, 0, 1, 1], [], []>} : vector<4x32xf32>, vector<32x32xf32>, vector<4x32xf32> -> vector<4x32xf32>
    %c0_47 = arith.constant 0 : index
    %c0_48 = arith.constant 0 : index
    %c0_49 = arith.constant 0 : index
    %70 = vector.load %arg3[%c0_47, %c0_48, %c0_49] : memref<3x1x32xf32, #tpu.memory_space<vmem>>, vector<1x1x32xf32>
    %71 = vector.shape_cast %70 : vector<1x1x32xf32> to vector<1x32xf32>
    %72 = vector.broadcast %71 : vector<1x32xf32> to vector<4x32xf32>
    %73 = arith.addf %69, %72 : vector<4x32xf32>
    %c1_50 = arith.constant 1 : index
    %c0_51 = arith.constant 0 : index
    %c0_52 = arith.constant 0 : index
    %74 = vector.load %arg2[%c1_50, %c0_51, %c0_52] : memref<3x32x32xf32, #tpu.memory_space<vmem>>, vector<1x32x32xf32>
    %75 = vector.shape_cast %74 : vector<1x32x32xf32> to vector<32x32xf32>
    %cst_53 = arith.constant dense<0.000000e+00> : vector<4x32xf32>
    %76 = tpu.matmul %66, %75, %cst_53 {dimension_numbers = #tpu.dot_dimension_numbers<[1], [0], [0], [1], [0, 0, 1, 1], [], []>} : vector<4x32xf32>, vector<32x32xf32>, vector<4x32xf32> -> vector<4x32xf32>
    %c1_54 = arith.constant 1 : index
    %c0_55 = arith.constant 0 : index
    %c0_56 = arith.constant 0 : index
    %77 = vector.load %arg3[%c1_54, %c0_55, %c0_56] : memref<3x1x32xf32, #tpu.memory_space<vmem>>, vector<1x1x32xf32>
    %78 = vector.shape_cast %77 : vector<1x1x32xf32> to vector<1x32xf32>
    %79 = vector.broadcast %78 : vector<1x32xf32> to vector<4x32xf32>
    %80 = arith.addf %76, %79 : vector<4x32xf32>
    %c2_57 = arith.constant 2 : index
    %c0_58 = arith.constant 0 : index
    %c0_59 = arith.constant 0 : index
    %81 = vector.load %arg2[%c2_57, %c0_58, %c0_59] : memref<3x32x32xf32, #tpu.memory_space<vmem>>, vector<1x32x32xf32>
    %82 = vector.shape_cast %81 : vector<1x32x32xf32> to vector<32x32xf32>
    %cst_60 = arith.constant dense<0.000000e+00> : vector<4x32xf32>
    %83 = tpu.matmul %66, %82, %cst_60 {dimension_numbers = #tpu.dot_dimension_numbers<[1], [0], [0], [1], [0, 0, 1, 1], [], []>} : vector<4x32xf32>, vector<32x32xf32>, vector<4x32xf32> -> vector<4x32xf32>
    %c2_61 = arith.constant 2 : index
    %c0_62 = arith.constant 0 : index
    %c0_63 = arith.constant 0 : index
    %84 = vector.load %arg3[%c2_61, %c0_62, %c0_63] : memref<3x1x32xf32, #tpu.memory_space<vmem>>, vector<1x1x32xf32>
    %85 = vector.shape_cast %84 : vector<1x1x32xf32> to vector<1x32xf32>
    %86 = vector.broadcast %85 : vector<1x32xf32> to vector<4x32xf32>
    %87 = arith.addf %83, %86 : vector<4x32xf32>
    %c0_64 = arith.constant 0 : index
    %88 = arith.index_cast %65 : i32 to index
    %c0_65 = arith.constant 0 : index
    %c0_66 = arith.constant 0 : index
    %89 = vector.load %arg1[%c0_64, %88, %c0_65, %c0_66] : memref<3x8x4x32xf32, #tpu.memory_space<vmem>>, vector<1x1x4x32xf32>
    %90 = vector.shape_cast %89 : vector<1x1x4x32xf32> to vector<4x32xf32>
    %91 = arith.addf %90, %73 : vector<4x32xf32>
    %92 = arith.negf %91 : vector<4x32xf32>
    %93 = math.exp %92 : vector<4x32xf32>
    %cst_67 = arith.constant 1.000000e+00 : f32
    %94 = vector.broadcast %cst_67 : f32 to vector<4x32xf32>
    %95 = arith.addf %94, %93 : vector<4x32xf32>
    %96 = arith.divf %94, %95 : vector<4x32xf32>
    %c1_68 = arith.constant 1 : index
    %97 = arith.index_cast %65 : i32 to index
    %c0_69 = arith.constant 0 : index
    %c0_70 = arith.constant 0 : index
    %98 = vector.load %arg1[%c1_68, %97, %c0_69, %c0_70] : memref<3x8x4x32xf32, #tpu.memory_space<vmem>>, vector<1x1x4x32xf32>
    %99 = vector.shape_cast %98 : vector<1x1x4x32xf32> to vector<4x32xf32>
    %100 = arith.addf %99, %80 : vector<4x32xf32>
    %101 = arith.negf %100 : vector<4x32xf32>
    %102 = math.exp %101 : vector<4x32xf32>
    %cst_71 = arith.constant 1.000000e+00 : f32
    %103 = vector.broadcast %cst_71 : f32 to vector<4x32xf32>
    %104 = arith.addf %103, %102 : vector<4x32xf32>
    %105 = arith.divf %103, %104 : vector<4x32xf32>
    %c2_72 = arith.constant 2 : index
    %106 = arith.index_cast %65 : i32 to index
    %c0_73 = arith.constant 0 : index
    %c0_74 = arith.constant 0 : index
    %107 = vector.load %arg1[%c2_72, %106, %c0_73, %c0_74] : memref<3x8x4x32xf32, #tpu.memory_space<vmem>>, vector<1x1x4x32xf32>
    %108 = vector.shape_cast %107 : vector<1x1x4x32xf32> to vector<4x32xf32>
    %109 = arith.mulf %96, %87 : vector<4x32xf32>
    %110 = arith.addf %108, %109 : vector<4x32xf32>
    %111 = math.tanh %110 : vector<4x32xf32>
    %cst_75 = arith.constant 1.000000e+00 : f32
    %112 = vector.broadcast %cst_75 : f32 to vector<4x32xf32>
    %113 = arith.subf %112, %105 : vector<4x32xf32>
    %114 = arith.mulf %113, %111 : vector<4x32xf32>
    %115 = arith.mulf %105, %66 : vector<4x32xf32>
    %116 = arith.addf %114, %115 : vector<4x32xf32>
    %c0_76 = arith.constant 0 : index
    %c0_77 = arith.constant 0 : index
    %117 = vector.load %arg6[%c0_76, %c0_77] : memref<4x32xf32, #tpu.memory_space<vmem>>, vector<4x32xf32>
    tpu.vector_store %arg6[%c0_76, %c0_77], %116 {strides = array<i32>} : memref<4x32xf32, #tpu.memory_space<vmem>>, vector<4x32xf32>,
    %c0_78 = arith.constant 0 : index
    %118 = arith.index_cast %65 : i32 to index
    %c0_79 = arith.constant 0 : index
    %c0_80 = arith.constant 0 : index
    %119 = vector.load %arg4[%c0_78, %118, %c0_79, %c0_80] : memref<1x8x4x32xf32, #tpu.memory_space<vmem>>, vector<1x1x4x32xf32>
    %120 = vector.shape_cast %119 : vector<1x1x4x32xf32> to vector<4x32xf32>
    %121 = vector.shape_cast %116 : vector<4x32xf32> to vector<1x1x4x32xf32>
    tpu.vector_store %arg4[%c0_78, %118, %c0_79, %c0_80], %121 {strides = array<i32>} : memref<1x8x4x32xf32, #tpu.memory_space<vmem>>, vector<1x1x4x32xf32>,
    %c2_i32_81 = arith.constant 2 : i32
    %c2_i32_82 = arith.constant 2 : i32
    %122 = arith.muli %c2_i32_82, %c2_i32_81 : i32
    %c7_i32_83 = arith.constant 7 : i32
    %123 = arith.subi %c7_i32_83, %122 : i32
    %124 = arith.muli %arg0, %123 : i32
    %125 = arith.addi %c2_i32_81, %124 : i32
    %c0_84 = arith.constant 0 : index
    %c0_85 = arith.constant 0 : index
    %126 = vector.load %arg6[%c0_84, %c0_85] : memref<4x32xf32, #tpu.memory_space<vmem>>, vector<4x32xf32>
    %c0_86 = arith.constant 0 : index
    %c0_87 = arith.constant 0 : index
    %c0_88 = arith.constant 0 : index
    %127 = vector.load %arg2[%c0_86, %c0_87, %c0_88] : memref<3x32x32xf32, #tpu.memory_space<vmem>>, vector<1x32x32xf32>
    %128 = vector.shape_cast %127 : vector<1x32x32xf32> to vector<32x32xf32>
    %cst_89 = arith.constant dense<0.000000e+00> : vector<4x32xf32>
    %129 = tpu.matmul %126, %128, %cst_89 {dimension_numbers = #tpu.dot_dimension_numbers<[1], [0], [0], [1], [0, 0, 1, 1], [], []>} : vector<4x32xf32>, vector<32x32xf32>, vector<4x32xf32> -> vector<4x32xf32>
    %c0_90 = arith.constant 0 : index
    %c0_91 = arith.constant 0 : index
    %c0_92 = arith.constant 0 : index
    %130 = vector.load %arg3[%c0_90, %c0_91, %c0_92] : memref<3x1x32xf32, #tpu.memory_space<vmem>>, vector<1x1x32xf32>
    %131 = vector.shape_cast %130 : vector<1x1x32xf32> to vector<1x32xf32>
    %132 = vector.broadcast %131 : vector<1x32xf32> to vector<4x32xf32>
    %133 = arith.addf %129, %132 : vector<4x32xf32>
    %c1_93 = arith.constant 1 : index
    %c0_94 = arith.constant 0 : index
    %c0_95 = arith.constant 0 : index
    %134 = vector.load %arg2[%c1_93, %c0_94, %c0_95] : memref<3x32x32xf32, #tpu.memory_space<vmem>>, vector<1x32x32xf32>
    %135 = vector.shape_cast %134 : vector<1x32x32xf32> to vector<32x32xf32>
    %cst_96 = arith.constant dense<0.000000e+00> : vector<4x32xf32>
    %136 = tpu.matmul %126, %135, %cst_96 {dimension_numbers = #tpu.dot_dimension_numbers<[1], [0], [0], [1], [0, 0, 1, 1], [], []>} : vector<4x32xf32>, vector<32x32xf32>, vector<4x32xf32> -> vector<4x32xf32>
    %c1_97 = arith.constant 1 : index
    %c0_98 = arith.constant 0 : index
    %c0_99 = arith.constant 0 : index
    %137 = vector.load %arg3[%c1_97, %c0_98, %c0_99] : memref<3x1x32xf32, #tpu.memory_space<vmem>>, vector<1x1x32xf32>
    %138 = vector.shape_cast %137 : vector<1x1x32xf32> to vector<1x32xf32>
    %139 = vector.broadcast %138 : vector<1x32xf32> to vector<4x32xf32>
    %140 = arith.addf %136, %139 : vector<4x32xf32>
    %c2_100 = arith.constant 2 : index
    %c0_101 = arith.constant 0 : index
    %c0_102 = arith.constant 0 : index
    %141 = vector.load %arg2[%c2_100, %c0_101, %c0_102] : memref<3x32x32xf32, #tpu.memory_space<vmem>>, vector<1x32x32xf32>
    %142 = vector.shape_cast %141 : vector<1x32x32xf32> to vector<32x32xf32>
    %cst_103 = arith.constant dense<0.000000e+00> : vector<4x32xf32>
    %143 = tpu.matmul %126, %142, %cst_103 {dimension_numbers = #tpu.dot_dimension_numbers<[1], [0], [0], [1], [0, 0, 1, 1], [], []>} : vector<4x32xf32>, vector<32x32xf32>, vector<4x32xf32> -> vector<4x32xf32>
    %c2_104 = arith.constant 2 : index
    %c0_105 = arith.constant 0 : index
    %c0_106 = arith.constant 0 : index
    %144 = vector.load %arg3[%c2_104, %c0_105, %c0_106] : memref<3x1x32xf32, #tpu.memory_space<vmem>>, vector<1x1x32xf32>
    %145 = vector.shape_cast %144 : vector<1x1x32xf32> to vector<1x32xf32>
    %146 = vector.broadcast %145 : vector<1x32xf32> to vector<4x32xf32>
    %147 = arith.addf %143, %146 : vector<4x32xf32>
    %c0_107 = arith.constant 0 : index
    %148 = arith.index_cast %125 : i32 to index
    %c0_108 = arith.constant 0 : index
    %c0_109 = arith.constant 0 : index
    %149 = vector.load %arg1[%c0_107, %148, %c0_108, %c0_109] : memref<3x8x4x32xf32, #tpu.memory_space<vmem>>, vector<1x1x4x32xf32>
    %150 = vector.shape_cast %149 : vector<1x1x4x32xf32> to vector<4x32xf32>
    %151 = arith.addf %150, %133 : vector<4x32xf32>
    %152 = arith.negf %151 : vector<4x32xf32>
    %153 = math.exp %152 : vector<4x32xf32>
    %cst_110 = arith.constant 1.000000e+00 : f32
    %154 = vector.broadcast %cst_110 : f32 to vector<4x32xf32>
    %155 = arith.addf %154, %153 : vector<4x32xf32>
    %156 = arith.divf %154, %155 : vector<4x32xf32>
    %c1_111 = arith.constant 1 : index
    %157 = arith.index_cast %125 : i32 to index
    %c0_112 = arith.constant 0 : index
    %c0_113 = arith.constant 0 : index
    %158 = vector.load %arg1[%c1_111, %157, %c0_112, %c0_113] : memref<3x8x4x32xf32, #tpu.memory_space<vmem>>, vector<1x1x4x32xf32>
    %159 = vector.shape_cast %158 : vector<1x1x4x32xf32> to vector<4x32xf32>
    %160 = arith.addf %159, %140 : vector<4x32xf32>
    %161 = arith.negf %160 : vector<4x32xf32>
    %162 = math.exp %161 : vector<4x32xf32>
    %cst_114 = arith.constant 1.000000e+00 : f32
    %163 = vector.broadcast %cst_114 : f32 to vector<4x32xf32>
    %164 = arith.addf %163, %162 : vector<4x32xf32>
    %165 = arith.divf %163, %164 : vector<4x32xf32>
    %c2_115 = arith.constant 2 : index
    %166 = arith.index_cast %125 : i32 to index
    %c0_116 = arith.constant 0 : index
    %c0_117 = arith.constant 0 : index
    %167 = vector.load %arg1[%c2_115, %166, %c0_116, %c0_117] : memref<3x8x4x32xf32, #tpu.memory_space<vmem>>, vector<1x1x4x32xf32>
    %168 = vector.shape_cast %167 : vector<1x1x4x32xf32> to vector<4x32xf32>
    %169 = arith.mulf %156, %147 : vector<4x32xf32>
    %170 = arith.addf %168, %169 : vector<4x32xf32>
    %171 = math.tanh %170 : vector<4x32xf32>
    %cst_118 = arith.constant 1.000000e+00 : f32
    %172 = vector.broadcast %cst_118 : f32 to vector<4x32xf32>
    %173 = arith.subf %172, %165 : vector<4x32xf32>
    %174 = arith.mulf %173, %171 : vector<4x32xf32>
    %175 = arith.mulf %165, %126 : vector<4x32xf32>
    %176 = arith.addf %174, %175 : vector<4x32xf32>
    %c0_119 = arith.constant 0 : index
    %c0_120 = arith.constant 0 : index
    %177 = vector.load %arg6[%c0_119, %c0_120] : memref<4x32xf32, #tpu.memory_space<vmem>>, vector<4x32xf32>
    tpu.vector_store %arg6[%c0_119, %c0_120], %176 {strides = array<i32>} : memref<4x32xf32, #tpu.memory_space<vmem>>, vector<4x32xf32>,
    %c0_121 = arith.constant 0 : index
    %178 = arith.index_cast %125 : i32 to index
    %c0_122 = arith.constant 0 : index
    %c0_123 = arith.constant 0 : index
    %179 = vector.load %arg4[%c0_121, %178, %c0_122, %c0_123] : memref<1x8x4x32xf32, #tpu.memory_space<vmem>>, vector<1x1x4x32xf32>
    %180 = vector.shape_cast %179 : vector<1x1x4x32xf32> to vector<4x32xf32>
    %181 = vector.shape_cast %176 : vector<4x32xf32> to vector<1x1x4x32xf32>
    tpu.vector_store %arg4[%c0_121, %178, %c0_122, %c0_123], %181 {strides = array<i32>} : memref<1x8x4x32xf32, #tpu.memory_space<vmem>>, vector<1x1x4x32xf32>,
    %c3_i32 = arith.constant 3 : i32
    %c2_i32_124 = arith.constant 2 : i32
    %182 = arith.muli %c2_i32_124, %c3_i32 : i32
    %c7_i32_125 = arith.constant 7 : i32
    %183 = arith.subi %c7_i32_125, %182 : i32
    %184 = arith.muli %arg0, %183 : i32
    %185 = arith.addi %c3_i32, %184 : i32
    %c0_126 = arith.constant 0 : index
    %c0_127 = arith.constant 0 : index
    %186 = vector.load %arg6[%c0_126, %c0_127] : memref<4x32xf32, #tpu.memory_space<vmem>>, vector<4x32xf32>
    %c0_128 = arith.constant 0 : index
    %c0_129 = arith.constant 0 : index
    %c0_130 = arith.constant 0 : index
    %187 = vector.load %arg2[%c0_128, %c0_129, %c0_130] : memref<3x32x32xf32, #tpu.memory_space<vmem>>, vector<1x32x32xf32>
    %188 = vector.shape_cast %187 : vector<1x32x32xf32> to vector<32x32xf32>
    %cst_131 = arith.constant dense<0.000000e+00> : vector<4x32xf32>
    %189 = tpu.matmul %186, %188, %cst_131 {dimension_numbers = #tpu.dot_dimension_numbers<[1], [0], [0], [1], [0, 0, 1, 1], [], []>} : vector<4x32xf32>, vector<32x32xf32>, vector<4x32xf32> -> vector<4x32xf32>
    %c0_132 = arith.constant 0 : index
    %c0_133 = arith.constant 0 : index
    %c0_134 = arith.constant 0 : index
    %190 = vector.load %arg3[%c0_132, %c0_133, %c0_134] : memref<3x1x32xf32, #tpu.memory_space<vmem>>, vector<1x1x32xf32>
    %191 = vector.shape_cast %190 : vector<1x1x32xf32> to vector<1x32xf32>
    %192 = vector.broadcast %191 : vector<1x32xf32> to vector<4x32xf32>
    %193 = arith.addf %189, %192 : vector<4x32xf32>
    %c1_135 = arith.constant 1 : index
    %c0_136 = arith.constant 0 : index
    %c0_137 = arith.constant 0 : index
    %194 = vector.load %arg2[%c1_135, %c0_136, %c0_137] : memref<3x32x32xf32, #tpu.memory_space<vmem>>, vector<1x32x32xf32>
    %195 = vector.shape_cast %194 : vector<1x32x32xf32> to vector<32x32xf32>
    %cst_138 = arith.constant dense<0.000000e+00> : vector<4x32xf32>
    %196 = tpu.matmul %186, %195, %cst_138 {dimension_numbers = #tpu.dot_dimension_numbers<[1], [0], [0], [1], [0, 0, 1, 1], [], []>} : vector<4x32xf32>, vector<32x32xf32>, vector<4x32xf32> -> vector<4x32xf32>
    %c1_139 = arith.constant 1 : index
    %c0_140 = arith.constant 0 : index
    %c0_141 = arith.constant 0 : index
    %197 = vector.load %arg3[%c1_139, %c0_140, %c0_141] : memref<3x1x32xf32, #tpu.memory_space<vmem>>, vector<1x1x32xf32>
    %198 = vector.shape_cast %197 : vector<1x1x32xf32> to vector<1x32xf32>
    %199 = vector.broadcast %198 : vector<1x32xf32> to vector<4x32xf32>
    %200 = arith.addf %196, %199 : vector<4x32xf32>
    %c2_142 = arith.constant 2 : index
    %c0_143 = arith.constant 0 : index
    %c0_144 = arith.constant 0 : index
    %201 = vector.load %arg2[%c2_142, %c0_143, %c0_144] : memref<3x32x32xf32, #tpu.memory_space<vmem>>, vector<1x32x32xf32>
    %202 = vector.shape_cast %201 : vector<1x32x32xf32> to vector<32x32xf32>
    %cst_145 = arith.constant dense<0.000000e+00> : vector<4x32xf32>
    %203 = tpu.matmul %186, %202, %cst_145 {dimension_numbers = #tpu.dot_dimension_numbers<[1], [0], [0], [1], [0, 0, 1, 1], [], []>} : vector<4x32xf32>, vector<32x32xf32>, vector<4x32xf32> -> vector<4x32xf32>
    %c2_146 = arith.constant 2 : index
    %c0_147 = arith.constant 0 : index
    %c0_148 = arith.constant 0 : index
    %204 = vector.load %arg3[%c2_146, %c0_147, %c0_148] : memref<3x1x32xf32, #tpu.memory_space<vmem>>, vector<1x1x32xf32>
    %205 = vector.shape_cast %204 : vector<1x1x32xf32> to vector<1x32xf32>
    %206 = vector.broadcast %205 : vector<1x32xf32> to vector<4x32xf32>
    %207 = arith.addf %203, %206 : vector<4x32xf32>
    %c0_149 = arith.constant 0 : index
    %208 = arith.index_cast %185 : i32 to index
    %c0_150 = arith.constant 0 : index
    %c0_151 = arith.constant 0 : index
    %209 = vector.load %arg1[%c0_149, %208, %c0_150, %c0_151] : memref<3x8x4x32xf32, #tpu.memory_space<vmem>>, vector<1x1x4x32xf32>
    %210 = vector.shape_cast %209 : vector<1x1x4x32xf32> to vector<4x32xf32>
    %211 = arith.addf %210, %193 : vector<4x32xf32>
    %212 = arith.negf %211 : vector<4x32xf32>
    %213 = math.exp %212 : vector<4x32xf32>
    %cst_152 = arith.constant 1.000000e+00 : f32
    %214 = vector.broadcast %cst_152 : f32 to vector<4x32xf32>
    %215 = arith.addf %214, %213 : vector<4x32xf32>
    %216 = arith.divf %214, %215 : vector<4x32xf32>
    %c1_153 = arith.constant 1 : index
    %217 = arith.index_cast %185 : i32 to index
    %c0_154 = arith.constant 0 : index
    %c0_155 = arith.constant 0 : index
    %218 = vector.load %arg1[%c1_153, %217, %c0_154, %c0_155] : memref<3x8x4x32xf32, #tpu.memory_space<vmem>>, vector<1x1x4x32xf32>
    %219 = vector.shape_cast %218 : vector<1x1x4x32xf32> to vector<4x32xf32>
    %220 = arith.addf %219, %200 : vector<4x32xf32>
    %221 = arith.negf %220 : vector<4x32xf32>
    %222 = math.exp %221 : vector<4x32xf32>
    %cst_156 = arith.constant 1.000000e+00 : f32
    %223 = vector.broadcast %cst_156 : f32 to vector<4x32xf32>
    %224 = arith.addf %223, %222 : vector<4x32xf32>
    %225 = arith.divf %223, %224 : vector<4x32xf32>
    %c2_157 = arith.constant 2 : index
    %226 = arith.index_cast %185 : i32 to index
    %c0_158 = arith.constant 0 : index
    %c0_159 = arith.constant 0 : index
    %227 = vector.load %arg1[%c2_157, %226, %c0_158, %c0_159] : memref<3x8x4x32xf32, #tpu.memory_space<vmem>>, vector<1x1x4x32xf32>
    %228 = vector.shape_cast %227 : vector<1x1x4x32xf32> to vector<4x32xf32>
    %229 = arith.mulf %216, %207 : vector<4x32xf32>
    %230 = arith.addf %228, %229 : vector<4x32xf32>
    %231 = math.tanh %230 : vector<4x32xf32>
    %cst_160 = arith.constant 1.000000e+00 : f32
    %232 = vector.broadcast %cst_160 : f32 to vector<4x32xf32>
    %233 = arith.subf %232, %225 : vector<4x32xf32>
    %234 = arith.mulf %233, %231 : vector<4x32xf32>
    %235 = arith.mulf %225, %186 : vector<4x32xf32>
    %236 = arith.addf %234, %235 : vector<4x32xf32>
    %c0_161 = arith.constant 0 : index
    %c0_162 = arith.constant 0 : index
    %237 = vector.load %arg6[%c0_161, %c0_162] : memref<4x32xf32, #tpu.memory_space<vmem>>, vector<4x32xf32>
    tpu.vector_store %arg6[%c0_161, %c0_162], %236 {strides = array<i32>} : memref<4x32xf32, #tpu.memory_space<vmem>>, vector<4x32xf32>,
    %c0_163 = arith.constant 0 : index
    %238 = arith.index_cast %185 : i32 to index
    %c0_164 = arith.constant 0 : index
    %c0_165 = arith.constant 0 : index
    %239 = vector.load %arg4[%c0_163, %238, %c0_164, %c0_165] : memref<1x8x4x32xf32, #tpu.memory_space<vmem>>, vector<1x1x4x32xf32>
    %240 = vector.shape_cast %239 : vector<1x1x4x32xf32> to vector<4x32xf32>
    %241 = vector.shape_cast %236 : vector<4x32xf32> to vector<1x1x4x32xf32>
    tpu.vector_store %arg4[%c0_163, %238, %c0_164, %c0_165], %241 {strides = array<i32>} : memref<1x8x4x32xf32, #tpu.memory_space<vmem>>, vector<1x1x4x32xf32>,
    %c4_i32 = arith.constant 4 : i32
    %c2_i32_166 = arith.constant 2 : i32
    %242 = arith.muli %c2_i32_166, %c4_i32 : i32
    %c7_i32_167 = arith.constant 7 : i32
    %243 = arith.subi %c7_i32_167, %242 : i32
    %244 = arith.muli %arg0, %243 : i32
    %245 = arith.addi %c4_i32, %244 : i32
    %c0_168 = arith.constant 0 : index
    %c0_169 = arith.constant 0 : index
    %246 = vector.load %arg6[%c0_168, %c0_169] : memref<4x32xf32, #tpu.memory_space<vmem>>, vector<4x32xf32>
    %c0_170 = arith.constant 0 : index
    %c0_171 = arith.constant 0 : index
    %c0_172 = arith.constant 0 : index
    %247 = vector.load %arg2[%c0_170, %c0_171, %c0_172] : memref<3x32x32xf32, #tpu.memory_space<vmem>>, vector<1x32x32xf32>
    %248 = vector.shape_cast %247 : vector<1x32x32xf32> to vector<32x32xf32>
    %cst_173 = arith.constant dense<0.000000e+00> : vector<4x32xf32>
    %249 = tpu.matmul %246, %248, %cst_173 {dimension_numbers = #tpu.dot_dimension_numbers<[1], [0], [0], [1], [0, 0, 1, 1], [], []>} : vector<4x32xf32>, vector<32x32xf32>, vector<4x32xf32> -> vector<4x32xf32>
    %c0_174 = arith.constant 0 : index
    %c0_175 = arith.constant 0 : index
    %c0_176 = arith.constant 0 : index
    %250 = vector.load %arg3[%c0_174, %c0_175, %c0_176] : memref<3x1x32xf32, #tpu.memory_space<vmem>>, vector<1x1x32xf32>
    %251 = vector.shape_cast %250 : vector<1x1x32xf32> to vector<1x32xf32>
    %252 = vector.broadcast %251 : vector<1x32xf32> to vector<4x32xf32>
    %253 = arith.addf %249, %252 : vector<4x32xf32>
    %c1_177 = arith.constant 1 : index
    %c0_178 = arith.constant 0 : index
    %c0_179 = arith.constant 0 : index
    %254 = vector.load %arg2[%c1_177, %c0_178, %c0_179] : memref<3x32x32xf32, #tpu.memory_space<vmem>>, vector<1x32x32xf32>
    %255 = vector.shape_cast %254 : vector<1x32x32xf32> to vector<32x32xf32>
    %cst_180 = arith.constant dense<0.000000e+00> : vector<4x32xf32>
    %256 = tpu.matmul %246, %255, %cst_180 {dimension_numbers = #tpu.dot_dimension_numbers<[1], [0], [0], [1], [0, 0, 1, 1], [], []>} : vector<4x32xf32>, vector<32x32xf32>, vector<4x32xf32> -> vector<4x32xf32>
    %c1_181 = arith.constant 1 : index
    %c0_182 = arith.constant 0 : index
    %c0_183 = arith.constant 0 : index
    %257 = vector.load %arg3[%c1_181, %c0_182, %c0_183] : memref<3x1x32xf32, #tpu.memory_space<vmem>>, vector<1x1x32xf32>
    %258 = vector.shape_cast %257 : vector<1x1x32xf32> to vector<1x32xf32>
    %259 = vector.broadcast %258 : vector<1x32xf32> to vector<4x32xf32>
    %260 = arith.addf %256, %259 : vector<4x32xf32>
    %c2_184 = arith.constant 2 : index
    %c0_185 = arith.constant 0 : index
    %c0_186 = arith.constant 0 : index
    %261 = vector.load %arg2[%c2_184, %c0_185, %c0_186] : memref<3x32x32xf32, #tpu.memory_space<vmem>>, vector<1x32x32xf32>
    %262 = vector.shape_cast %261 : vector<1x32x32xf32> to vector<32x32xf32>
    %cst_187 = arith.constant dense<0.000000e+00> : vector<4x32xf32>
    %263 = tpu.matmul %246, %262, %cst_187 {dimension_numbers = #tpu.dot_dimension_numbers<[1], [0], [0], [1], [0, 0, 1, 1], [], []>} : vector<4x32xf32>, vector<32x32xf32>, vector<4x32xf32> -> vector<4x32xf32>
    %c2_188 = arith.constant 2 : index
    %c0_189 = arith.constant 0 : index
    %c0_190 = arith.constant 0 : index
    %264 = vector.load %arg3[%c2_188, %c0_189, %c0_190] : memref<3x1x32xf32, #tpu.memory_space<vmem>>, vector<1x1x32xf32>
    %265 = vector.shape_cast %264 : vector<1x1x32xf32> to vector<1x32xf32>
    %266 = vector.broadcast %265 : vector<1x32xf32> to vector<4x32xf32>
    %267 = arith.addf %263, %266 : vector<4x32xf32>
    %c0_191 = arith.constant 0 : index
    %268 = arith.index_cast %245 : i32 to index
    %c0_192 = arith.constant 0 : index
    %c0_193 = arith.constant 0 : index
    %269 = vector.load %arg1[%c0_191, %268, %c0_192, %c0_193] : memref<3x8x4x32xf32, #tpu.memory_space<vmem>>, vector<1x1x4x32xf32>
    %270 = vector.shape_cast %269 : vector<1x1x4x32xf32> to vector<4x32xf32>
    %271 = arith.addf %270, %253 : vector<4x32xf32>
    %272 = arith.negf %271 : vector<4x32xf32>
    %273 = math.exp %272 : vector<4x32xf32>
    %cst_194 = arith.constant 1.000000e+00 : f32
    %274 = vector.broadcast %cst_194 : f32 to vector<4x32xf32>
    %275 = arith.addf %274, %273 : vector<4x32xf32>
    %276 = arith.divf %274, %275 : vector<4x32xf32>
    %c1_195 = arith.constant 1 : index
    %277 = arith.index_cast %245 : i32 to index
    %c0_196 = arith.constant 0 : index
    %c0_197 = arith.constant 0 : index
    %278 = vector.load %arg1[%c1_195, %277, %c0_196, %c0_197] : memref<3x8x4x32xf32, #tpu.memory_space<vmem>>, vector<1x1x4x32xf32>
    %279 = vector.shape_cast %278 : vector<1x1x4x32xf32> to vector<4x32xf32>
    %280 = arith.addf %279, %260 : vector<4x32xf32>
    %281 = arith.negf %280 : vector<4x32xf32>
    %282 = math.exp %281 : vector<4x32xf32>
    %cst_198 = arith.constant 1.000000e+00 : f32
    %283 = vector.broadcast %cst_198 : f32 to vector<4x32xf32>
    %284 = arith.addf %283, %282 : vector<4x32xf32>
    %285 = arith.divf %283, %284 : vector<4x32xf32>
    %c2_199 = arith.constant 2 : index
    %286 = arith.index_cast %245 : i32 to index
    %c0_200 = arith.constant 0 : index
    %c0_201 = arith.constant 0 : index
    %287 = vector.load %arg1[%c2_199, %286, %c0_200, %c0_201] : memref<3x8x4x32xf32, #tpu.memory_space<vmem>>, vector<1x1x4x32xf32>
    %288 = vector.shape_cast %287 : vector<1x1x4x32xf32> to vector<4x32xf32>
    %289 = arith.mulf %276, %267 : vector<4x32xf32>
    %290 = arith.addf %288, %289 : vector<4x32xf32>
    %291 = math.tanh %290 : vector<4x32xf32>
    %cst_202 = arith.constant 1.000000e+00 : f32
    %292 = vector.broadcast %cst_202 : f32 to vector<4x32xf32>
    %293 = arith.subf %292, %285 : vector<4x32xf32>
    %294 = arith.mulf %293, %291 : vector<4x32xf32>
    %295 = arith.mulf %285, %246 : vector<4x32xf32>
    %296 = arith.addf %294, %295 : vector<4x32xf32>
    %c0_203 = arith.constant 0 : index
    %c0_204 = arith.constant 0 : index
    %297 = vector.load %arg6[%c0_203, %c0_204] : memref<4x32xf32, #tpu.memory_space<vmem>>, vector<4x32xf32>
    tpu.vector_store %arg6[%c0_203, %c0_204], %296 {strides = array<i32>} : memref<4x32xf32, #tpu.memory_space<vmem>>, vector<4x32xf32>,
    %c0_205 = arith.constant 0 : index
    %298 = arith.index_cast %245 : i32 to index
    %c0_206 = arith.constant 0 : index
    %c0_207 = arith.constant 0 : index
    %299 = vector.load %arg4[%c0_205, %298, %c0_206, %c0_207] : memref<1x8x4x32xf32, #tpu.memory_space<vmem>>, vector<1x1x4x32xf32>
    %300 = vector.shape_cast %299 : vector<1x1x4x32xf32> to vector<4x32xf32>
    %301 = vector.shape_cast %296 : vector<4x32xf32> to vector<1x1x4x32xf32>
    tpu.vector_store %arg4[%c0_205, %298, %c0_206, %c0_207], %301 {strides = array<i32>} : memref<1x8x4x32xf32, #tpu.memory_space<vmem>>, vector<1x1x4x32xf32>,
    %c5_i32 = arith.constant 5 : i32
    %c2_i32_208 = arith.constant 2 : i32
    %302 = arith.muli %c2_i32_208, %c5_i32 : i32
    %c7_i32_209 = arith.constant 7 : i32
    %303 = arith.subi %c7_i32_209, %302 : i32
    %304 = arith.muli %arg0, %303 : i32
    %305 = arith.addi %c5_i32, %304 : i32
    %c0_210 = arith.constant 0 : index
    %c0_211 = arith.constant 0 : index
    %306 = vector.load %arg6[%c0_210, %c0_211] : memref<4x32xf32, #tpu.memory_space<vmem>>, vector<4x32xf32>
    %c0_212 = arith.constant 0 : index
    %c0_213 = arith.constant 0 : index
    %c0_214 = arith.constant 0 : index
    %307 = vector.load %arg2[%c0_212, %c0_213, %c0_214] : memref<3x32x32xf32, #tpu.memory_space<vmem>>, vector<1x32x32xf32>
    %308 = vector.shape_cast %307 : vector<1x32x32xf32> to vector<32x32xf32>
    %cst_215 = arith.constant dense<0.000000e+00> : vector<4x32xf32>
    %309 = tpu.matmul %306, %308, %cst_215 {dimension_numbers = #tpu.dot_dimension_numbers<[1], [0], [0], [1], [0, 0, 1, 1], [], []>} : vector<4x32xf32>, vector<32x32xf32>, vector<4x32xf32> -> vector<4x32xf32>
    %c0_216 = arith.constant 0 : index
    %c0_217 = arith.constant 0 : index
    %c0_218 = arith.constant 0 : index
    %310 = vector.load %arg3[%c0_216, %c0_217, %c0_218] : memref<3x1x32xf32, #tpu.memory_space<vmem>>, vector<1x1x32xf32>
    %311 = vector.shape_cast %310 : vector<1x1x32xf32> to vector<1x32xf32>
    %312 = vector.broadcast %311 : vector<1x32xf32> to vector<4x32xf32>
    %313 = arith.addf %309, %312 : vector<4x32xf32>
    %c1_219 = arith.constant 1 : index
    %c0_220 = arith.constant 0 : index
    %c0_221 = arith.constant 0 : index
    %314 = vector.load %arg2[%c1_219, %c0_220, %c0_221] : memref<3x32x32xf32, #tpu.memory_space<vmem>>, vector<1x32x32xf32>
    %315 = vector.shape_cast %314 : vector<1x32x32xf32> to vector<32x32xf32>
    %cst_222 = arith.constant dense<0.000000e+00> : vector<4x32xf32>
    %316 = tpu.matmul %306, %315, %cst_222 {dimension_numbers = #tpu.dot_dimension_numbers<[1], [0], [0], [1], [0, 0, 1, 1], [], []>} : vector<4x32xf32>, vector<32x32xf32>, vector<4x32xf32> -> vector<4x32xf32>
    %c1_223 = arith.constant 1 : index
    %c0_224 = arith.constant 0 : index
    %c0_225 = arith.constant 0 : index
    %317 = vector.load %arg3[%c1_223, %c0_224, %c0_225] : memref<3x1x32xf32, #tpu.memory_space<vmem>>, vector<1x1x32xf32>
    %318 = vector.shape_cast %317 : vector<1x1x32xf32> to vector<1x32xf32>
    %319 = vector.broadcast %318 : vector<1x32xf32> to vector<4x32xf32>
    %320 = arith.addf %316, %319 : vector<4x32xf32>
    %c2_226 = arith.constant 2 : index
    %c0_227 = arith.constant 0 : index
    %c0_228 = arith.constant 0 : index
    %321 = vector.load %arg2[%c2_226, %c0_227, %c0_228] : memref<3x32x32xf32, #tpu.memory_space<vmem>>, vector<1x32x32xf32>
    %322 = vector.shape_cast %321 : vector<1x32x32xf32> to vector<32x32xf32>
    %cst_229 = arith.constant dense<0.000000e+00> : vector<4x32xf32>
    %323 = tpu.matmul %306, %322, %cst_229 {dimension_numbers = #tpu.dot_dimension_numbers<[1], [0], [0], [1], [0, 0, 1, 1], [], []>} : vector<4x32xf32>, vector<32x32xf32>, vector<4x32xf32> -> vector<4x32xf32>
    %c2_230 = arith.constant 2 : index
    %c0_231 = arith.constant 0 : index
    %c0_232 = arith.constant 0 : index
    %324 = vector.load %arg3[%c2_230, %c0_231, %c0_232] : memref<3x1x32xf32, #tpu.memory_space<vmem>>, vector<1x1x32xf32>
    %325 = vector.shape_cast %324 : vector<1x1x32xf32> to vector<1x32xf32>
    %326 = vector.broadcast %325 : vector<1x32xf32> to vector<4x32xf32>
    %327 = arith.addf %323, %326 : vector<4x32xf32>
    %c0_233 = arith.constant 0 : index
    %328 = arith.index_cast %305 : i32 to index
    %c0_234 = arith.constant 0 : index
    %c0_235 = arith.constant 0 : index
    %329 = vector.load %arg1[%c0_233, %328, %c0_234, %c0_235] : memref<3x8x4x32xf32, #tpu.memory_space<vmem>>, vector<1x1x4x32xf32>
    %330 = vector.shape_cast %329 : vector<1x1x4x32xf32> to vector<4x32xf32>
    %331 = arith.addf %330, %313 : vector<4x32xf32>
    %332 = arith.negf %331 : vector<4x32xf32>
    %333 = math.exp %332 : vector<4x32xf32>
    %cst_236 = arith.constant 1.000000e+00 : f32
    %334 = vector.broadcast %cst_236 : f32 to vector<4x32xf32>
    %335 = arith.addf %334, %333 : vector<4x32xf32>
    %336 = arith.divf %334, %335 : vector<4x32xf32>
    %c1_237 = arith.constant 1 : index
    %337 = arith.index_cast %305 : i32 to index
    %c0_238 = arith.constant 0 : index
    %c0_239 = arith.constant 0 : index
    %338 = vector.load %arg1[%c1_237, %337, %c0_238, %c0_239] : memref<3x8x4x32xf32, #tpu.memory_space<vmem>>, vector<1x1x4x32xf32>
    %339 = vector.shape_cast %338 : vector<1x1x4x32xf32> to vector<4x32xf32>
    %340 = arith.addf %339, %320 : vector<4x32xf32>
    %341 = arith.negf %340 : vector<4x32xf32>
    %342 = math.exp %341 : vector<4x32xf32>
    %cst_240 = arith.constant 1.000000e+00 : f32
    %343 = vector.broadcast %cst_240 : f32 to vector<4x32xf32>
    %344 = arith.addf %343, %342 : vector<4x32xf32>
    %345 = arith.divf %343, %344 : vector<4x32xf32>
    %c2_241 = arith.constant 2 : index
    %346 = arith.index_cast %305 : i32 to index
    %c0_242 = arith.constant 0 : index
    %c0_243 = arith.constant 0 : index
    %347 = vector.load %arg1[%c2_241, %346, %c0_242, %c0_243] : memref<3x8x4x32xf32, #tpu.memory_space<vmem>>, vector<1x1x4x32xf32>
    %348 = vector.shape_cast %347 : vector<1x1x4x32xf32> to vector<4x32xf32>
    %349 = arith.mulf %336, %327 : vector<4x32xf32>
    %350 = arith.addf %348, %349 : vector<4x32xf32>
    %351 = math.tanh %350 : vector<4x32xf32>
    %cst_244 = arith.constant 1.000000e+00 : f32
    %352 = vector.broadcast %cst_244 : f32 to vector<4x32xf32>
    %353 = arith.subf %352, %345 : vector<4x32xf32>
    %354 = arith.mulf %353, %351 : vector<4x32xf32>
    %355 = arith.mulf %345, %306 : vector<4x32xf32>
    %356 = arith.addf %354, %355 : vector<4x32xf32>
    %c0_245 = arith.constant 0 : index
    %c0_246 = arith.constant 0 : index
    %357 = vector.load %arg6[%c0_245, %c0_246] : memref<4x32xf32, #tpu.memory_space<vmem>>, vector<4x32xf32>
    tpu.vector_store %arg6[%c0_245, %c0_246], %356 {strides = array<i32>} : memref<4x32xf32, #tpu.memory_space<vmem>>, vector<4x32xf32>,
    %c0_247 = arith.constant 0 : index
    %358 = arith.index_cast %305 : i32 to index
    %c0_248 = arith.constant 0 : index
    %c0_249 = arith.constant 0 : index
    %359 = vector.load %arg4[%c0_247, %358, %c0_248, %c0_249] : memref<1x8x4x32xf32, #tpu.memory_space<vmem>>, vector<1x1x4x32xf32>
    %360 = vector.shape_cast %359 : vector<1x1x4x32xf32> to vector<4x32xf32>
    %361 = vector.shape_cast %356 : vector<4x32xf32> to vector<1x1x4x32xf32>
    tpu.vector_store %arg4[%c0_247, %358, %c0_248, %c0_249], %361 {strides = array<i32>} : memref<1x8x4x32xf32, #tpu.memory_space<vmem>>, vector<1x1x4x32xf32>,
    %c6_i32 = arith.constant 6 : i32
    %c2_i32_250 = arith.constant 2 : i32
    %362 = arith.muli %c2_i32_250, %c6_i32 : i32
    %c7_i32_251 = arith.constant 7 : i32
    %363 = arith.subi %c7_i32_251, %362 : i32
    %364 = arith.muli %arg0, %363 : i32
    %365 = arith.addi %c6_i32, %364 : i32
    %c0_252 = arith.constant 0 : index
    %c0_253 = arith.constant 0 : index
    %366 = vector.load %arg6[%c0_252, %c0_253] : memref<4x32xf32, #tpu.memory_space<vmem>>, vector<4x32xf32>
    %c0_254 = arith.constant 0 : index
    %c0_255 = arith.constant 0 : index
    %c0_256 = arith.constant 0 : index
    %367 = vector.load %arg2[%c0_254, %c0_255, %c0_256] : memref<3x32x32xf32, #tpu.memory_space<vmem>>, vector<1x32x32xf32>
    %368 = vector.shape_cast %367 : vector<1x32x32xf32> to vector<32x32xf32>
    %cst_257 = arith.constant dense<0.000000e+00> : vector<4x32xf32>
    %369 = tpu.matmul %366, %368, %cst_257 {dimension_numbers = #tpu.dot_dimension_numbers<[1], [0], [0], [1], [0, 0, 1, 1], [], []>} : vector<4x32xf32>, vector<32x32xf32>, vector<4x32xf32> -> vector<4x32xf32>
    %c0_258 = arith.constant 0 : index
    %c0_259 = arith.constant 0 : index
    %c0_260 = arith.constant 0 : index
    %370 = vector.load %arg3[%c0_258, %c0_259, %c0_260] : memref<3x1x32xf32, #tpu.memory_space<vmem>>, vector<1x1x32xf32>
    %371 = vector.shape_cast %370 : vector<1x1x32xf32> to vector<1x32xf32>
    %372 = vector.broadcast %371 : vector<1x32xf32> to vector<4x32xf32>
    %373 = arith.addf %369, %372 : vector<4x32xf32>
    %c1_261 = arith.constant 1 : index
    %c0_262 = arith.constant 0 : index
    %c0_263 = arith.constant 0 : index
    %374 = vector.load %arg2[%c1_261, %c0_262, %c0_263] : memref<3x32x32xf32, #tpu.memory_space<vmem>>, vector<1x32x32xf32>
    %375 = vector.shape_cast %374 : vector<1x32x32xf32> to vector<32x32xf32>
    %cst_264 = arith.constant dense<0.000000e+00> : vector<4x32xf32>
    %376 = tpu.matmul %366, %375, %cst_264 {dimension_numbers = #tpu.dot_dimension_numbers<[1], [0], [0], [1], [0, 0, 1, 1], [], []>} : vector<4x32xf32>, vector<32x32xf32>, vector<4x32xf32> -> vector<4x32xf32>
    %c1_265 = arith.constant 1 : index
    %c0_266 = arith.constant 0 : index
    %c0_267 = arith.constant 0 : index
    %377 = vector.load %arg3[%c1_265, %c0_266, %c0_267] : memref<3x1x32xf32, #tpu.memory_space<vmem>>, vector<1x1x32xf32>
    %378 = vector.shape_cast %377 : vector<1x1x32xf32> to vector<1x32xf32>
    %379 = vector.broadcast %378 : vector<1x32xf32> to vector<4x32xf32>
    %380 = arith.addf %376, %379 : vector<4x32xf32>
    %c2_268 = arith.constant 2 : index
    %c0_269 = arith.constant 0 : index
    %c0_270 = arith.constant 0 : index
    %381 = vector.load %arg2[%c2_268, %c0_269, %c0_270] : memref<3x32x32xf32, #tpu.memory_space<vmem>>, vector<1x32x32xf32>
    %382 = vector.shape_cast %381 : vector<1x32x32xf32> to vector<32x32xf32>
    %cst_271 = arith.constant dense<0.000000e+00> : vector<4x32xf32>
    %383 = tpu.matmul %366, %382, %cst_271 {dimension_numbers = #tpu.dot_dimension_numbers<[1], [0], [0], [1], [0, 0, 1, 1], [], []>} : vector<4x32xf32>, vector<32x32xf32>, vector<4x32xf32> -> vector<4x32xf32>
    %c2_272 = arith.constant 2 : index
    %c0_273 = arith.constant 0 : index
    %c0_274 = arith.constant 0 : index
    %384 = vector.load %arg3[%c2_272, %c0_273, %c0_274] : memref<3x1x32xf32, #tpu.memory_space<vmem>>, vector<1x1x32xf32>
    %385 = vector.shape_cast %384 : vector<1x1x32xf32> to vector<1x32xf32>
    %386 = vector.broadcast %385 : vector<1x32xf32> to vector<4x32xf32>
    %387 = arith.addf %383, %386 : vector<4x32xf32>
    %c0_275 = arith.constant 0 : index
    %388 = arith.index_cast %365 : i32 to index
    %c0_276 = arith.constant 0 : index
    %c0_277 = arith.constant 0 : index
    %389 = vector.load %arg1[%c0_275, %388, %c0_276, %c0_277] : memref<3x8x4x32xf32, #tpu.memory_space<vmem>>, vector<1x1x4x32xf32>
    %390 = vector.shape_cast %389 : vector<1x1x4x32xf32> to vector<4x32xf32>
    %391 = arith.addf %390, %373 : vector<4x32xf32>
    %392 = arith.negf %391 : vector<4x32xf32>
    %393 = math.exp %392 : vector<4x32xf32>
    %cst_278 = arith.constant 1.000000e+00 : f32
    %394 = vector.broadcast %cst_278 : f32 to vector<4x32xf32>
    %395 = arith.addf %394, %393 : vector<4x32xf32>
    %396 = arith.divf %394, %395 : vector<4x32xf32>
    %c1_279 = arith.constant 1 : index
    %397 = arith.index_cast %365 : i32 to index
    %c0_280 = arith.constant 0 : index
    %c0_281 = arith.constant 0 : index
    %398 = vector.load %arg1[%c1_279, %397, %c0_280, %c0_281] : memref<3x8x4x32xf32, #tpu.memory_space<vmem>>, vector<1x1x4x32xf32>
    %399 = vector.shape_cast %398 : vector<1x1x4x32xf32> to vector<4x32xf32>
    %400 = arith.addf %399, %380 : vector<4x32xf32>
    %401 = arith.negf %400 : vector<4x32xf32>
    %402 = math.exp %401 : vector<4x32xf32>
    %cst_282 = arith.constant 1.000000e+00 : f32
    %403 = vector.broadcast %cst_282 : f32 to vector<4x32xf32>
    %404 = arith.addf %403, %402 : vector<4x32xf32>
    %405 = arith.divf %403, %404 : vector<4x32xf32>
    %c2_283 = arith.constant 2 : index
    %406 = arith.index_cast %365 : i32 to index
    %c0_284 = arith.constant 0 : index
    %c0_285 = arith.constant 0 : index
    %407 = vector.load %arg1[%c2_283, %406, %c0_284, %c0_285] : memref<3x8x4x32xf32, #tpu.memory_space<vmem>>, vector<1x1x4x32xf32>
    %408 = vector.shape_cast %407 : vector<1x1x4x32xf32> to vector<4x32xf32>
    %409 = arith.mulf %396, %387 : vector<4x32xf32>
    %410 = arith.addf %408, %409 : vector<4x32xf32>
    %411 = math.tanh %410 : vector<4x32xf32>
    %cst_286 = arith.constant 1.000000e+00 : f32
    %412 = vector.broadcast %cst_286 : f32 to vector<4x32xf32>
    %413 = arith.subf %412, %405 : vector<4x32xf32>
    %414 = arith.mulf %413, %411 : vector<4x32xf32>
    %415 = arith.mulf %405, %366 : vector<4x32xf32>
    %416 = arith.addf %414, %415 : vector<4x32xf32>
    %c0_287 = arith.constant 0 : index
    %c0_288 = arith.constant 0 : index
    %417 = vector.load %arg6[%c0_287, %c0_288] : memref<4x32xf32, #tpu.memory_space<vmem>>, vector<4x32xf32>
    tpu.vector_store %arg6[%c0_287, %c0_288], %416 {strides = array<i32>} : memref<4x32xf32, #tpu.memory_space<vmem>>, vector<4x32xf32>,
    %c0_289 = arith.constant 0 : index
    %418 = arith.index_cast %365 : i32 to index
    %c0_290 = arith.constant 0 : index
    %c0_291 = arith.constant 0 : index
    %419 = vector.load %arg4[%c0_289, %418, %c0_290, %c0_291] : memref<1x8x4x32xf32, #tpu.memory_space<vmem>>, vector<1x1x4x32xf32>
    %420 = vector.shape_cast %419 : vector<1x1x4x32xf32> to vector<4x32xf32>
    %421 = vector.shape_cast %416 : vector<4x32xf32> to vector<1x1x4x32xf32>
    tpu.vector_store %arg4[%c0_289, %418, %c0_290, %c0_291], %421 {strides = array<i32>} : memref<1x8x4x32xf32, #tpu.memory_space<vmem>>, vector<1x1x4x32xf32>,
    %c7_i32_292 = arith.constant 7 : i32
    %c2_i32_293 = arith.constant 2 : i32
    %422 = arith.muli %c2_i32_293, %c7_i32_292 : i32
    %c7_i32_294 = arith.constant 7 : i32
    %423 = arith.subi %c7_i32_294, %422 : i32
    %424 = arith.muli %arg0, %423 : i32
    %425 = arith.addi %c7_i32_292, %424 : i32
    %c0_295 = arith.constant 0 : index
    %c0_296 = arith.constant 0 : index
    %426 = vector.load %arg6[%c0_295, %c0_296] : memref<4x32xf32, #tpu.memory_space<vmem>>, vector<4x32xf32>
    %c0_297 = arith.constant 0 : index
    %c0_298 = arith.constant 0 : index
    %c0_299 = arith.constant 0 : index
    %427 = vector.load %arg2[%c0_297, %c0_298, %c0_299] : memref<3x32x32xf32, #tpu.memory_space<vmem>>, vector<1x32x32xf32>
    %428 = vector.shape_cast %427 : vector<1x32x32xf32> to vector<32x32xf32>
    %cst_300 = arith.constant dense<0.000000e+00> : vector<4x32xf32>
    %429 = tpu.matmul %426, %428, %cst_300 {dimension_numbers = #tpu.dot_dimension_numbers<[1], [0], [0], [1], [0, 0, 1, 1], [], []>} : vector<4x32xf32>, vector<32x32xf32>, vector<4x32xf32> -> vector<4x32xf32>
    %c0_301 = arith.constant 0 : index
    %c0_302 = arith.constant 0 : index
    %c0_303 = arith.constant 0 : index
    %430 = vector.load %arg3[%c0_301, %c0_302, %c0_303] : memref<3x1x32xf32, #tpu.memory_space<vmem>>, vector<1x1x32xf32>
    %431 = vector.shape_cast %430 : vector<1x1x32xf32> to vector<1x32xf32>
    %432 = vector.broadcast %431 : vector<1x32xf32> to vector<4x32xf32>
    %433 = arith.addf %429, %432 : vector<4x32xf32>
    %c1_304 = arith.constant 1 : index
    %c0_305 = arith.constant 0 : index
    %c0_306 = arith.constant 0 : index
    %434 = vector.load %arg2[%c1_304, %c0_305, %c0_306] : memref<3x32x32xf32, #tpu.memory_space<vmem>>, vector<1x32x32xf32>
    %435 = vector.shape_cast %434 : vector<1x32x32xf32> to vector<32x32xf32>
    %cst_307 = arith.constant dense<0.000000e+00> : vector<4x32xf32>
    %436 = tpu.matmul %426, %435, %cst_307 {dimension_numbers = #tpu.dot_dimension_numbers<[1], [0], [0], [1], [0, 0, 1, 1], [], []>} : vector<4x32xf32>, vector<32x32xf32>, vector<4x32xf32> -> vector<4x32xf32>
    %c1_308 = arith.constant 1 : index
    %c0_309 = arith.constant 0 : index
    %c0_310 = arith.constant 0 : index
    %437 = vector.load %arg3[%c1_308, %c0_309, %c0_310] : memref<3x1x32xf32, #tpu.memory_space<vmem>>, vector<1x1x32xf32>
    %438 = vector.shape_cast %437 : vector<1x1x32xf32> to vector<1x32xf32>
    %439 = vector.broadcast %438 : vector<1x32xf32> to vector<4x32xf32>
    %440 = arith.addf %436, %439 : vector<4x32xf32>
    %c2_311 = arith.constant 2 : index
    %c0_312 = arith.constant 0 : index
    %c0_313 = arith.constant 0 : index
    %441 = vector.load %arg2[%c2_311, %c0_312, %c0_313] : memref<3x32x32xf32, #tpu.memory_space<vmem>>, vector<1x32x32xf32>
    %442 = vector.shape_cast %441 : vector<1x32x32xf32> to vector<32x32xf32>
    %cst_314 = arith.constant dense<0.000000e+00> : vector<4x32xf32>
    %443 = tpu.matmul %426, %442, %cst_314 {dimension_numbers = #tpu.dot_dimension_numbers<[1], [0], [0], [1], [0, 0, 1, 1], [], []>} : vector<4x32xf32>, vector<32x32xf32>, vector<4x32xf32> -> vector<4x32xf32>
    %c2_315 = arith.constant 2 : index
    %c0_316 = arith.constant 0 : index
    %c0_317 = arith.constant 0 : index
    %444 = vector.load %arg3[%c2_315, %c0_316, %c0_317] : memref<3x1x32xf32, #tpu.memory_space<vmem>>, vector<1x1x32xf32>
    %445 = vector.shape_cast %444 : vector<1x1x32xf32> to vector<1x32xf32>
    %446 = vector.broadcast %445 : vector<1x32xf32> to vector<4x32xf32>
    %447 = arith.addf %443, %446 : vector<4x32xf32>
    %c0_318 = arith.constant 0 : index
    %448 = arith.index_cast %425 : i32 to index
    %c0_319 = arith.constant 0 : index
    %c0_320 = arith.constant 0 : index
    %449 = vector.load %arg1[%c0_318, %448, %c0_319, %c0_320] : memref<3x8x4x32xf32, #tpu.memory_space<vmem>>, vector<1x1x4x32xf32>
    %450 = vector.shape_cast %449 : vector<1x1x4x32xf32> to vector<4x32xf32>
    %451 = arith.addf %450, %433 : vector<4x32xf32>
    %452 = arith.negf %451 : vector<4x32xf32>
    %453 = math.exp %452 : vector<4x32xf32>
    %cst_321 = arith.constant 1.000000e+00 : f32
    %454 = vector.broadcast %cst_321 : f32 to vector<4x32xf32>
    %455 = arith.addf %454, %453 : vector<4x32xf32>
    %456 = arith.divf %454, %455 : vector<4x32xf32>
    %c1_322 = arith.constant 1 : index
    %457 = arith.index_cast %425 : i32 to index
    %c0_323 = arith.constant 0 : index
    %c0_324 = arith.constant 0 : index
    %458 = vector.load %arg1[%c1_322, %457, %c0_323, %c0_324] : memref<3x8x4x32xf32, #tpu.memory_space<vmem>>, vector<1x1x4x32xf32>
    %459 = vector.shape_cast %458 : vector<1x1x4x32xf32> to vector<4x32xf32>
    %460 = arith.addf %459, %440 : vector<4x32xf32>
    %461 = arith.negf %460 : vector<4x32xf32>
    %462 = math.exp %461 : vector<4x32xf32>
    %cst_325 = arith.constant 1.000000e+00 : f32
    %463 = vector.broadcast %cst_325 : f32 to vector<4x32xf32>
    %464 = arith.addf %463, %462 : vector<4x32xf32>
    %465 = arith.divf %463, %464 : vector<4x32xf32>
    %c2_326 = arith.constant 2 : index
    %466 = arith.index_cast %425 : i32 to index
    %c0_327 = arith.constant 0 : index
    %c0_328 = arith.constant 0 : index
    %467 = vector.load %arg1[%c2_326, %466, %c0_327, %c0_328] : memref<3x8x4x32xf32, #tpu.memory_space<vmem>>, vector<1x1x4x32xf32>
    %468 = vector.shape_cast %467 : vector<1x1x4x32xf32> to vector<4x32xf32>
    %469 = arith.mulf %456, %447 : vector<4x32xf32>
    %470 = arith.addf %468, %469 : vector<4x32xf32>
    %471 = math.tanh %470 : vector<4x32xf32>
    %cst_329 = arith.constant 1.000000e+00 : f32
    %472 = vector.broadcast %cst_329 : f32 to vector<4x32xf32>
    %473 = arith.subf %472, %465 : vector<4x32xf32>
    %474 = arith.mulf %473, %471 : vector<4x32xf32>
    %475 = arith.mulf %465, %426 : vector<4x32xf32>
    %476 = arith.addf %474, %475 : vector<4x32xf32>
    %c0_330 = arith.constant 0 : index
    %c0_331 = arith.constant 0 : index
    %477 = vector.load %arg6[%c0_330, %c0_331] : memref<4x32xf32, #tpu.memory_space<vmem>>, vector<4x32xf32>
    tpu.vector_store %arg6[%c0_330, %c0_331], %476 {strides = array<i32>} : memref<4x32xf32, #tpu.memory_space<vmem>>, vector<4x32xf32>,
    %c0_332 = arith.constant 0 : index
    %478 = arith.index_cast %425 : i32 to index
    %c0_333 = arith.constant 0 : index
    %c0_334 = arith.constant 0 : index
    %479 = vector.load %arg4[%c0_332, %478, %c0_333, %c0_334] : memref<1x8x4x32xf32, #tpu.memory_space<vmem>>, vector<1x1x4x32xf32>
    %480 = vector.shape_cast %479 : vector<1x1x4x32xf32> to vector<4x32xf32>
    %481 = vector.shape_cast %476 : vector<4x32xf32> to vector<1x1x4x32xf32>
    tpu.vector_store %arg4[%c0_332, %478, %c0_333, %c0_334], %481 {strides = array<i32>} : memref<1x8x4x32xf32, #tpu.memory_space<vmem>>, vector<1x1x4x32xf32>,
    %c8_i32 = arith.constant 8 : i32
    %c0_335 = arith.constant 0 : index
    %c0_336 = arith.constant 0 : index
    %482 = vector.load %arg6[%c0_335, %c0_336] : memref<4x32xf32, #tpu.memory_space<vmem>>, vector<4x32xf32>
    %c0_337 = arith.constant 0 : index
    %c0_338 = arith.constant 0 : index
    %c0_339 = arith.constant 0 : index
    %483 = vector.load %arg5[%c0_337, %c0_338, %c0_339] : memref<1x4x32xf32, #tpu.memory_space<vmem>>, vector<1x4x32xf32>
    %484 = vector.shape_cast %483 : vector<1x4x32xf32> to vector<4x32xf32>
    %485 = vector.shape_cast %482 : vector<4x32xf32> to vector<1x4x32xf32>
    tpu.vector_store %arg5[%c0_337, %c0_338, %c0_339], %485 {strides = array<i32>} : memref<1x4x32xf32, #tpu.memory_space<vmem>>, vector<1x4x32xf32>,
    return
  }
  func.func @transform_0(%arg0: i32) -> (i32, i32, i32, i32) {
    %c0_i32 = arith.constant 0 : i32
    %c0_i32_0 = arith.constant 0 : i32
    %c0_i32_1 = arith.constant 0 : i32
    %c0_i32_2 = arith.constant 0 : i32
    return %arg0, %c0_i32, %c0_i32_0, %c0_i32_1 : i32, i32, i32, i32
  }
  func.func @transform_1(%arg0: i32) -> (i32, i32, i32) {
    %c0_i32 = arith.constant 0 : i32
    %c0_i32_0 = arith.constant 0 : i32
    %c0_i32_1 = arith.constant 0 : i32
    return %arg0, %c0_i32, %c0_i32_0 : i32, i32, i32
  }
  func.func @transform_2(%arg0: i32) -> (i32, i32, i32) {
    %c0_i32 = arith.constant 0 : i32
    %c0_i32_0 = arith.constant 0 : i32
    %c0_i32_1 = arith.constant 0 : i32
    return %arg0, %c0_i32, %c0_i32_0 : i32, i32, i32
  }
  func.func @transform_3(%arg0: i32) -> (i32, i32, i32, i32) {
    %c0_i32 = arith.constant 0 : i32
    %c0_i32_0 = arith.constant 0 : i32
    %c0_i32_1 = arith.constant 0 : i32
    %c0_i32_2 = arith.constant 0 : i32
    return %arg0, %c0_i32, %c0_i32_0, %c0_i32_1 : i32, i32, i32, i32
  }
  func.func @transform_4(%arg0: i32) -> (i32, i32, i32) {
    %c0_i32 = arith.constant 0 : i32
    %c0_i32_0 = arith.constant 0 : i32
    %c0_i32_1 = arith.constant 0 : i32
    return %arg0, %c0_i32, %c0_i32_0 : i32, i32, i32
  }
}

module attributes {stable_mosaic.version = 11 : i64} {
  func.func @_bigru_layer_kernel(%arg0: i32, %arg1: memref<3x8x4x32xf32, #tpu.memory_space<vmem>>, %arg2: memref<3x32x32xf32, #tpu.memory_space<vmem>>, %arg3: memref<3x1x32xf32, #tpu.memory_space<vmem>>, %arg4: memref<1x8x4x32xf32, #tpu.memory_space<vmem>>, %arg5: memref<1x4x32xf32, #tpu.memory_space<vmem>>, %arg6: memref<4x32xf32, #tpu.memory_space<vmem>>) attributes {dimension_semantics = [#tpu.dimension_semantics<parallel>], iteration_bounds = array<i64: 2>, scalar_prefetch = 0 : i64, scratch_operands = 1 : i64, tpu.core_type = #tpu.core_type<tc>, window_params = [{transform_indices = @transform_0, window_bounds = array<i64: 3, 8, 4, 32>}, {transform_indices = @transform_1, window_bounds = array<i64: 3, 32, 32>}, {transform_indices = @transform_2, window_bounds = array<i64: 3, 1, 32>}, {transform_indices = @transform_3, window_bounds = array<i64: 1, 8, 4, 32>}, {transform_indices = @transform_4, window_bounds = array<i64: 1, 4, 32>}]} {
    %cst = arith.constant 0.000000e+00 : f32
    %0 = vector.broadcast %cst : f32 to vector<4x32xf32>
    %c0 = arith.constant 0 : index
    %c0_0 = arith.constant 0 : index
    %1 = vector.load %arg6[%c0, %c0_0] : memref<4x32xf32, #tpu.memory_space<vmem>>, vector<4x32xf32>
    tpu.vector_store %arg6[%c0, %c0_0], %0 {strides = array<i32>} : memref<4x32xf32, #tpu.memory_space<vmem>>, vector<4x32xf32>,
    %c0_i32 = arith.constant 0 : i32
    %c2_i32 = arith.constant 2 : i32
    %2 = arith.muli %c2_i32, %c0_i32 : i32
    %c7_i32 = arith.constant 7 : i32
    %3 = arith.subi %c7_i32, %2 : i32
    %4 = arith.muli %arg0, %3 : i32
    %5 = arith.addi %c0_i32, %4 : i32
    %c0_1 = arith.constant 0 : index
    %c0_2 = arith.constant 0 : index
    %6 = vector.load %arg6[%c0_1, %c0_2] : memref<4x32xf32, #tpu.memory_space<vmem>>, vector<4x32xf32>
    %c0_3 = arith.constant 0 : index
    %c0_4 = arith.constant 0 : index
    %c0_5 = arith.constant 0 : index
    %7 = vector.load %arg2[%c0_3, %c0_4, %c0_5] : memref<3x32x32xf32, #tpu.memory_space<vmem>>, vector<1x32x32xf32>
    %8 = vector.shape_cast %7 : vector<1x32x32xf32> to vector<32x32xf32>
    %cst_6 = arith.constant dense<0.000000e+00> : vector<4x32xf32>
    %9 = tpu.matmul %6, %8, %cst_6 {dimension_numbers = #tpu.dot_dimension_numbers<[1], [0], [0], [1], [0, 0, 1, 1], [], []>} : vector<4x32xf32>, vector<32x32xf32>, vector<4x32xf32> -> vector<4x32xf32>
    %c0_7 = arith.constant 0 : index
    %c0_8 = arith.constant 0 : index
    %c0_9 = arith.constant 0 : index
    %10 = vector.load %arg3[%c0_7, %c0_8, %c0_9] : memref<3x1x32xf32, #tpu.memory_space<vmem>>, vector<1x1x32xf32>
    %11 = vector.shape_cast %10 : vector<1x1x32xf32> to vector<1x32xf32>
    %12 = vector.broadcast %11 : vector<1x32xf32> to vector<4x32xf32>
    %13 = arith.addf %9, %12 : vector<4x32xf32>
    %c1 = arith.constant 1 : index
    %c0_10 = arith.constant 0 : index
    %c0_11 = arith.constant 0 : index
    %14 = vector.load %arg2[%c1, %c0_10, %c0_11] : memref<3x32x32xf32, #tpu.memory_space<vmem>>, vector<1x32x32xf32>
    %15 = vector.shape_cast %14 : vector<1x32x32xf32> to vector<32x32xf32>
    %cst_12 = arith.constant dense<0.000000e+00> : vector<4x32xf32>
    %16 = tpu.matmul %6, %15, %cst_12 {dimension_numbers = #tpu.dot_dimension_numbers<[1], [0], [0], [1], [0, 0, 1, 1], [], []>} : vector<4x32xf32>, vector<32x32xf32>, vector<4x32xf32> -> vector<4x32xf32>
    %c1_13 = arith.constant 1 : index
    %c0_14 = arith.constant 0 : index
    %c0_15 = arith.constant 0 : index
    %17 = vector.load %arg3[%c1_13, %c0_14, %c0_15] : memref<3x1x32xf32, #tpu.memory_space<vmem>>, vector<1x1x32xf32>
    %18 = vector.shape_cast %17 : vector<1x1x32xf32> to vector<1x32xf32>
    %19 = vector.broadcast %18 : vector<1x32xf32> to vector<4x32xf32>
    %20 = arith.addf %16, %19 : vector<4x32xf32>
    %c2 = arith.constant 2 : index
    %c0_16 = arith.constant 0 : index
    %c0_17 = arith.constant 0 : index
    %21 = vector.load %arg2[%c2, %c0_16, %c0_17] : memref<3x32x32xf32, #tpu.memory_space<vmem>>, vector<1x32x32xf32>
    %22 = vector.shape_cast %21 : vector<1x32x32xf32> to vector<32x32xf32>
    %cst_18 = arith.constant dense<0.000000e+00> : vector<4x32xf32>
    %23 = tpu.matmul %6, %22, %cst_18 {dimension_numbers = #tpu.dot_dimension_numbers<[1], [0], [0], [1], [0, 0, 1, 1], [], []>} : vector<4x32xf32>, vector<32x32xf32>, vector<4x32xf32> -> vector<4x32xf32>
    %c2_19 = arith.constant 2 : index
    %c0_20 = arith.constant 0 : index
    %c0_21 = arith.constant 0 : index
    %24 = vector.load %arg3[%c2_19, %c0_20, %c0_21] : memref<3x1x32xf32, #tpu.memory_space<vmem>>, vector<1x1x32xf32>
    %25 = vector.shape_cast %24 : vector<1x1x32xf32> to vector<1x32xf32>
    %26 = vector.broadcast %25 : vector<1x32xf32> to vector<4x32xf32>
    %27 = arith.addf %23, %26 : vector<4x32xf32>
    %c0_22 = arith.constant 0 : index
    %28 = arith.index_cast %5 : i32 to index
    %c0_23 = arith.constant 0 : index
    %c0_24 = arith.constant 0 : index
    %29 = vector.load %arg1[%c0_22, %28, %c0_23, %c0_24] : memref<3x8x4x32xf32, #tpu.memory_space<vmem>>, vector<1x1x4x32xf32>
    %30 = vector.shape_cast %29 : vector<1x1x4x32xf32> to vector<4x32xf32>
    %31 = arith.addf %30, %13 : vector<4x32xf32>
    %32 = arith.negf %31 : vector<4x32xf32>
    %33 = math.exp %32 : vector<4x32xf32>
    %cst_25 = arith.constant 1.000000e+00 : f32
    %34 = vector.broadcast %cst_25 : f32 to vector<4x32xf32>
    %35 = arith.addf %34, %33 : vector<4x32xf32>
    %36 = arith.divf %34, %35 : vector<4x32xf32>
    %c1_26 = arith.constant 1 : index
    %37 = arith.index_cast %5 : i32 to index
    %c0_27 = arith.constant 0 : index
    %c0_28 = arith.constant 0 : index
    %38 = vector.load %arg1[%c1_26, %37, %c0_27, %c0_28] : memref<3x8x4x32xf32, #tpu.memory_space<vmem>>, vector<1x1x4x32xf32>
    %39 = vector.shape_cast %38 : vector<1x1x4x32xf32> to vector<4x32xf32>
    %40 = arith.addf %39, %20 : vector<4x32xf32>
    %41 = arith.negf %40 : vector<4x32xf32>
    %42 = math.exp %41 : vector<4x32xf32>
    %cst_29 = arith.constant 1.000000e+00 : f32
    %43 = vector.broadcast %cst_29 : f32 to vector<4x32xf32>
    %44 = arith.addf %43, %42 : vector<4x32xf32>
    %45 = arith.divf %43, %44 : vector<4x32xf32>
    %c2_30 = arith.constant 2 : index
    %46 = arith.index_cast %5 : i32 to index
    %c0_31 = arith.constant 0 : index
    %c0_32 = arith.constant 0 : index
    %47 = vector.load %arg1[%c2_30, %46, %c0_31, %c0_32] : memref<3x8x4x32xf32, #tpu.memory_space<vmem>>, vector<1x1x4x32xf32>
    %48 = vector.shape_cast %47 : vector<1x1x4x32xf32> to vector<4x32xf32>
    %49 = arith.mulf %36, %27 : vector<4x32xf32>
    %50 = arith.addf %48, %49 : vector<4x32xf32>
    %51 = math.tanh %50 : vector<4x32xf32>
    %cst_33 = arith.constant 1.000000e+00 : f32
    %52 = vector.broadcast %cst_33 : f32 to vector<4x32xf32>
    %53 = arith.subf %52, %45 : vector<4x32xf32>
    %54 = arith.mulf %53, %51 : vector<4x32xf32>
    %55 = arith.mulf %45, %6 : vector<4x32xf32>
    %56 = arith.addf %54, %55 : vector<4x32xf32>
    %c0_34 = arith.constant 0 : index
    %c0_35 = arith.constant 0 : index
    %57 = vector.load %arg6[%c0_34, %c0_35] : memref<4x32xf32, #tpu.memory_space<vmem>>, vector<4x32xf32>
    tpu.vector_store %arg6[%c0_34, %c0_35], %56 {strides = array<i32>} : memref<4x32xf32, #tpu.memory_space<vmem>>, vector<4x32xf32>,
    %c0_36 = arith.constant 0 : index
    %58 = arith.index_cast %5 : i32 to index
    %c0_37 = arith.constant 0 : index
    %c0_38 = arith.constant 0 : index
    %59 = vector.load %arg4[%c0_36, %58, %c0_37, %c0_38] : memref<1x8x4x32xf32, #tpu.memory_space<vmem>>, vector<1x1x4x32xf32>
    %60 = vector.shape_cast %59 : vector<1x1x4x32xf32> to vector<4x32xf32>
    %61 = vector.shape_cast %56 : vector<4x32xf32> to vector<1x1x4x32xf32>
    tpu.vector_store %arg4[%c0_36, %58, %c0_37, %c0_38], %61 {strides = array<i32>} : memref<1x8x4x32xf32, #tpu.memory_space<vmem>>, vector<1x1x4x32xf32>,
    %c1_i32 = arith.constant 1 : i32
    %c2_i32_39 = arith.constant 2 : i32
    %62 = arith.muli %c2_i32_39, %c1_i32 : i32
    %c7_i32_40 = arith.constant 7 : i32
    %63 = arith.subi %c7_i32_40, %62 : i32
    %64 = arith.muli %arg0, %63 : i32
    %65 = arith.addi %c1_i32, %64 : i32
    %c0_41 = arith.constant 0 : index
    %c0_42 = arith.constant 0 : index
    %66 = vector.load %arg6[%c0_41, %c0_42] : memref<4x32xf32, #tpu.memory_space<vmem>>, vector<4x32xf32>
    %c0_43 = arith.constant 0 : index
    %c0_44 = arith.constant 0 : index
    %c0_45 = arith.constant 0 : index
    %67 = vector.load %arg2[%c0_43, %c0_44, %c0_45] : memref<3x32x32xf32, #tpu.memory_space<vmem>>, vector<1x32x32xf32>
    %68 = vector.shape_cast %67 : vector<1x32x32xf32> to vector<32x32xf32>
    %cst_46 = arith.constant dense<0.000000e+00> : vector<4x32xf32>
    %69 = tpu.matmul %66, %68, %cst_46 {dimension_numbers = #tpu.dot_dimension_numbers<[1], [0], [0], [1], [0, 0, 1, 1], [], []>} : vector<4x32xf32>, vector<32x32xf32>, vector<4x32xf32> -> vector<4x32xf32>
    %c0_47 = arith.constant 0 : index
    %c0_48 = arith.constant 0 : index
    %c0_49 = arith.constant 0 : index
    %70 = vector.load %arg3[%c0_47, %c0_48, %c0_49] : memref<3x1x32xf32, #tpu.memory_space<vmem>>, vector<1x1x32xf32>
    %71 = vector.shape_cast %70 : vector<1x1x32xf32> to vector<1x32xf32>
    %72 = vector.broadcast %71 : vector<1x32xf32> to vector<4x32xf32>
    %73 = arith.addf %69, %72 : vector<4x32xf32>
    %c1_50 = arith.constant 1 : index
    %c0_51 = arith.constant 0 : index
    %c0_52 = arith.constant 0 : index
    %74 = vector.load %arg2[%c1_50, %c0_51, %c0_52] : memref<3x32x32xf32, #tpu.memory_space<vmem>>, vector<1x32x32xf32>
    %75 = vector.shape_cast %74 : vector<1x32x32xf32> to vector<32x32xf32>
    %cst_53 = arith.constant dense<0.000000e+00> : vector<4x32xf32>
    %76 = tpu.matmul %66, %75, %cst_53 {dimension_numbers = #tpu.dot_dimension_numbers<[1], [0], [0], [1], [0, 0, 1, 1], [], []>} : vector<4x32xf32>, vector<32x32xf32>, vector<4x32xf32> -> vector<4x32xf32>
    %c1_54 = arith.constant 1 : index
    %c0_55 = arith.constant 0 : index
    %c0_56 = arith.constant 0 : index
    %77 = vector.load %arg3[%c1_54, %c0_55, %c0_56] : memref<3x1x32xf32, #tpu.memory_space<vmem>>, vector<1x1x32xf32>
    %78 = vector.shape_cast %77 : vector<1x1x32xf32> to vector<1x32xf32>
    %79 = vector.broadcast %78 : vector<1x32xf32> to vector<4x32xf32>
    %80 = arith.addf %76, %79 : vector<4x32xf32>
    %c2_57 = arith.constant 2 : index
    %c0_58 = arith.constant 0 : index
    %c0_59 = arith.constant 0 : index
    %81 = vector.load %arg2[%c2_57, %c0_58, %c0_59] : memref<3x32x32xf32, #tpu.memory_space<vmem>>, vector<1x32x32xf32>
    %82 = vector.shape_cast %81 : vector<1x32x32xf32> to vector<32x32xf32>
    %cst_60 = arith.constant dense<0.000000e+00> : vector<4x32xf32>
    %83 = tpu.matmul %66, %82, %cst_60 {dimension_numbers = #tpu.dot_dimension_numbers<[1], [0], [0], [1], [0, 0, 1, 1], [], []>} : vector<4x32xf32>, vector<32x32xf32>, vector<4x32xf32> -> vector<4x32xf32>
    %c2_61 = arith.constant 2 : index
    %c0_62 = arith.constant 0 : index
    %c0_63 = arith.constant 0 : index
    %84 = vector.load %arg3[%c2_61, %c0_62, %c0_63] : memref<3x1x32xf32, #tpu.memory_space<vmem>>, vector<1x1x32xf32>
    %85 = vector.shape_cast %84 : vector<1x1x32xf32> to vector<1x32xf32>
    %86 = vector.broadcast %85 : vector<1x32xf32> to vector<4x32xf32>
    %87 = arith.addf %83, %86 : vector<4x32xf32>
    %c0_64 = arith.constant 0 : index
    %88 = arith.index_cast %65 : i32 to index
    %c0_65 = arith.constant 0 : index
    %c0_66 = arith.constant 0 : index
    %89 = vector.load %arg1[%c0_64, %88, %c0_65, %c0_66] : memref<3x8x4x32xf32, #tpu.memory_space<vmem>>, vector<1x1x4x32xf32>
    %90 = vector.shape_cast %89 : vector<1x1x4x32xf32> to vector<4x32xf32>
    %91 = arith.addf %90, %73 : vector<4x32xf32>
    %92 = arith.negf %91 : vector<4x32xf32>
    %93 = math.exp %92 : vector<4x32xf32>
    %cst_67 = arith.constant 1.000000e+00 : f32
    %94 = vector.broadcast %cst_67 : f32 to vector<4x32xf32>
    %95 = arith.addf %94, %93 : vector<4x32xf32>
    %96 = arith.divf %94, %95 : vector<4x32xf32>
    %c1_68 = arith.constant 1 : index
    %97 = arith.index_cast %65 : i32 to index
    %c0_69 = arith.constant 0 : index
    %c0_70 = arith.constant 0 : index
    %98 = vector.load %arg1[%c1_68, %97, %c0_69, %c0_70] : memref<3x8x4x32xf32, #tpu.memory_space<vmem>>, vector<1x1x4x32xf32>
    %99 = vector.shape_cast %98 : vector<1x1x4x32xf32> to vector<4x32xf32>
    %100 = arith.addf %99, %80 : vector<4x32xf32>
    %101 = arith.negf %100 : vector<4x32xf32>
    %102 = math.exp %101 : vector<4x32xf32>
    %cst_71 = arith.constant 1.000000e+00 : f32
    %103 = vector.broadcast %cst_71 : f32 to vector<4x32xf32>
    %104 = arith.addf %103, %102 : vector<4x32xf32>
    %105 = arith.divf %103, %104 : vector<4x32xf32>
    %c2_72 = arith.constant 2 : index
    %106 = arith.index_cast %65 : i32 to index
    %c0_73 = arith.constant 0 : index
    %c0_74 = arith.constant 0 : index
    %107 = vector.load %arg1[%c2_72, %106, %c0_73, %c0_74] : memref<3x8x4x32xf32, #tpu.memory_space<vmem>>, vector<1x1x4x32xf32>
    %108 = vector.shape_cast %107 : vector<1x1x4x32xf32> to vector<4x32xf32>
    %109 = arith.mulf %96, %87 : vector<4x32xf32>
    %110 = arith.addf %108, %109 : vector<4x32xf32>
    %111 = math.tanh %110 : vector<4x32xf32>
    %cst_75 = arith.constant 1.000000e+00 : f32
    %112 = vector.broadcast %cst_75 : f32 to vector<4x32xf32>
    %113 = arith.subf %112, %105 : vector<4x32xf32>
    %114 = arith.mulf %113, %111 : vector<4x32xf32>
    %115 = arith.mulf %105, %66 : vector<4x32xf32>
    %116 = arith.addf %114, %115 : vector<4x32xf32>
    %c0_76 = arith.constant 0 : index
    %c0_77 = arith.constant 0 : index
    %117 = vector.load %arg6[%c0_76, %c0_77] : memref<4x32xf32, #tpu.memory_space<vmem>>, vector<4x32xf32>
    tpu.vector_store %arg6[%c0_76, %c0_77], %116 {strides = array<i32>} : memref<4x32xf32, #tpu.memory_space<vmem>>, vector<4x32xf32>,
    %c0_78 = arith.constant 0 : index
    %118 = arith.index_cast %65 : i32 to index
    %c0_79 = arith.constant 0 : index
    %c0_80 = arith.constant 0 : index
    %119 = vector.load %arg4[%c0_78, %118, %c0_79, %c0_80] : memref<1x8x4x32xf32, #tpu.memory_space<vmem>>, vector<1x1x4x32xf32>
    %120 = vector.shape_cast %119 : vector<1x1x4x32xf32> to vector<4x32xf32>
    %121 = vector.shape_cast %116 : vector<4x32xf32> to vector<1x1x4x32xf32>
    tpu.vector_store %arg4[%c0_78, %118, %c0_79, %c0_80], %121 {strides = array<i32>} : memref<1x8x4x32xf32, #tpu.memory_space<vmem>>, vector<1x1x4x32xf32>,
    %c2_i32_81 = arith.constant 2 : i32
    %c2_i32_82 = arith.constant 2 : i32
    %122 = arith.muli %c2_i32_82, %c2_i32_81 : i32
    %c7_i32_83 = arith.constant 7 : i32
    %123 = arith.subi %c7_i32_83, %122 : i32
    %124 = arith.muli %arg0, %123 : i32
    %125 = arith.addi %c2_i32_81, %124 : i32
    %c0_84 = arith.constant 0 : index
    %c0_85 = arith.constant 0 : index
    %126 = vector.load %arg6[%c0_84, %c0_85] : memref<4x32xf32, #tpu.memory_space<vmem>>, vector<4x32xf32>
    %c0_86 = arith.constant 0 : index
    %c0_87 = arith.constant 0 : index
    %c0_88 = arith.constant 0 : index
    %127 = vector.load %arg2[%c0_86, %c0_87, %c0_88] : memref<3x32x32xf32, #tpu.memory_space<vmem>>, vector<1x32x32xf32>
    %128 = vector.shape_cast %127 : vector<1x32x32xf32> to vector<32x32xf32>
    %cst_89 = arith.constant dense<0.000000e+00> : vector<4x32xf32>
    %129 = tpu.matmul %126, %128, %cst_89 {dimension_numbers = #tpu.dot_dimension_numbers<[1], [0], [0], [1], [0, 0, 1, 1], [], []>} : vector<4x32xf32>, vector<32x32xf32>, vector<4x32xf32> -> vector<4x32xf32>
    %c0_90 = arith.constant 0 : index
    %c0_91 = arith.constant 0 : index
    %c0_92 = arith.constant 0 : index
    %130 = vector.load %arg3[%c0_90, %c0_91, %c0_92] : memref<3x1x32xf32, #tpu.memory_space<vmem>>, vector<1x1x32xf32>
    %131 = vector.shape_cast %130 : vector<1x1x32xf32> to vector<1x32xf32>
    %132 = vector.broadcast %131 : vector<1x32xf32> to vector<4x32xf32>
    %133 = arith.addf %129, %132 : vector<4x32xf32>
    %c1_93 = arith.constant 1 : index
    %c0_94 = arith.constant 0 : index
    %c0_95 = arith.constant 0 : index
    %134 = vector.load %arg2[%c1_93, %c0_94, %c0_95] : memref<3x32x32xf32, #tpu.memory_space<vmem>>, vector<1x32x32xf32>
    %135 = vector.shape_cast %134 : vector<1x32x32xf32> to vector<32x32xf32>
    %cst_96 = arith.constant dense<0.000000e+00> : vector<4x32xf32>
    %136 = tpu.matmul %126, %135, %cst_96 {dimension_numbers = #tpu.dot_dimension_numbers<[1], [0], [0], [1], [0, 0, 1, 1], [], []>} : vector<4x32xf32>, vector<32x32xf32>, vector<4x32xf32> -> vector<4x32xf32>
    %c1_97 = arith.constant 1 : index
    %c0_98 = arith.constant 0 : index
    %c0_99 = arith.constant 0 : index
    %137 = vector.load %arg3[%c1_97, %c0_98, %c0_99] : memref<3x1x32xf32, #tpu.memory_space<vmem>>, vector<1x1x32xf32>
    %138 = vector.shape_cast %137 : vector<1x1x32xf32> to vector<1x32xf32>
    %139 = vector.broadcast %138 : vector<1x32xf32> to vector<4x32xf32>
    %140 = arith.addf %136, %139 : vector<4x32xf32>
    %c2_100 = arith.constant 2 : index
    %c0_101 = arith.constant 0 : index
    %c0_102 = arith.constant 0 : index
    %141 = vector.load %arg2[%c2_100, %c0_101, %c0_102] : memref<3x32x32xf32, #tpu.memory_space<vmem>>, vector<1x32x32xf32>
    %142 = vector.shape_cast %141 : vector<1x32x32xf32> to vector<32x32xf32>
    %cst_103 = arith.constant dense<0.000000e+00> : vector<4x32xf32>
    %143 = tpu.matmul %126, %142, %cst_103 {dimension_numbers = #tpu.dot_dimension_numbers<[1], [0], [0], [1], [0, 0, 1, 1], [], []>} : vector<4x32xf32>, vector<32x32xf32>, vector<4x32xf32> -> vector<4x32xf32>
    %c2_104 = arith.constant 2 : index
    %c0_105 = arith.constant 0 : index
    %c0_106 = arith.constant 0 : index
    %144 = vector.load %arg3[%c2_104, %c0_105, %c0_106] : memref<3x1x32xf32, #tpu.memory_space<vmem>>, vector<1x1x32xf32>
    %145 = vector.shape_cast %144 : vector<1x1x32xf32> to vector<1x32xf32>
    %146 = vector.broadcast %145 : vector<1x32xf32> to vector<4x32xf32>
    %147 = arith.addf %143, %146 : vector<4x32xf32>
    %c0_107 = arith.constant 0 : index
    %148 = arith.index_cast %125 : i32 to index
    %c0_108 = arith.constant 0 : index
    %c0_109 = arith.constant 0 : index
    %149 = vector.load %arg1[%c0_107, %148, %c0_108, %c0_109] : memref<3x8x4x32xf32, #tpu.memory_space<vmem>>, vector<1x1x4x32xf32>
    %150 = vector.shape_cast %149 : vector<1x1x4x32xf32> to vector<4x32xf32>
    %151 = arith.addf %150, %133 : vector<4x32xf32>
    %152 = arith.negf %151 : vector<4x32xf32>
    %153 = math.exp %152 : vector<4x32xf32>
    %cst_110 = arith.constant 1.000000e+00 : f32
    %154 = vector.broadcast %cst_110 : f32 to vector<4x32xf32>
    %155 = arith.addf %154, %153 : vector<4x32xf32>
    %156 = arith.divf %154, %155 : vector<4x32xf32>
    %c1_111 = arith.constant 1 : index
    %157 = arith.index_cast %125 : i32 to index
    %c0_112 = arith.constant 0 : index
    %c0_113 = arith.constant 0 : index
    %158 = vector.load %arg1[%c1_111, %157, %c0_112, %c0_113] : memref<3x8x4x32xf32, #tpu.memory_space<vmem>>, vector<1x1x4x32xf32>
    %159 = vector.shape_cast %158 : vector<1x1x4x32xf32> to vector<4x32xf32>
    %160 = arith.addf %159, %140 : vector<4x32xf32>
    %161 = arith.negf %160 : vector<4x32xf32>
    %162 = math.exp %161 : vector<4x32xf32>
    %cst_114 = arith.constant 1.000000e+00 : f32
    %163 = vector.broadcast %cst_114 : f32 to vector<4x32xf32>
    %164 = arith.addf %163, %162 : vector<4x32xf32>
    %165 = arith.divf %163, %164 : vector<4x32xf32>
    %c2_115 = arith.constant 2 : index
    %166 = arith.index_cast %125 : i32 to index
    %c0_116 = arith.constant 0 : index
    %c0_117 = arith.constant 0 : index
    %167 = vector.load %arg1[%c2_115, %166, %c0_116, %c0_117] : memref<3x8x4x32xf32, #tpu.memory_space<vmem>>, vector<1x1x4x32xf32>
    %168 = vector.shape_cast %167 : vector<1x1x4x32xf32> to vector<4x32xf32>
    %169 = arith.mulf %156, %147 : vector<4x32xf32>
    %170 = arith.addf %168, %169 : vector<4x32xf32>
    %171 = math.tanh %170 : vector<4x32xf32>
    %cst_118 = arith.constant 1.000000e+00 : f32
    %172 = vector.broadcast %cst_118 : f32 to vector<4x32xf32>
    %173 = arith.subf %172, %165 : vector<4x32xf32>
    %174 = arith.mulf %173, %171 : vector<4x32xf32>
    %175 = arith.mulf %165, %126 : vector<4x32xf32>
    %176 = arith.addf %174, %175 : vector<4x32xf32>
    %c0_119 = arith.constant 0 : index
    %c0_120 = arith.constant 0 : index
    %177 = vector.load %arg6[%c0_119, %c0_120] : memref<4x32xf32, #tpu.memory_space<vmem>>, vector<4x32xf32>
    tpu.vector_store %arg6[%c0_119, %c0_120], %176 {strides = array<i32>} : memref<4x32xf32, #tpu.memory_space<vmem>>, vector<4x32xf32>,
    %c0_121 = arith.constant 0 : index
    %178 = arith.index_cast %125 : i32 to index
    %c0_122 = arith.constant 0 : index
    %c0_123 = arith.constant 0 : index
    %179 = vector.load %arg4[%c0_121, %178, %c0_122, %c0_123] : memref<1x8x4x32xf32, #tpu.memory_space<vmem>>, vector<1x1x4x32xf32>
    %180 = vector.shape_cast %179 : vector<1x1x4x32xf32> to vector<4x32xf32>
    %181 = vector.shape_cast %176 : vector<4x32xf32> to vector<1x1x4x32xf32>
    tpu.vector_store %arg4[%c0_121, %178, %c0_122, %c0_123], %181 {strides = array<i32>} : memref<1x8x4x32xf32, #tpu.memory_space<vmem>>, vector<1x1x4x32xf32>,
    %c3_i32 = arith.constant 3 : i32
    %c2_i32_124 = arith.constant 2 : i32
    %182 = arith.muli %c2_i32_124, %c3_i32 : i32
    %c7_i32_125 = arith.constant 7 : i32
    %183 = arith.subi %c7_i32_125, %182 : i32
    %184 = arith.muli %arg0, %183 : i32
    %185 = arith.addi %c3_i32, %184 : i32
    %c0_126 = arith.constant 0 : index
    %c0_127 = arith.constant 0 : index
    %186 = vector.load %arg6[%c0_126, %c0_127] : memref<4x32xf32, #tpu.memory_space<vmem>>, vector<4x32xf32>
    %c0_128 = arith.constant 0 : index
    %c0_129 = arith.constant 0 : index
    %c0_130 = arith.constant 0 : index
    %187 = vector.load %arg2[%c0_128, %c0_129, %c0_130] : memref<3x32x32xf32, #tpu.memory_space<vmem>>, vector<1x32x32xf32>
    %188 = vector.shape_cast %187 : vector<1x32x32xf32> to vector<32x32xf32>
    %cst_131 = arith.constant dense<0.000000e+00> : vector<4x32xf32>
    %189 = tpu.matmul %186, %188, %cst_131 {dimension_numbers = #tpu.dot_dimension_numbers<[1], [0], [0], [1], [0, 0, 1, 1], [], []>} : vector<4x32xf32>, vector<32x32xf32>, vector<4x32xf32> -> vector<4x32xf32>
    %c0_132 = arith.constant 0 : index
    %c0_133 = arith.constant 0 : index
    %c0_134 = arith.constant 0 : index
    %190 = vector.load %arg3[%c0_132, %c0_133, %c0_134] : memref<3x1x32xf32, #tpu.memory_space<vmem>>, vector<1x1x32xf32>
    %191 = vector.shape_cast %190 : vector<1x1x32xf32> to vector<1x32xf32>
    %192 = vector.broadcast %191 : vector<1x32xf32> to vector<4x32xf32>
    %193 = arith.addf %189, %192 : vector<4x32xf32>
    %c1_135 = arith.constant 1 : index
    %c0_136 = arith.constant 0 : index
    %c0_137 = arith.constant 0 : index
    %194 = vector.load %arg2[%c1_135, %c0_136, %c0_137] : memref<3x32x32xf32, #tpu.memory_space<vmem>>, vector<1x32x32xf32>
    %195 = vector.shape_cast %194 : vector<1x32x32xf32> to vector<32x32xf32>
    %cst_138 = arith.constant dense<0.000000e+00> : vector<4x32xf32>
    %196 = tpu.matmul %186, %195, %cst_138 {dimension_numbers = #tpu.dot_dimension_numbers<[1], [0], [0], [1], [0, 0, 1, 1], [], []>} : vector<4x32xf32>, vector<32x32xf32>, vector<4x32xf32> -> vector<4x32xf32>
    %c1_139 = arith.constant 1 : index
    %c0_140 = arith.constant 0 : index
    %c0_141 = arith.constant 0 : index
    %197 = vector.load %arg3[%c1_139, %c0_140, %c0_141] : memref<3x1x32xf32, #tpu.memory_space<vmem>>, vector<1x1x32xf32>
    %198 = vector.shape_cast %197 : vector<1x1x32xf32> to vector<1x32xf32>
    %199 = vector.broadcast %198 : vector<1x32xf32> to vector<4x32xf32>
    %200 = arith.addf %196, %199 : vector<4x32xf32>
    %c2_142 = arith.constant 2 : index
    %c0_143 = arith.constant 0 : index
    %c0_144 = arith.constant 0 : index
    %201 = vector.load %arg2[%c2_142, %c0_143, %c0_144] : memref<3x32x32xf32, #tpu.memory_space<vmem>>, vector<1x32x32xf32>
    %202 = vector.shape_cast %201 : vector<1x32x32xf32> to vector<32x32xf32>
    %cst_145 = arith.constant dense<0.000000e+00> : vector<4x32xf32>
    %203 = tpu.matmul %186, %202, %cst_145 {dimension_numbers = #tpu.dot_dimension_numbers<[1], [0], [0], [1], [0, 0, 1, 1], [], []>} : vector<4x32xf32>, vector<32x32xf32>, vector<4x32xf32> -> vector<4x32xf32>
    %c2_146 = arith.constant 2 : index
    %c0_147 = arith.constant 0 : index
    %c0_148 = arith.constant 0 : index
    %204 = vector.load %arg3[%c2_146, %c0_147, %c0_148] : memref<3x1x32xf32, #tpu.memory_space<vmem>>, vector<1x1x32xf32>
    %205 = vector.shape_cast %204 : vector<1x1x32xf32> to vector<1x32xf32>
    %206 = vector.broadcast %205 : vector<1x32xf32> to vector<4x32xf32>
    %207 = arith.addf %203, %206 : vector<4x32xf32>
    %c0_149 = arith.constant 0 : index
    %208 = arith.index_cast %185 : i32 to index
    %c0_150 = arith.constant 0 : index
    %c0_151 = arith.constant 0 : index
    %209 = vector.load %arg1[%c0_149, %208, %c0_150, %c0_151] : memref<3x8x4x32xf32, #tpu.memory_space<vmem>>, vector<1x1x4x32xf32>
    %210 = vector.shape_cast %209 : vector<1x1x4x32xf32> to vector<4x32xf32>
    %211 = arith.addf %210, %193 : vector<4x32xf32>
    %212 = arith.negf %211 : vector<4x32xf32>
    %213 = math.exp %212 : vector<4x32xf32>
    %cst_152 = arith.constant 1.000000e+00 : f32
    %214 = vector.broadcast %cst_152 : f32 to vector<4x32xf32>
    %215 = arith.addf %214, %213 : vector<4x32xf32>
    %216 = arith.divf %214, %215 : vector<4x32xf32>
    %c1_153 = arith.constant 1 : index
    %217 = arith.index_cast %185 : i32 to index
    %c0_154 = arith.constant 0 : index
    %c0_155 = arith.constant 0 : index
    %218 = vector.load %arg1[%c1_153, %217, %c0_154, %c0_155] : memref<3x8x4x32xf32, #tpu.memory_space<vmem>>, vector<1x1x4x32xf32>
    %219 = vector.shape_cast %218 : vector<1x1x4x32xf32> to vector<4x32xf32>
    %220 = arith.addf %219, %200 : vector<4x32xf32>
    %221 = arith.negf %220 : vector<4x32xf32>
    %222 = math.exp %221 : vector<4x32xf32>
    %cst_156 = arith.constant 1.000000e+00 : f32
    %223 = vector.broadcast %cst_156 : f32 to vector<4x32xf32>
    %224 = arith.addf %223, %222 : vector<4x32xf32>
    %225 = arith.divf %223, %224 : vector<4x32xf32>
    %c2_157 = arith.constant 2 : index
    %226 = arith.index_cast %185 : i32 to index
    %c0_158 = arith.constant 0 : index
    %c0_159 = arith.constant 0 : index
    %227 = vector.load %arg1[%c2_157, %226, %c0_158, %c0_159] : memref<3x8x4x32xf32, #tpu.memory_space<vmem>>, vector<1x1x4x32xf32>
    %228 = vector.shape_cast %227 : vector<1x1x4x32xf32> to vector<4x32xf32>
    %229 = arith.mulf %216, %207 : vector<4x32xf32>
    %230 = arith.addf %228, %229 : vector<4x32xf32>
    %231 = math.tanh %230 : vector<4x32xf32>
    %cst_160 = arith.constant 1.000000e+00 : f32
    %232 = vector.broadcast %cst_160 : f32 to vector<4x32xf32>
    %233 = arith.subf %232, %225 : vector<4x32xf32>
    %234 = arith.mulf %233, %231 : vector<4x32xf32>
    %235 = arith.mulf %225, %186 : vector<4x32xf32>
    %236 = arith.addf %234, %235 : vector<4x32xf32>
    %c0_161 = arith.constant 0 : index
    %c0_162 = arith.constant 0 : index
    %237 = vector.load %arg6[%c0_161, %c0_162] : memref<4x32xf32, #tpu.memory_space<vmem>>, vector<4x32xf32>
    tpu.vector_store %arg6[%c0_161, %c0_162], %236 {strides = array<i32>} : memref<4x32xf32, #tpu.memory_space<vmem>>, vector<4x32xf32>,
    %c0_163 = arith.constant 0 : index
    %238 = arith.index_cast %185 : i32 to index
    %c0_164 = arith.constant 0 : index
    %c0_165 = arith.constant 0 : index
    %239 = vector.load %arg4[%c0_163, %238, %c0_164, %c0_165] : memref<1x8x4x32xf32, #tpu.memory_space<vmem>>, vector<1x1x4x32xf32>
    %240 = vector.shape_cast %239 : vector<1x1x4x32xf32> to vector<4x32xf32>
    %241 = vector.shape_cast %236 : vector<4x32xf32> to vector<1x1x4x32xf32>
    tpu.vector_store %arg4[%c0_163, %238, %c0_164, %c0_165], %241 {strides = array<i32>} : memref<1x8x4x32xf32, #tpu.memory_space<vmem>>, vector<1x1x4x32xf32>,
    %c4_i32 = arith.constant 4 : i32
    %c2_i32_166 = arith.constant 2 : i32
    %242 = arith.muli %c2_i32_166, %c4_i32 : i32
    %c7_i32_167 = arith.constant 7 : i32
    %243 = arith.subi %c7_i32_167, %242 : i32
    %244 = arith.muli %arg0, %243 : i32
    %245 = arith.addi %c4_i32, %244 : i32
    %c0_168 = arith.constant 0 : index
    %c0_169 = arith.constant 0 : index
    %246 = vector.load %arg6[%c0_168, %c0_169] : memref<4x32xf32, #tpu.memory_space<vmem>>, vector<4x32xf32>
    %c0_170 = arith.constant 0 : index
    %c0_171 = arith.constant 0 : index
    %c0_172 = arith.constant 0 : index
    %247 = vector.load %arg2[%c0_170, %c0_171, %c0_172] : memref<3x32x32xf32, #tpu.memory_space<vmem>>, vector<1x32x32xf32>
    %248 = vector.shape_cast %247 : vector<1x32x32xf32> to vector<32x32xf32>
    %cst_173 = arith.constant dense<0.000000e+00> : vector<4x32xf32>
    %249 = tpu.matmul %246, %248, %cst_173 {dimension_numbers = #tpu.dot_dimension_numbers<[1], [0], [0], [1], [0, 0, 1, 1], [], []>} : vector<4x32xf32>, vector<32x32xf32>, vector<4x32xf32> -> vector<4x32xf32>
    %c0_174 = arith.constant 0 : index
    %c0_175 = arith.constant 0 : index
    %c0_176 = arith.constant 0 : index
    %250 = vector.load %arg3[%c0_174, %c0_175, %c0_176] : memref<3x1x32xf32, #tpu.memory_space<vmem>>, vector<1x1x32xf32>
    %251 = vector.shape_cast %250 : vector<1x1x32xf32> to vector<1x32xf32>
    %252 = vector.broadcast %251 : vector<1x32xf32> to vector<4x32xf32>
    %253 = arith.addf %249, %252 : vector<4x32xf32>
    %c1_177 = arith.constant 1 : index
    %c0_178 = arith.constant 0 : index
    %c0_179 = arith.constant 0 : index
    %254 = vector.load %arg2[%c1_177, %c0_178, %c0_179] : memref<3x32x32xf32, #tpu.memory_space<vmem>>, vector<1x32x32xf32>
    %255 = vector.shape_cast %254 : vector<1x32x32xf32> to vector<32x32xf32>
    %cst_180 = arith.constant dense<0.000000e+00> : vector<4x32xf32>
    %256 = tpu.matmul %246, %255, %cst_180 {dimension_numbers = #tpu.dot_dimension_numbers<[1], [0], [0], [1], [0, 0, 1, 1], [], []>} : vector<4x32xf32>, vector<32x32xf32>, vector<4x32xf32> -> vector<4x32xf32>
    %c1_181 = arith.constant 1 : index
    %c0_182 = arith.constant 0 : index
    %c0_183 = arith.constant 0 : index
    %257 = vector.load %arg3[%c1_181, %c0_182, %c0_183] : memref<3x1x32xf32, #tpu.memory_space<vmem>>, vector<1x1x32xf32>
    %258 = vector.shape_cast %257 : vector<1x1x32xf32> to vector<1x32xf32>
    %259 = vector.broadcast %258 : vector<1x32xf32> to vector<4x32xf32>
    %260 = arith.addf %256, %259 : vector<4x32xf32>
    %c2_184 = arith.constant 2 : index
    %c0_185 = arith.constant 0 : index
    %c0_186 = arith.constant 0 : index
    %261 = vector.load %arg2[%c2_184, %c0_185, %c0_186] : memref<3x32x32xf32, #tpu.memory_space<vmem>>, vector<1x32x32xf32>
    %262 = vector.shape_cast %261 : vector<1x32x32xf32> to vector<32x32xf32>
    %cst_187 = arith.constant dense<0.000000e+00> : vector<4x32xf32>
    %263 = tpu.matmul %246, %262, %cst_187 {dimension_numbers = #tpu.dot_dimension_numbers<[1], [0], [0], [1], [0, 0, 1, 1], [], []>} : vector<4x32xf32>, vector<32x32xf32>, vector<4x32xf32> -> vector<4x32xf32>
    %c2_188 = arith.constant 2 : index
    %c0_189 = arith.constant 0 : index
    %c0_190 = arith.constant 0 : index
    %264 = vector.load %arg3[%c2_188, %c0_189, %c0_190] : memref<3x1x32xf32, #tpu.memory_space<vmem>>, vector<1x1x32xf32>
    %265 = vector.shape_cast %264 : vector<1x1x32xf32> to vector<1x32xf32>
    %266 = vector.broadcast %265 : vector<1x32xf32> to vector<4x32xf32>
    %267 = arith.addf %263, %266 : vector<4x32xf32>
    %c0_191 = arith.constant 0 : index
    %268 = arith.index_cast %245 : i32 to index
    %c0_192 = arith.constant 0 : index
    %c0_193 = arith.constant 0 : index
    %269 = vector.load %arg1[%c0_191, %268, %c0_192, %c0_193] : memref<3x8x4x32xf32, #tpu.memory_space<vmem>>, vector<1x1x4x32xf32>
    %270 = vector.shape_cast %269 : vector<1x1x4x32xf32> to vector<4x32xf32>
    %271 = arith.addf %270, %253 : vector<4x32xf32>
    %272 = arith.negf %271 : vector<4x32xf32>
    %273 = math.exp %272 : vector<4x32xf32>
    %cst_194 = arith.constant 1.000000e+00 : f32
    %274 = vector.broadcast %cst_194 : f32 to vector<4x32xf32>
    %275 = arith.addf %274, %273 : vector<4x32xf32>
    %276 = arith.divf %274, %275 : vector<4x32xf32>
    %c1_195 = arith.constant 1 : index
    %277 = arith.index_cast %245 : i32 to index
    %c0_196 = arith.constant 0 : index
    %c0_197 = arith.constant 0 : index
    %278 = vector.load %arg1[%c1_195, %277, %c0_196, %c0_197] : memref<3x8x4x32xf32, #tpu.memory_space<vmem>>, vector<1x1x4x32xf32>
    %279 = vector.shape_cast %278 : vector<1x1x4x32xf32> to vector<4x32xf32>
    %280 = arith.addf %279, %260 : vector<4x32xf32>
    %281 = arith.negf %280 : vector<4x32xf32>
    %282 = math.exp %281 : vector<4x32xf32>
    %cst_198 = arith.constant 1.000000e+00 : f32
    %283 = vector.broadcast %cst_198 : f32 to vector<4x32xf32>
    %284 = arith.addf %283, %282 : vector<4x32xf32>
    %285 = arith.divf %283, %284 : vector<4x32xf32>
    %c2_199 = arith.constant 2 : index
    %286 = arith.index_cast %245 : i32 to index
    %c0_200 = arith.constant 0 : index
    %c0_201 = arith.constant 0 : index
    %287 = vector.load %arg1[%c2_199, %286, %c0_200, %c0_201] : memref<3x8x4x32xf32, #tpu.memory_space<vmem>>, vector<1x1x4x32xf32>
    %288 = vector.shape_cast %287 : vector<1x1x4x32xf32> to vector<4x32xf32>
    %289 = arith.mulf %276, %267 : vector<4x32xf32>
    %290 = arith.addf %288, %289 : vector<4x32xf32>
    %291 = math.tanh %290 : vector<4x32xf32>
    %cst_202 = arith.constant 1.000000e+00 : f32
    %292 = vector.broadcast %cst_202 : f32 to vector<4x32xf32>
    %293 = arith.subf %292, %285 : vector<4x32xf32>
    %294 = arith.mulf %293, %291 : vector<4x32xf32>
    %295 = arith.mulf %285, %246 : vector<4x32xf32>
    %296 = arith.addf %294, %295 : vector<4x32xf32>
    %c0_203 = arith.constant 0 : index
    %c0_204 = arith.constant 0 : index
    %297 = vector.load %arg6[%c0_203, %c0_204] : memref<4x32xf32, #tpu.memory_space<vmem>>, vector<4x32xf32>
    tpu.vector_store %arg6[%c0_203, %c0_204], %296 {strides = array<i32>} : memref<4x32xf32, #tpu.memory_space<vmem>>, vector<4x32xf32>,
    %c0_205 = arith.constant 0 : index
    %298 = arith.index_cast %245 : i32 to index
    %c0_206 = arith.constant 0 : index
    %c0_207 = arith.constant 0 : index
    %299 = vector.load %arg4[%c0_205, %298, %c0_206, %c0_207] : memref<1x8x4x32xf32, #tpu.memory_space<vmem>>, vector<1x1x4x32xf32>
    %300 = vector.shape_cast %299 : vector<1x1x4x32xf32> to vector<4x32xf32>
    %301 = vector.shape_cast %296 : vector<4x32xf32> to vector<1x1x4x32xf32>
    tpu.vector_store %arg4[%c0_205, %298, %c0_206, %c0_207], %301 {strides = array<i32>} : memref<1x8x4x32xf32, #tpu.memory_space<vmem>>, vector<1x1x4x32xf32>,
    %c5_i32 = arith.constant 5 : i32
    %c2_i32_208 = arith.constant 2 : i32
    %302 = arith.muli %c2_i32_208, %c5_i32 : i32
    %c7_i32_209 = arith.constant 7 : i32
    %303 = arith.subi %c7_i32_209, %302 : i32
    %304 = arith.muli %arg0, %303 : i32
    %305 = arith.addi %c5_i32, %304 : i32
    %c0_210 = arith.constant 0 : index
    %c0_211 = arith.constant 0 : index
    %306 = vector.load %arg6[%c0_210, %c0_211] : memref<4x32xf32, #tpu.memory_space<vmem>>, vector<4x32xf32>
    %c0_212 = arith.constant 0 : index
    %c0_213 = arith.constant 0 : index
    %c0_214 = arith.constant 0 : index
    %307 = vector.load %arg2[%c0_212, %c0_213, %c0_214] : memref<3x32x32xf32, #tpu.memory_space<vmem>>, vector<1x32x32xf32>
    %308 = vector.shape_cast %307 : vector<1x32x32xf32> to vector<32x32xf32>
    %cst_215 = arith.constant dense<0.000000e+00> : vector<4x32xf32>
    %309 = tpu.matmul %306, %308, %cst_215 {dimension_numbers = #tpu.dot_dimension_numbers<[1], [0], [0], [1], [0, 0, 1, 1], [], []>} : vector<4x32xf32>, vector<32x32xf32>, vector<4x32xf32> -> vector<4x32xf32>
    %c0_216 = arith.constant 0 : index
    %c0_217 = arith.constant 0 : index
    %c0_218 = arith.constant 0 : index
    %310 = vector.load %arg3[%c0_216, %c0_217, %c0_218] : memref<3x1x32xf32, #tpu.memory_space<vmem>>, vector<1x1x32xf32>
    %311 = vector.shape_cast %310 : vector<1x1x32xf32> to vector<1x32xf32>
    %312 = vector.broadcast %311 : vector<1x32xf32> to vector<4x32xf32>
    %313 = arith.addf %309, %312 : vector<4x32xf32>
    %c1_219 = arith.constant 1 : index
    %c0_220 = arith.constant 0 : index
    %c0_221 = arith.constant 0 : index
    %314 = vector.load %arg2[%c1_219, %c0_220, %c0_221] : memref<3x32x32xf32, #tpu.memory_space<vmem>>, vector<1x32x32xf32>
    %315 = vector.shape_cast %314 : vector<1x32x32xf32> to vector<32x32xf32>
    %cst_222 = arith.constant dense<0.000000e+00> : vector<4x32xf32>
    %316 = tpu.matmul %306, %315, %cst_222 {dimension_numbers = #tpu.dot_dimension_numbers<[1], [0], [0], [1], [0, 0, 1, 1], [], []>} : vector<4x32xf32>, vector<32x32xf32>, vector<4x32xf32> -> vector<4x32xf32>
    %c1_223 = arith.constant 1 : index
    %c0_224 = arith.constant 0 : index
    %c0_225 = arith.constant 0 : index
    %317 = vector.load %arg3[%c1_223, %c0_224, %c0_225] : memref<3x1x32xf32, #tpu.memory_space<vmem>>, vector<1x1x32xf32>
    %318 = vector.shape_cast %317 : vector<1x1x32xf32> to vector<1x32xf32>
    %319 = vector.broadcast %318 : vector<1x32xf32> to vector<4x32xf32>
    %320 = arith.addf %316, %319 : vector<4x32xf32>
    %c2_226 = arith.constant 2 : index
    %c0_227 = arith.constant 0 : index
    %c0_228 = arith.constant 0 : index
    %321 = vector.load %arg2[%c2_226, %c0_227, %c0_228] : memref<3x32x32xf32, #tpu.memory_space<vmem>>, vector<1x32x32xf32>
    %322 = vector.shape_cast %321 : vector<1x32x32xf32> to vector<32x32xf32>
    %cst_229 = arith.constant dense<0.000000e+00> : vector<4x32xf32>
    %323 = tpu.matmul %306, %322, %cst_229 {dimension_numbers = #tpu.dot_dimension_numbers<[1], [0], [0], [1], [0, 0, 1, 1], [], []>} : vector<4x32xf32>, vector<32x32xf32>, vector<4x32xf32> -> vector<4x32xf32>
    %c2_230 = arith.constant 2 : index
    %c0_231 = arith.constant 0 : index
    %c0_232 = arith.constant 0 : index
    %324 = vector.load %arg3[%c2_230, %c0_231, %c0_232] : memref<3x1x32xf32, #tpu.memory_space<vmem>>, vector<1x1x32xf32>
    %325 = vector.shape_cast %324 : vector<1x1x32xf32> to vector<1x32xf32>
    %326 = vector.broadcast %325 : vector<1x32xf32> to vector<4x32xf32>
    %327 = arith.addf %323, %326 : vector<4x32xf32>
    %c0_233 = arith.constant 0 : index
    %328 = arith.index_cast %305 : i32 to index
    %c0_234 = arith.constant 0 : index
    %c0_235 = arith.constant 0 : index
    %329 = vector.load %arg1[%c0_233, %328, %c0_234, %c0_235] : memref<3x8x4x32xf32, #tpu.memory_space<vmem>>, vector<1x1x4x32xf32>
    %330 = vector.shape_cast %329 : vector<1x1x4x32xf32> to vector<4x32xf32>
    %331 = arith.addf %330, %313 : vector<4x32xf32>
    %332 = arith.negf %331 : vector<4x32xf32>
    %333 = math.exp %332 : vector<4x32xf32>
    %cst_236 = arith.constant 1.000000e+00 : f32
    %334 = vector.broadcast %cst_236 : f32 to vector<4x32xf32>
    %335 = arith.addf %334, %333 : vector<4x32xf32>
    %336 = arith.divf %334, %335 : vector<4x32xf32>
    %c1_237 = arith.constant 1 : index
    %337 = arith.index_cast %305 : i32 to index
    %c0_238 = arith.constant 0 : index
    %c0_239 = arith.constant 0 : index
    %338 = vector.load %arg1[%c1_237, %337, %c0_238, %c0_239] : memref<3x8x4x32xf32, #tpu.memory_space<vmem>>, vector<1x1x4x32xf32>
    %339 = vector.shape_cast %338 : vector<1x1x4x32xf32> to vector<4x32xf32>
    %340 = arith.addf %339, %320 : vector<4x32xf32>
    %341 = arith.negf %340 : vector<4x32xf32>
    %342 = math.exp %341 : vector<4x32xf32>
    %cst_240 = arith.constant 1.000000e+00 : f32
    %343 = vector.broadcast %cst_240 : f32 to vector<4x32xf32>
    %344 = arith.addf %343, %342 : vector<4x32xf32>
    %345 = arith.divf %343, %344 : vector<4x32xf32>
    %c2_241 = arith.constant 2 : index
    %346 = arith.index_cast %305 : i32 to index
    %c0_242 = arith.constant 0 : index
    %c0_243 = arith.constant 0 : index
    %347 = vector.load %arg1[%c2_241, %346, %c0_242, %c0_243] : memref<3x8x4x32xf32, #tpu.memory_space<vmem>>, vector<1x1x4x32xf32>
    %348 = vector.shape_cast %347 : vector<1x1x4x32xf32> to vector<4x32xf32>
    %349 = arith.mulf %336, %327 : vector<4x32xf32>
    %350 = arith.addf %348, %349 : vector<4x32xf32>
    %351 = math.tanh %350 : vector<4x32xf32>
    %cst_244 = arith.constant 1.000000e+00 : f32
    %352 = vector.broadcast %cst_244 : f32 to vector<4x32xf32>
    %353 = arith.subf %352, %345 : vector<4x32xf32>
    %354 = arith.mulf %353, %351 : vector<4x32xf32>
    %355 = arith.mulf %345, %306 : vector<4x32xf32>
    %356 = arith.addf %354, %355 : vector<4x32xf32>
    %c0_245 = arith.constant 0 : index
    %c0_246 = arith.constant 0 : index
    %357 = vector.load %arg6[%c0_245, %c0_246] : memref<4x32xf32, #tpu.memory_space<vmem>>, vector<4x32xf32>
    tpu.vector_store %arg6[%c0_245, %c0_246], %356 {strides = array<i32>} : memref<4x32xf32, #tpu.memory_space<vmem>>, vector<4x32xf32>,
    %c0_247 = arith.constant 0 : index
    %358 = arith.index_cast %305 : i32 to index
    %c0_248 = arith.constant 0 : index
    %c0_249 = arith.constant 0 : index
    %359 = vector.load %arg4[%c0_247, %358, %c0_248, %c0_249] : memref<1x8x4x32xf32, #tpu.memory_space<vmem>>, vector<1x1x4x32xf32>
    %360 = vector.shape_cast %359 : vector<1x1x4x32xf32> to vector<4x32xf32>
    %361 = vector.shape_cast %356 : vector<4x32xf32> to vector<1x1x4x32xf32>
    tpu.vector_store %arg4[%c0_247, %358, %c0_248, %c0_249], %361 {strides = array<i32>} : memref<1x8x4x32xf32, #tpu.memory_space<vmem>>, vector<1x1x4x32xf32>,
    %c6_i32 = arith.constant 6 : i32
    %c2_i32_250 = arith.constant 2 : i32
    %362 = arith.muli %c2_i32_250, %c6_i32 : i32
    %c7_i32_251 = arith.constant 7 : i32
    %363 = arith.subi %c7_i32_251, %362 : i32
    %364 = arith.muli %arg0, %363 : i32
    %365 = arith.addi %c6_i32, %364 : i32
    %c0_252 = arith.constant 0 : index
    %c0_253 = arith.constant 0 : index
    %366 = vector.load %arg6[%c0_252, %c0_253] : memref<4x32xf32, #tpu.memory_space<vmem>>, vector<4x32xf32>
    %c0_254 = arith.constant 0 : index
    %c0_255 = arith.constant 0 : index
    %c0_256 = arith.constant 0 : index
    %367 = vector.load %arg2[%c0_254, %c0_255, %c0_256] : memref<3x32x32xf32, #tpu.memory_space<vmem>>, vector<1x32x32xf32>
    %368 = vector.shape_cast %367 : vector<1x32x32xf32> to vector<32x32xf32>
    %cst_257 = arith.constant dense<0.000000e+00> : vector<4x32xf32>
    %369 = tpu.matmul %366, %368, %cst_257 {dimension_numbers = #tpu.dot_dimension_numbers<[1], [0], [0], [1], [0, 0, 1, 1], [], []>} : vector<4x32xf32>, vector<32x32xf32>, vector<4x32xf32> -> vector<4x32xf32>
    %c0_258 = arith.constant 0 : index
    %c0_259 = arith.constant 0 : index
    %c0_260 = arith.constant 0 : index
    %370 = vector.load %arg3[%c0_258, %c0_259, %c0_260] : memref<3x1x32xf32, #tpu.memory_space<vmem>>, vector<1x1x32xf32>
    %371 = vector.shape_cast %370 : vector<1x1x32xf32> to vector<1x32xf32>
    %372 = vector.broadcast %371 : vector<1x32xf32> to vector<4x32xf32>
    %373 = arith.addf %369, %372 : vector<4x32xf32>
    %c1_261 = arith.constant 1 : index
    %c0_262 = arith.constant 0 : index
    %c0_263 = arith.constant 0 : index
    %374 = vector.load %arg2[%c1_261, %c0_262, %c0_263] : memref<3x32x32xf32, #tpu.memory_space<vmem>>, vector<1x32x32xf32>
    %375 = vector.shape_cast %374 : vector<1x32x32xf32> to vector<32x32xf32>
    %cst_264 = arith.constant dense<0.000000e+00> : vector<4x32xf32>
    %376 = tpu.matmul %366, %375, %cst_264 {dimension_numbers = #tpu.dot_dimension_numbers<[1], [0], [0], [1], [0, 0, 1, 1], [], []>} : vector<4x32xf32>, vector<32x32xf32>, vector<4x32xf32> -> vector<4x32xf32>
    %c1_265 = arith.constant 1 : index
    %c0_266 = arith.constant 0 : index
    %c0_267 = arith.constant 0 : index
    %377 = vector.load %arg3[%c1_265, %c0_266, %c0_267] : memref<3x1x32xf32, #tpu.memory_space<vmem>>, vector<1x1x32xf32>
    %378 = vector.shape_cast %377 : vector<1x1x32xf32> to vector<1x32xf32>
    %379 = vector.broadcast %378 : vector<1x32xf32> to vector<4x32xf32>
    %380 = arith.addf %376, %379 : vector<4x32xf32>
    %c2_268 = arith.constant 2 : index
    %c0_269 = arith.constant 0 : index
    %c0_270 = arith.constant 0 : index
    %381 = vector.load %arg2[%c2_268, %c0_269, %c0_270] : memref<3x32x32xf32, #tpu.memory_space<vmem>>, vector<1x32x32xf32>
    %382 = vector.shape_cast %381 : vector<1x32x32xf32> to vector<32x32xf32>
    %cst_271 = arith.constant dense<0.000000e+00> : vector<4x32xf32>
    %383 = tpu.matmul %366, %382, %cst_271 {dimension_numbers = #tpu.dot_dimension_numbers<[1], [0], [0], [1], [0, 0, 1, 1], [], []>} : vector<4x32xf32>, vector<32x32xf32>, vector<4x32xf32> -> vector<4x32xf32>
    %c2_272 = arith.constant 2 : index
    %c0_273 = arith.constant 0 : index
    %c0_274 = arith.constant 0 : index
    %384 = vector.load %arg3[%c2_272, %c0_273, %c0_274] : memref<3x1x32xf32, #tpu.memory_space<vmem>>, vector<1x1x32xf32>
    %385 = vector.shape_cast %384 : vector<1x1x32xf32> to vector<1x32xf32>
    %386 = vector.broadcast %385 : vector<1x32xf32> to vector<4x32xf32>
    %387 = arith.addf %383, %386 : vector<4x32xf32>
    %c0_275 = arith.constant 0 : index
    %388 = arith.index_cast %365 : i32 to index
    %c0_276 = arith.constant 0 : index
    %c0_277 = arith.constant 0 : index
    %389 = vector.load %arg1[%c0_275, %388, %c0_276, %c0_277] : memref<3x8x4x32xf32, #tpu.memory_space<vmem>>, vector<1x1x4x32xf32>
    %390 = vector.shape_cast %389 : vector<1x1x4x32xf32> to vector<4x32xf32>
    %391 = arith.addf %390, %373 : vector<4x32xf32>
    %392 = arith.negf %391 : vector<4x32xf32>
    %393 = math.exp %392 : vector<4x32xf32>
    %cst_278 = arith.constant 1.000000e+00 : f32
    %394 = vector.broadcast %cst_278 : f32 to vector<4x32xf32>
    %395 = arith.addf %394, %393 : vector<4x32xf32>
    %396 = arith.divf %394, %395 : vector<4x32xf32>
    %c1_279 = arith.constant 1 : index
    %397 = arith.index_cast %365 : i32 to index
    %c0_280 = arith.constant 0 : index
    %c0_281 = arith.constant 0 : index
    %398 = vector.load %arg1[%c1_279, %397, %c0_280, %c0_281] : memref<3x8x4x32xf32, #tpu.memory_space<vmem>>, vector<1x1x4x32xf32>
    %399 = vector.shape_cast %398 : vector<1x1x4x32xf32> to vector<4x32xf32>
    %400 = arith.addf %399, %380 : vector<4x32xf32>
    %401 = arith.negf %400 : vector<4x32xf32>
    %402 = math.exp %401 : vector<4x32xf32>
    %cst_282 = arith.constant 1.000000e+00 : f32
    %403 = vector.broadcast %cst_282 : f32 to vector<4x32xf32>
    %404 = arith.addf %403, %402 : vector<4x32xf32>
    %405 = arith.divf %403, %404 : vector<4x32xf32>
    %c2_283 = arith.constant 2 : index
    %406 = arith.index_cast %365 : i32 to index
    %c0_284 = arith.constant 0 : index
    %c0_285 = arith.constant 0 : index
    %407 = vector.load %arg1[%c2_283, %406, %c0_284, %c0_285] : memref<3x8x4x32xf32, #tpu.memory_space<vmem>>, vector<1x1x4x32xf32>
    %408 = vector.shape_cast %407 : vector<1x1x4x32xf32> to vector<4x32xf32>
    %409 = arith.mulf %396, %387 : vector<4x32xf32>
    %410 = arith.addf %408, %409 : vector<4x32xf32>
    %411 = math.tanh %410 : vector<4x32xf32>
    %cst_286 = arith.constant 1.000000e+00 : f32
    %412 = vector.broadcast %cst_286 : f32 to vector<4x32xf32>
    %413 = arith.subf %412, %405 : vector<4x32xf32>
    %414 = arith.mulf %413, %411 : vector<4x32xf32>
    %415 = arith.mulf %405, %366 : vector<4x32xf32>
    %416 = arith.addf %414, %415 : vector<4x32xf32>
    %c0_287 = arith.constant 0 : index
    %c0_288 = arith.constant 0 : index
    %417 = vector.load %arg6[%c0_287, %c0_288] : memref<4x32xf32, #tpu.memory_space<vmem>>, vector<4x32xf32>
    tpu.vector_store %arg6[%c0_287, %c0_288], %416 {strides = array<i32>} : memref<4x32xf32, #tpu.memory_space<vmem>>, vector<4x32xf32>,
    %c0_289 = arith.constant 0 : index
    %418 = arith.index_cast %365 : i32 to index
    %c0_290 = arith.constant 0 : index
    %c0_291 = arith.constant 0 : index
    %419 = vector.load %arg4[%c0_289, %418, %c0_290, %c0_291] : memref<1x8x4x32xf32, #tpu.memory_space<vmem>>, vector<1x1x4x32xf32>
    %420 = vector.shape_cast %419 : vector<1x1x4x32xf32> to vector<4x32xf32>
    %421 = vector.shape_cast %416 : vector<4x32xf32> to vector<1x1x4x32xf32>
    tpu.vector_store %arg4[%c0_289, %418, %c0_290, %c0_291], %421 {strides = array<i32>} : memref<1x8x4x32xf32, #tpu.memory_space<vmem>>, vector<1x1x4x32xf32>,
    %c7_i32_292 = arith.constant 7 : i32
    %c2_i32_293 = arith.constant 2 : i32
    %422 = arith.muli %c2_i32_293, %c7_i32_292 : i32
    %c7_i32_294 = arith.constant 7 : i32
    %423 = arith.subi %c7_i32_294, %422 : i32
    %424 = arith.muli %arg0, %423 : i32
    %425 = arith.addi %c7_i32_292, %424 : i32
    %c0_295 = arith.constant 0 : index
    %c0_296 = arith.constant 0 : index
    %426 = vector.load %arg6[%c0_295, %c0_296] : memref<4x32xf32, #tpu.memory_space<vmem>>, vector<4x32xf32>
    %c0_297 = arith.constant 0 : index
    %c0_298 = arith.constant 0 : index
    %c0_299 = arith.constant 0 : index
    %427 = vector.load %arg2[%c0_297, %c0_298, %c0_299] : memref<3x32x32xf32, #tpu.memory_space<vmem>>, vector<1x32x32xf32>
    %428 = vector.shape_cast %427 : vector<1x32x32xf32> to vector<32x32xf32>
    %cst_300 = arith.constant dense<0.000000e+00> : vector<4x32xf32>
    %429 = tpu.matmul %426, %428, %cst_300 {dimension_numbers = #tpu.dot_dimension_numbers<[1], [0], [0], [1], [0, 0, 1, 1], [], []>} : vector<4x32xf32>, vector<32x32xf32>, vector<4x32xf32> -> vector<4x32xf32>
    %c0_301 = arith.constant 0 : index
    %c0_302 = arith.constant 0 : index
    %c0_303 = arith.constant 0 : index
    %430 = vector.load %arg3[%c0_301, %c0_302, %c0_303] : memref<3x1x32xf32, #tpu.memory_space<vmem>>, vector<1x1x32xf32>
    %431 = vector.shape_cast %430 : vector<1x1x32xf32> to vector<1x32xf32>
    %432 = vector.broadcast %431 : vector<1x32xf32> to vector<4x32xf32>
    %433 = arith.addf %429, %432 : vector<4x32xf32>
    %c1_304 = arith.constant 1 : index
    %c0_305 = arith.constant 0 : index
    %c0_306 = arith.constant 0 : index
    %434 = vector.load %arg2[%c1_304, %c0_305, %c0_306] : memref<3x32x32xf32, #tpu.memory_space<vmem>>, vector<1x32x32xf32>
    %435 = vector.shape_cast %434 : vector<1x32x32xf32> to vector<32x32xf32>
    %cst_307 = arith.constant dense<0.000000e+00> : vector<4x32xf32>
    %436 = tpu.matmul %426, %435, %cst_307 {dimension_numbers = #tpu.dot_dimension_numbers<[1], [0], [0], [1], [0, 0, 1, 1], [], []>} : vector<4x32xf32>, vector<32x32xf32>, vector<4x32xf32> -> vector<4x32xf32>
    %c1_308 = arith.constant 1 : index
    %c0_309 = arith.constant 0 : index
    %c0_310 = arith.constant 0 : index
    %437 = vector.load %arg3[%c1_308, %c0_309, %c0_310] : memref<3x1x32xf32, #tpu.memory_space<vmem>>, vector<1x1x32xf32>
    %438 = vector.shape_cast %437 : vector<1x1x32xf32> to vector<1x32xf32>
    %439 = vector.broadcast %438 : vector<1x32xf32> to vector<4x32xf32>
    %440 = arith.addf %436, %439 : vector<4x32xf32>
    %c2_311 = arith.constant 2 : index
    %c0_312 = arith.constant 0 : index
    %c0_313 = arith.constant 0 : index
    %441 = vector.load %arg2[%c2_311, %c0_312, %c0_313] : memref<3x32x32xf32, #tpu.memory_space<vmem>>, vector<1x32x32xf32>
    %442 = vector.shape_cast %441 : vector<1x32x32xf32> to vector<32x32xf32>
    %cst_314 = arith.constant dense<0.000000e+00> : vector<4x32xf32>
    %443 = tpu.matmul %426, %442, %cst_314 {dimension_numbers = #tpu.dot_dimension_numbers<[1], [0], [0], [1], [0, 0, 1, 1], [], []>} : vector<4x32xf32>, vector<32x32xf32>, vector<4x32xf32> -> vector<4x32xf32>
    %c2_315 = arith.constant 2 : index
    %c0_316 = arith.constant 0 : index
    %c0_317 = arith.constant 0 : index
    %444 = vector.load %arg3[%c2_315, %c0_316, %c0_317] : memref<3x1x32xf32, #tpu.memory_space<vmem>>, vector<1x1x32xf32>
    %445 = vector.shape_cast %444 : vector<1x1x32xf32> to vector<1x32xf32>
    %446 = vector.broadcast %445 : vector<1x32xf32> to vector<4x32xf32>
    %447 = arith.addf %443, %446 : vector<4x32xf32>
    %c0_318 = arith.constant 0 : index
    %448 = arith.index_cast %425 : i32 to index
    %c0_319 = arith.constant 0 : index
    %c0_320 = arith.constant 0 : index
    %449 = vector.load %arg1[%c0_318, %448, %c0_319, %c0_320] : memref<3x8x4x32xf32, #tpu.memory_space<vmem>>, vector<1x1x4x32xf32>
    %450 = vector.shape_cast %449 : vector<1x1x4x32xf32> to vector<4x32xf32>
    %451 = arith.addf %450, %433 : vector<4x32xf32>
    %452 = arith.negf %451 : vector<4x32xf32>
    %453 = math.exp %452 : vector<4x32xf32>
    %cst_321 = arith.constant 1.000000e+00 : f32
    %454 = vector.broadcast %cst_321 : f32 to vector<4x32xf32>
    %455 = arith.addf %454, %453 : vector<4x32xf32>
    %456 = arith.divf %454, %455 : vector<4x32xf32>
    %c1_322 = arith.constant 1 : index
    %457 = arith.index_cast %425 : i32 to index
    %c0_323 = arith.constant 0 : index
    %c0_324 = arith.constant 0 : index
    %458 = vector.load %arg1[%c1_322, %457, %c0_323, %c0_324] : memref<3x8x4x32xf32, #tpu.memory_space<vmem>>, vector<1x1x4x32xf32>
    %459 = vector.shape_cast %458 : vector<1x1x4x32xf32> to vector<4x32xf32>
    %460 = arith.addf %459, %440 : vector<4x32xf32>
    %461 = arith.negf %460 : vector<4x32xf32>
    %462 = math.exp %461 : vector<4x32xf32>
    %cst_325 = arith.constant 1.000000e+00 : f32
    %463 = vector.broadcast %cst_325 : f32 to vector<4x32xf32>
    %464 = arith.addf %463, %462 : vector<4x32xf32>
    %465 = arith.divf %463, %464 : vector<4x32xf32>
    %c2_326 = arith.constant 2 : index
    %466 = arith.index_cast %425 : i32 to index
    %c0_327 = arith.constant 0 : index
    %c0_328 = arith.constant 0 : index
    %467 = vector.load %arg1[%c2_326, %466, %c0_327, %c0_328] : memref<3x8x4x32xf32, #tpu.memory_space<vmem>>, vector<1x1x4x32xf32>
    %468 = vector.shape_cast %467 : vector<1x1x4x32xf32> to vector<4x32xf32>
    %469 = arith.mulf %456, %447 : vector<4x32xf32>
    %470 = arith.addf %468, %469 : vector<4x32xf32>
    %471 = math.tanh %470 : vector<4x32xf32>
    %cst_329 = arith.constant 1.000000e+00 : f32
    %472 = vector.broadcast %cst_329 : f32 to vector<4x32xf32>
    %473 = arith.subf %472, %465 : vector<4x32xf32>
    %474 = arith.mulf %473, %471 : vector<4x32xf32>
    %475 = arith.mulf %465, %426 : vector<4x32xf32>
    %476 = arith.addf %474, %475 : vector<4x32xf32>
    %c0_330 = arith.constant 0 : index
    %c0_331 = arith.constant 0 : index
    %477 = vector.load %arg6[%c0_330, %c0_331] : memref<4x32xf32, #tpu.memory_space<vmem>>, vector<4x32xf32>
    tpu.vector_store %arg6[%c0_330, %c0_331], %476 {strides = array<i32>} : memref<4x32xf32, #tpu.memory_space<vmem>>, vector<4x32xf32>,
    %c0_332 = arith.constant 0 : index
    %478 = arith.index_cast %425 : i32 to index
    %c0_333 = arith.constant 0 : index
    %c0_334 = arith.constant 0 : index
    %479 = vector.load %arg4[%c0_332, %478, %c0_333, %c0_334] : memref<1x8x4x32xf32, #tpu.memory_space<vmem>>, vector<1x1x4x32xf32>
    %480 = vector.shape_cast %479 : vector<1x1x4x32xf32> to vector<4x32xf32>
    %481 = vector.shape_cast %476 : vector<4x32xf32> to vector<1x1x4x32xf32>
    tpu.vector_store %arg4[%c0_332, %478, %c0_333, %c0_334], %481 {strides = array<i32>} : memref<1x8x4x32xf32, #tpu.memory_space<vmem>>, vector<1x1x4x32xf32>,
    %c8_i32 = arith.constant 8 : i32
    %c0_335 = arith.constant 0 : index
    %c0_336 = arith.constant 0 : index
    %482 = vector.load %arg6[%c0_335, %c0_336] : memref<4x32xf32, #tpu.memory_space<vmem>>, vector<4x32xf32>
    %c0_337 = arith.constant 0 : index
    %c0_338 = arith.constant 0 : index
    %c0_339 = arith.constant 0 : index
    %483 = vector.load %arg5[%c0_337, %c0_338, %c0_339] : memref<1x4x32xf32, #tpu.memory_space<vmem>>, vector<1x4x32xf32>
    %484 = vector.shape_cast %483 : vector<1x4x32xf32> to vector<4x32xf32>
    %485 = vector.shape_cast %482 : vector<4x32xf32> to vector<1x4x32xf32>
    tpu.vector_store %arg5[%c0_337, %c0_338, %c0_339], %485 {strides = array<i32>} : memref<1x4x32xf32, #tpu.memory_space<vmem>>, vector<1x4x32xf32>,
    return
  }
  func.func @transform_0(%arg0: i32) -> (i32, i32, i32, i32) {
    %c0_i32 = arith.constant 0 : i32
    %c0_i32_0 = arith.constant 0 : i32
    %c0_i32_1 = arith.constant 0 : i32
    %c0_i32_2 = arith.constant 0 : i32
    return %arg0, %c0_i32, %c0_i32_0, %c0_i32_1 : i32, i32, i32, i32
  }
  func.func @transform_1(%arg0: i32) -> (i32, i32, i32) {
    %c0_i32 = arith.constant 0 : i32
    %c0_i32_0 = arith.constant 0 : i32
    %c0_i32_1 = arith.constant 0 : i32
    return %arg0, %c0_i32, %c0_i32_0 : i32, i32, i32
  }
  func.func @transform_2(%arg0: i32) -> (i32, i32, i32) {
    %c0_i32 = arith.constant 0 : i32
    %c0_i32_0 = arith.constant 0 : i32
    %c0_i32_1 = arith.constant 0 : i32
    return %arg0, %c0_i32, %c0_i32_0 : i32, i32, i32
  }
  func.func @transform_3(%arg0: i32) -> (i32, i32, i32, i32) {
    %c0_i32 = arith.constant 0 : i32
    %c0_i32_0 = arith.constant 0 : i32
    %c0_i32_1 = arith.constant 0 : i32
    %c0_i32_2 = arith.constant 0 : i32
    return %arg0, %c0_i32, %c0_i32_0, %c0_i32_1 : i32, i32, i32, i32
  }
  func.func @transform_4(%arg0: i32) -> (i32, i32, i32) {
    %c0_i32 = arith.constant 0 : i32
    %c0_i32_0 = arith.constant 0 : i32
    %c0_i32_1 = arith.constant 0 : i32
    return %arg0, %c0_i32, %c0_i32_0 : i32, i32, i32
  }
}

</mosaic_0001>

<bundles_post_ra>
// kernel: rnn_encoder_forward.2
= control target key start
LH: loop header
LB: loop body
LE: loop exit
PB: predicated region body
PF: predicated region fallthrough
CT: control target
= control target key end

     0   :  { %s3611_s15 = smov 0   ;;  %s3980_s0 = inlined_call_operand.vmem [shape: f32[6,8,4,32], index: 0, kind: input, shape index: {}]   ;;  %s3981_s1 = inlined_call_operand.vmem [shape: f32[6,32,32], index: 1, kind: input, shape index: {}]   ;;  %s3982_s2 = inlined_call_operand.vmem [shape: f32[6,1,32], index: 2, kind: input, shape index: {}]   ;;  %s3983_s3 = inlined_call_operand.vmem [shape: f32[2,8,4,32], index: 3, kind: output, shape index: {0}]   ;;  %s3984_s4 = inlined_call_operand.vmem [shape: f32[2,4,32], index: 4, kind: output, shape index: {1}]  }
   0x1 LB: > { %s3617_s16 = sadd.s32 4294967295, %s3581_s15   ;;  %p2743_p0 = scmp.ge.s32.totalorder %s3581_s15, 1  ;;  %s3581_s15 = sphi %s3611_s15, %s15_s15  }
   0x2   : > { %p189_p1 = scmp.lt.s32.totalorder %s3581_s15, 3 }
   0x4   : > { %p190_p2 = pnand %p2743_p0, %p189_p1 }
   0x5   : > { %s230_s17 = smul.u32 (!%p190_p2), 3, %s3617_s16  ;;  %vm258_vm0 = vcmask (!%p190_p2), 257024   ;;  %v3583_v0 = vmov (!%p190_p2), 0.0|0.0   ;;  %vm3584_vm1 = vmmov (!%p190_p2), 0   ;;  %v3585_v1 = vmov (!%p190_p2), 0.0   ;;  %p249_p4 = scmp.lt.s32.totalorder (!%p190_p2), %s3617_s16, 1 }
   0x6   : > { %193 = sbr.rel (%p190_p2) target bundleno = 2179 (0x883), region = 32  ;;  %3340 = vmatprep.subr.bf16.mxu0 (!%p190_p2), %v3583_v0  ;;  %3084 = vmatprep.mubr.msk.f32.mxu0 (!%p190_p2), %vm3584_vm1, %v3585_v1  ;;  %259 = vst.msk [vmem:[#allocation2] sm:$0xf] (!%p190_p2), %vm258_vm0, %v3585_v1  ;;  %vm273_vm2 = vcmask (!%p190_p2), 261120  }
   0x7   : > { %p231_p3 = scmp.lt.s32.totalorder (!%p190_p2), %s230_s17, 5  ;;  %3346 = vmatprep.subr.bf16.mxu1 (!%p190_p2), %v3583_v0  ;;  %3095 = vmatprep.mubr.msk.f32.mxu1 (!%p190_p2), %vm3584_vm1, %v3585_v1  ;;  %s2767_s22 = smul.u32 (!%p190_p2), 28, %s3617_s16 }
   0x8   : > { %s2788_s10 = smul.u32 (!%p190_p2), 20, %s3617_s16 }
   0x9   : > { %s2814_s13 = smul.u32 (!%p190_p2), 12, %s3617_s16 }
   0xa   : > { %s2889_s27 = smul.u32 (!%p190_p2), 4294967284, %s3617_s16 }
   0xb   : > { %s2915_s6 = smul.u32 (!%p190_p2), 4294967276, %s3617_s16 }
   0xd   : > { %s3986_s17 = smov (!%p231_p3, %s230_s17), 5  ;;  %v3663_v16 = vld [vmem:[#allocation2] sm:$0xf] }
   0xe   : > { %s2953_s18 = sshll.u32 %s3986_s17, 5  ;;  %s3710_s28 = scalar_lea.vmem %s3982_s2, %s3986_s17 }
   0xf   : > { %s3638_s21 = scalar_lea.vmem %s3981_s1, %s2953_s18  ;;  %s3704_s25 = scalar_lea.vmem %s3980_s0, %s2953_s18  ;;  %v3716_v21 = vld [vmem:[%s3710_s28] ss:$0 sm:$0xff]  ;;  %v3719_v24 = vld [vmem:[%s3710_s28 + $0x1] ss:$0 sm:$0xff]  ;;  %v3724_v40 = vld [vmem:[%s3710_s28 + $0x2] ss:$0 sm:$0xff] }
  0x10   : > { %v262_v2 = vld [vmem:[%s3638_s21] sm:$0xff]  ;;  %v263_v3 = vld [vmem:[%s3638_s21 + $0x8] sm:$0xff]  ;;  %v264_v4 = vld [vmem:[%s3638_s21 + $0x10] sm:$0xff]  ;;  %s514_s29 = scalar_lea.vmem %s3704_s25, %s2767_s22  ;;  %s2590_s11 = scalar_lea.vmem %s3704_s25, %s2788_s10 }
  0x11   : > { %v3643_v5 = vpack.c.bf16 %v263_v3, %v262_v2  ;;  %v265_v6 = vld [vmem:[%s3638_s21 + $0x18] sm:$0xff]  ;;  %v2753_v7 = vld [vmem:[%s3638_s21 + $0x20] sm:$0xff]  ;;  %v2754_v8 = vld [vmem:[%s3638_s21 + $0x28] sm:$0xff]  ;;  %s3729_s30 = scalar_select %p249_p4, %s3617_s16, 1 }
  0x12   : > { %v2755_v9 = vld [vmem:[%s3638_s21 + $0x30] sm:$0xff]  ;;  %v2756_v10 = vld [vmem:[%s3638_s21 + $0x38] sm:$0xff]  ;;  %v3651_v11 = vpack.c.bf16 %v265_v6, %v264_v4  ;;  %v3653_v12 = vpack.c.bf16 %v2754_v8, %v2753_v7  ;;  %v2760_v13 = vld [vmem:[%s3638_s21 + $0x40] sm:$0xff]  ;;  %s2606_s14 = scalar_lea.vmem %s3704_s25, %s2814_s13  ;;  %s2840_s18 = sshll.u32 %s3617_s16, 2 }
  0x13   : > { %3342 = vmatpush3.bf16.msra.mxu0 %v3643_v5  ;;  %v2761_v14 = vld [vmem:[%s3638_s21 + $0x48] sm:$0xff]  ;;  %v3659_v15 = vpack.c.bf16 %v2756_v10, %v2755_v9  ;;  %v2762_v18 = vld [vmem:[%s3638_s21 + $0x50] sm:$0xff]  ;;  %v2763_v19 = vld [vmem:[%s3638_s21 + $0x58] sm:$0xff]  ;;  %s2955_s5 = sshll.u32 %s3729_s30, 5  ;;  %s2621_s19 = scalar_lea.vmem %s3704_s25, %s2840_s18 }
  0x14   : > { %3343 = vmatprep.subr.bf16.mxu0 %v3583_v0  ;;  %3348 = vmatpush3.bf16.msra.mxu1 %v3653_v12  ;;  %v3665_v17 = vpack.c.bf16 %v2761_v14, %v2760_v13  ;;  %v3675_v20 = vpack.c.bf16 %v2763_v19, %v2762_v18  ;;  %v515_v23 = vld [vmem:[%s514_s29] sm:$0xf]  ;;  %s3735_s8 = scalar_lea.vmem %s3983_s3, %s2955_s5  ;;  %v2789_v55 = vld [vmem:[%s2590_s11 + $0x4] sm:$0xf]  ;;  %s2660_s7 = scalar_lea.vmem %s3704_s25, %s2915_s6 }
  0x15   : > { %3349 = vmatprep.subr.bf16.mxu1 %v3583_v0  ;;  %v2769_v28 = vld [vmem:[%s514_s29 + $0x20] sm:$0xf]  ;;  %s544_s9 = scalar_lea.vmem %s3735_s8, %s2767_s22  ;;  %v2792_v62 = vld [vmem:[%s2590_s11 + $0x24] sm:$0xf]  ;;  %s2602_s12 = scalar_lea.vmem %s3735_s8, %s2788_s10 }
  0x16   : > { %v2771_v44 = vld [vmem:[%s514_s29 + $0x40] sm:$0xf]  ;;  %s2618_s17 = scalar_lea.vmem %s3735_s8, %s2814_s13  ;;  %s2630_s20 = scalar_lea.vmem %s3735_s8, %s2840_s18 }
  0x17   : > { %3345 = vmatpush3.bf16.msra.mxu0 %v3651_v11  ;;  %s1391_s22 = ssub.s32 4, %s3617_s16  ;;  %s2644_s29 = scalar_lea.vmem %s3704_s25, %s2889_s27 }
  0x18   : > { %3352 = vmatprep.subr.bf16.mxu0 %v3583_v0  ;;  %3351 = vmatpush3.bf16.msra.mxu1 %v3659_v15  ;;  %s3864_s23 = sshll.u32 %s1391_s22, 2  ;;  %s2656_s5 = scalar_lea.vmem %s3735_s8, %s2889_s27 }
  0x19   : > { %3358 = vmatprep.subr.bf16.mxu1 %v3583_v0  ;;  %s1640_s24 = scalar_lea.vmem %s3704_s25, %s3864_s23  ;;  %s1670_s26 = scalar_lea.vmem %s3735_s8, %s3864_s23 }
  0x1a   : > { %3085 = vmatmul.mubr.msk.f32.vlgmr.msra.gmra.mrb[0].mxu0 %vm273_vm2, %v3663_v16  ;;  %s2941_s10 = smul.u32 4294967268, %s3617_s16 }
  0x1b   : > { %3354 = vmatpush3.bf16.msra.mxu0 %v3665_v17  ;;  %3106 = vmatprep.mubr.msk.f32.mxu0 %vm3584_vm1, %v3585_v1 }
  0x1c   : > { %3096 = vmatmul.mubr.msk.f32.vlgmr.msra.gmra.mrb[0].mxu1 %vm273_vm2, %v3663_v16  ;;  %3355 = vmatprep.subr.bf16.mxu0 %v3583_v0 }
  0x1d   : > { %3360 = vmatpush3.bf16.msra.mxu1 %v3643_v5  ;;  %3117 = vmatprep.mubr.msk.f32.mxu1 %vm3584_vm1, %v3585_v1 }
  0x1e   : > { %3361 = vmatprep.subr.bf16.mxu1 %v3583_v0 }
  0x1f   : > { %3357 = vmatpush3.bf16.msra.mxu0 %v3675_v20 }
  0x20   : > { %3364 = vmatprep.subr.bf16.mxu0 %v3583_v0 }
  0x21   : > { %3363 = vmatpush3.bf16.msra.mxu1 %v3651_v11 }
  0x22   : > { %3107 = vmatmul.mubr.msk.f32.vlgmr.msra.gmra.mrb[2].mxu0 %vm273_vm2, %v3663_v16  ;;  %3370 = vmatprep.subr.bf16.mxu1 %v3583_v0 }
  0x23   : > { %3366 = vmatpush3.bf16.msra.mxu0 %v3653_v12  ;;  %3128 = vmatprep.mubr.msk.f32.mxu0 %vm3584_vm1, %v3585_v1 }
  0x24   : > { %3367 = vmatprep.subr.bf16.mxu0 %v3583_v0 }
  0x27   : > { %3369 = vmatpush3.bf16.msra.mxu0 %v3659_v15 }
  0x28   : > { %3376 = vmatprep.subr.bf16.mxu0 %v3583_v0 }
  0xed   : > { %v343_v22 = vpop.f32.mrb[0].mxu0 }
  0xee   : > { %v344_v25 = vadd.f32 %v3716_v21, %v343_v22  ;;  %v3086_v26 = vpop.f32.mrb[1].mxu0 }
  0xef   : > { %v426_v27 = vpop.f32.mrb[0].mxu1 }
  0xf0   : > { %v516_v29 = vadd.f32 %v515_v23, %v344_v25  ;;  %v427_v30 = vadd.f32 %v3719_v24, %v426_v27  ;;  %v3097_v31 = vpop.f32.mrb[1].mxu1 }
  0xf1   : > { %v2815_v31 = vld [vmem:[%s2606_s14 + $0x8] sm:$0xf] }
  0xf2   : > { %v2768_v32 = vmul.f32 -1.442695, %v516_v29  ;;  %v526_v33 = vadd.f32 %v2769_v28, %v427_v30 }
  0xf4   : > { %3495 = vpow2.f32 %v2768_v32  ;;  %v2770_v34 = vmul.f32 -1.442695, %v526_v33 }
  0xf5   : > { %v509_v35 = vpop.f32.mrb[2].mxu0 }
  0xf6   : > { %v3108_v36 = vpop.f32.mrb[3].mxu0  ;;  %3497 = vpow2.f32 %v2770_v34  ;;  %v510_v42 = vadd.f32 %v3724_v40, %v509_v35 }
  0xfe   : > { %v3496_v37 = vpop.eup %3495 }
  0xff   : > { %v520_v38 = vadd.f32 1.0, %v3496_v37 }
 0x100   : > { %v3498_v39 = vpop.eup %3497 }
 0x101   : > { %3499 = vrcp.f32 %v520_v38  ;;  %v530_v41 = vadd.f32 1.0, %v3498_v39  ;;  %v2818_v38 = vld [vmem:[%s2606_s14 + $0x28] sm:$0xf] }
 0x103   : > { %3501 = vrcp.f32 %v530_v41 }
 0x10b   : > { %v3500_v43 = vpop.eup %3499 }
 0x10c   : > { %v536_v45 = vmul.f32 %v3500_v43, %v510_v42 }
 0x10d   : > { %v3502_v47 = vpop.eup %3501 }
 0x10e   : > { %v537_v46 = vadd.f32 %v2771_v44, %v536_v45  ;;  %v539_v48 = vsub.f32 1.0, %v3502_v47  ;;  %v541_v50 = vmul.f32 %v3502_v47, %v3663_v16  ;;  %v2795_v16 = vld [vmem:[%s2590_s11 + $0x44] sm:$0xf]  ;;  %s2676_s11 = scalar_lea.vmem %s3704_s25, %s2941_s10  ;;  %s2750_s25 = sshll.u32 %s3729_s30, 2 }
 0x10f   : > { %s257_s13 = scalar_lea.vmem %s3984_s4, %s2750_s25 }
 0x110   : > { %3503 = vtanh.f32 %v537_v46 }
 0x11a   : > { %v3504_v49 = vpop.eup %3503 }
 0x11b   : > { %v540_v51 = vmul.f32 %v3504_v49, %v539_v48 }
 0x11d   : > { %v542_v52 = vadd.f32 %v541_v50, %v540_v51  ;;  %v2821_v51 = vld [vmem:[%s2606_s14 + $0x48] sm:$0xf] }
 0x11f   : > { %543 = vst.msk [vmem:[#allocation2] sm:$0xf] %vm258_vm0, %v542_v52  ;;  %545 = vst.msk [vmem:[%s544_s9] sm:$0xf] %vm258_vm0, %v542_v52  ;;  %s2672_s9 = scalar_lea.vmem %s3735_s8, %s2915_s6 }
 0x126   : > { %v548_v53 = vld [vmem:[#allocation2] sm:$0xf] }
 0x127   : > { %3118 = vmatmul.mubr.msk.f32.vlgmr.msra.gmra.mrb[2].mxu1 %vm273_vm2, %v548_v53  ;;  %3129 = vmatmul.mubr.msk.f32.vlgmr.msra.gmra.mrb[4].mxu0 %vm273_vm2, %v548_v53 }
 0x128   : > { %3372 = vmatpush3.bf16.msra.mxu1 %v3665_v17  ;;  %3139 = vmatprep.mubr.msk.f32.mxu1 %vm3584_vm1, %v3585_v1 }
 0x129   : > { %3373 = vmatprep.subr.bf16.mxu1 %v3583_v0  ;;  %3378 = vmatpush3.bf16.msra.mxu0 %v3643_v5 }
 0x12a   : > { %3379 = vmatprep.subr.bf16.mxu0 %v3583_v0  ;;  %3150 = vmatprep.mubr.msk.f32.mxu0 %vm3584_vm1, %v3585_v1 }
 0x12c   : > { %3375 = vmatpush3.bf16.msra.mxu1 %v3675_v20 }
 0x12d   : > { %3382 = vmatprep.subr.bf16.mxu1 %v3583_v0  ;;  %3381 = vmatpush3.bf16.msra.mxu0 %v3651_v11 }
 0x12e   : > { %3388 = vmatprep.subr.bf16.mxu0 %v3583_v0 }
 0x12f   : > { %3140 = vmatmul.mubr.msk.f32.vlgmr.msra.gmra.mrb[4].mxu1 %vm273_vm2, %v548_v53 }
 0x130   : > { %3384 = vmatpush3.bf16.msra.mxu1 %v3653_v12  ;;  %3161 = vmatprep.mubr.msk.f32.mxu1 %vm3584_vm1, %v3585_v1 }
 0x131   : > { %3385 = vmatprep.subr.bf16.mxu1 %v3583_v0 }
 0x134   : > { %3387 = vmatpush3.bf16.msra.mxu1 %v3659_v15 }
 0x135   : > { %3394 = vmatprep.subr.bf16.mxu1 %v3583_v0 }
 0x1fa   : > { %v629_v54 = vpop.f32.mrb[2].mxu1  ;;  %v710_v56 = vpop.f32.mrb[4].mxu0 }
 0x1fb   : > { %v630_v57 = vadd.f32 %v3716_v21, %v629_v54  ;;  %v3119_v58 = vpop.f32.mrb[3].mxu1  ;;  %v3130_v59 = vpop.f32.mrb[5].mxu0  ;;  %v711_v60 = vadd.f32 %v3719_v24, %v710_v56 }
 0x1fd   : > { %v798_v61 = vadd.f32 %v2789_v55, %v630_v57  ;;  %v808_v2 = vadd.f32 %v2792_v62, %v711_v60  ;;  %v2841_v62 = vld [vmem:[%s2621_s19 + $0xc] sm:$0xf] }
 0x1ff   : > { %v2790_v63 = vmul.f32 -1.442695, %v798_v61  ;;  %v2793_v6 = vmul.f32 -1.442695, %v808_v2 }
 0x201   : > { %3505 = vpow2.f32 %v2790_v63 }
 0x202   : > { %v791_v3 = vpop.f32.mrb[4].mxu1  ;;  %3507 = vpow2.f32 %v2793_v6 }
 0x203   : > { %v3141_v4 = vpop.f32.mrb[5].mxu1  ;;  %v792_v13 = vadd.f32 %v3724_v40, %v791_v3 }
 0x20b   : > { %v3506_v7 = vpop.eup %3505 }
 0x20c   : > { %v802_v8 = vadd.f32 1.0, %v3506_v7  ;;  %v3508_v9 = vpop.eup %3507 }
 0x20d   : > { %v812_v10 = vadd.f32 1.0, %v3508_v9 }
 0x20e   : > { %3509 = vrcp.f32 %v802_v8  ;;  %v2844_v8 = vld [vmem:[%s2621_s19 + $0x2c] sm:$0xf] }
 0x20f   : > { %3511 = vrcp.f32 %v812_v10 }
 0x218   : > { %v3510_v14 = vpop.eup %3509 }
 0x219   : > { %v818_v18 = vmul.f32 %v3510_v14, %v792_v13  ;;  %v3512_v22 = vpop.eup %3511 }
 0x21a   : > { %v821_v23 = vsub.f32 1.0, %v3512_v22  ;;  %v823_v26 = vmul.f32 %v3512_v22, %v548_v53 }
 0x21b   : > { %v819_v19 = vadd.f32 %v2795_v16, %v818_v18 }
 0x21d   : > { %3513 = vtanh.f32 %v819_v19 }
 0x227   : > { %v3514_v25 = vpop.eup %3513 }
 0x228   : > { %v822_v27 = vmul.f32 %v3514_v25, %v821_v23 }
 0x22a   : > { %v824_v28 = vadd.f32 %v823_v26, %v822_v27  ;;  %v2847_v27 = vld [vmem:[%s2621_s19 + $0x4c] sm:$0xf] }
 0x22c   : > { %825 = vst.msk [vmem:[#allocation2] sm:$0xf] %vm258_vm0, %v824_v28  ;;  %2797 = vst.msk [vmem:[%s2602_s12 + $0x4] sm:$0xf] %vm258_vm0, %v824_v28 }
 0x233   : > { %v830_v29 = vld [vmem:[#allocation2] sm:$0xf] }
 0x234   : > { %3151 = vmatmul.mubr.msk.f32.vlgmr.msra.gmra.mrb[6].mxu0 %vm273_vm2, %v830_v29  ;;  %3162 = vmatmul.mubr.msk.f32.vlgmr.msra.gmra.mrb[6].mxu1 %vm273_vm2, %v830_v29 }
 0x235   : > { %3390 = vmatpush3.bf16.msra.mxu0 %v3665_v17  ;;  %3172 = vmatprep.mubr.msk.f32.mxu0 %vm3584_vm1, %v3585_v1 }
 0x236   : > { %3391 = vmatprep.subr.bf16.mxu0 %v3583_v0  ;;  %3396 = vmatpush3.bf16.msra.mxu1 %v3643_v5 }
 0x237   : > { %3397 = vmatprep.subr.bf16.mxu1 %v3583_v0  ;;  %3183 = vmatprep.mubr.msk.f32.mxu1 %vm3584_vm1, %v3585_v1 }
 0x239   : > { %3393 = vmatpush3.bf16.msra.mxu0 %v3675_v20 }
 0x23a   : > { %3400 = vmatprep.subr.bf16.mxu0 %v3583_v0  ;;  %3399 = vmatpush3.bf16.msra.mxu1 %v3651_v11 }
 0x23b   : > { %3406 = vmatprep.subr.bf16.mxu1 %v3583_v0 }
 0x23c   : > { %3173 = vmatmul.mubr.msk.f32.vlgmr.msra.gmra.mrb[8].mxu0 %vm273_vm2, %v830_v29 }
 0x23d   : > { %3402 = vmatpush3.bf16.msra.mxu0 %v3653_v12  ;;  %3194 = vmatprep.mubr.msk.f32.mxu0 %vm3584_vm1, %v3585_v1 }
 0x23e   : > { %3403 = vmatprep.subr.bf16.mxu0 %v3583_v0 }
 0x241   : > { %3405 = vmatpush3.bf16.msra.mxu0 %v3659_v15 }
 0x242   : > { %3412 = vmatprep.subr.bf16.mxu0 %v3583_v0 }
 0x307   : > { %v911_v30 = vpop.f32.mrb[6].mxu0  ;;  %v992_v32 = vpop.f32.mrb[6].mxu1 }
 0x308   : > { %v912_v33 = vadd.f32 %v3716_v21, %v911_v30  ;;  %v3152_v34 = vpop.f32.mrb[7].mxu0  ;;  %v3163_v35 = vpop.f32.mrb[7].mxu1  ;;  %v993_v36 = vadd.f32 %v3719_v24, %v992_v32 }
 0x30a   : > { %v1080_v37 = vadd.f32 %v2815_v31, %v912_v33  ;;  %v1090_v41 = vadd.f32 %v2818_v38, %v993_v36  ;;  %v1641_v38 = vld [vmem:[%s1640_s24] sm:$0xf] }
 0x30c   : > { %v2816_v39 = vmul.f32 -1.442695, %v1080_v37  ;;  %v2819_v44 = vmul.f32 -1.442695, %v1090_v41 }
 0x30e   : > { %3515 = vpow2.f32 %v2816_v39 }
 0x30f   : > { %v1073_v42 = vpop.f32.mrb[8].mxu0  ;;  %3517 = vpow2.f32 %v2819_v44 }
 0x310   : > { %v3174_v43 = vpop.f32.mrb[9].mxu0  ;;  %v1074_v49 = vadd.f32 %v3724_v40, %v1073_v42 }
 0x318   : > { %v3516_v45 = vpop.eup %3515 }
 0x319   : > { %v1084_v46 = vadd.f32 1.0, %v3516_v45  ;;  %v3518_v47 = vpop.eup %3517 }
 0x31a   : > { %v1094_v48 = vadd.f32 1.0, %v3518_v47 }
 0x31b   : > { %3519 = vrcp.f32 %v1084_v46  ;;  %v2869_v46 = vld [vmem:[%s1640_s24 + $0x20] sm:$0xf] }
 0x31c   : > { %3521 = vrcp.f32 %v1094_v48 }
 0x325   : > { %v3520_v50 = vpop.eup %3519 }
 0x326   : > { %v1100_v52 = vmul.f32 %v3520_v50, %v1074_v49  ;;  %v3522_v54 = vpop.eup %3521 }
 0x327   : > { %v1103_v55 = vsub.f32 1.0, %v3522_v54  ;;  %v1105_v57 = vmul.f32 %v3522_v54, %v830_v29 }
 0x328   : > { %v1101_v53 = vadd.f32 %v2821_v51, %v1100_v52 }
 0x32a   : > { %3523 = vtanh.f32 %v1101_v53 }
 0x334   : > { %v3524_v56 = vpop.eup %3523 }
 0x335   : > { %v1104_v58 = vmul.f32 %v3524_v56, %v1103_v55 }
 0x337   : > { %v1106_v59 = vadd.f32 %v1105_v57, %v1104_v58  ;;  %v2872_v58 = vld [vmem:[%s1640_s24 + $0x40] sm:$0xf] }
 0x339   : > { %1107 = vst.msk [vmem:[#allocation2] sm:$0xf] %vm258_vm0, %v1106_v59  ;;  %2823 = vst.msk [vmem:[%s2618_s17 + $0x8] sm:$0xf] %vm258_vm0, %v1106_v59 }
 0x340   : > { %v1111_v60 = vld [vmem:[#allocation2] sm:$0xf] }
 0x341   : > { %3184 = vmatmul.mubr.msk.f32.vlgmr.msra.gmra.mrb[8].mxu1 %vm273_vm2, %v1111_v60  ;;  %3195 = vmatmul.mubr.msk.f32.vlgmr.msra.gmra.mrb[10].mxu0 %vm273_vm2, %v1111_v60 }
 0x342   : > { %3408 = vmatpush3.bf16.msra.mxu1 %v3665_v17  ;;  %3205 = vmatprep.mubr.msk.f32.mxu1 %vm3584_vm1, %v3585_v1 }
 0x343   : > { %3409 = vmatprep.subr.bf16.mxu1 %v3583_v0  ;;  %3414 = vmatpush3.bf16.msra.mxu0 %v3643_v5 }
 0x344   : > { %3415 = vmatprep.subr.bf16.mxu0 %v3583_v0  ;;  %3216 = vmatprep.mubr.msk.f32.mxu0 %vm3584_vm1, %v3585_v1 }
 0x346   : > { %3411 = vmatpush3.bf16.msra.mxu1 %v3675_v20 }
 0x347   : > { %3418 = vmatprep.subr.bf16.mxu1 %v3583_v0  ;;  %3417 = vmatpush3.bf16.msra.mxu0 %v3651_v11 }
 0x348   : > { %3424 = vmatprep.subr.bf16.mxu0 %v3583_v0 }
 0x349   : > { %3206 = vmatmul.mubr.msk.f32.vlgmr.msra.gmra.mrb[10].mxu1 %vm273_vm2, %v1111_v60 }
 0x34a   : > { %3420 = vmatpush3.bf16.msra.mxu1 %v3653_v12  ;;  %3227 = vmatprep.mubr.msk.f32.mxu1 %vm3584_vm1, %v3585_v1 }
 0x34b   : > { %3421 = vmatprep.subr.bf16.mxu1 %v3583_v0 }
 0x34e   : > { %3423 = vmatpush3.bf16.msra.mxu1 %v3659_v15 }
 0x34f   : > { %3430 = vmatprep.subr.bf16.mxu1 %v3583_v0 }
 0x414   : > { %v1192_v61 = vpop.f32.mrb[8].mxu1  ;;  %v1273_v63 = vpop.f32.mrb[10].mxu0 }
 0x415   : > { %v1193_v2 = vadd.f32 %v3716_v21, %v1192_v61  ;;  %v3185_v3 = vpop.f32.mrb[9].mxu1  ;;  %v3196_v4 = vpop.f32.mrb[11].mxu0  ;;  %v1274_v6 = vadd.f32 %v3719_v24, %v1273_v63 }
 0x417   : > { %v1361_v7 = vadd.f32 %v2841_v62, %v1193_v2  ;;  %v1371_v10 = vadd.f32 %v2844_v8, %v1274_v6 }
 0x419   : > { %v2842_v9 = vmul.f32 -1.442695, %v1361_v7  ;;  %v2845_v16 = vmul.f32 -1.442695, %v1371_v10 }
 0x41b   : > { %3525 = vpow2.f32 %v2842_v9 }
 0x41c   : > { %v1354_v13 = vpop.f32.mrb[10].mxu1  ;;  %3527 = vpow2.f32 %v2845_v16 }
 0x41d   : > { %v3207_v14 = vpop.f32.mrb[11].mxu1  ;;  %v1355_v25 = vadd.f32 %v3724_v40, %v1354_v13 }
 0x41e   : > { %v2893_v14 = vld [vmem:[%s2644_s29 + $0x34] sm:$0xf] }
 0x425   : > { %v3526_v18 = vpop.eup %3525 }
 0x426   : > { %v1365_v19 = vadd.f32 1.0, %v3526_v18  ;;  %v3528_v22 = vpop.eup %3527 }
 0x427   : > { %v1375_v23 = vadd.f32 1.0, %v3528_v22 }
 0x428   : > { %3529 = vrcp.f32 %v1365_v19 }
 0x429   : > { %3531 = vrcp.f32 %v1375_v23 }
 0x432   : > { %v3530_v26 = vpop.eup %3529 }
 0x433   : > { %v1381_v28 = vmul.f32 %v3530_v26, %v1355_v25  ;;  %v3532_v30 = vpop.eup %3531 }
 0x434   : > { %v1384_v31 = vsub.f32 1.0, %v3532_v30  ;;  %v1386_v33 = vmul.f32 %v3532_v30, %v1111_v60  ;;  %v2896_v30 = vld [vmem:[%s2644_s29 + $0x54] sm:$0xf] }
 0x435   : > { %v1382_v29 = vadd.f32 %v2847_v27, %v1381_v28 }
 0x437   : > { %3533 = vtanh.f32 %v1382_v29 }
 0x441   : > { %v3534_v32 = vpop.eup %3533 }
 0x442   : > { %v1385_v34 = vmul.f32 %v3534_v32, %v1384_v31 }
 0x444   : > { %v1387_v35 = vadd.f32 %v1386_v33, %v1385_v34 }
 0x446   : > { %1388 = vst.msk [vmem:[#allocation2] sm:$0xf] %vm258_vm0, %v1387_v35  ;;  %2849 = vst.msk [vmem:[%s2630_s20 + $0xc] sm:$0xf] %vm258_vm0, %v1387_v35 }
 0x44d   : > { %v1392_v36 = vld [vmem:[#allocation2] sm:$0xf] }
 0x44e   : > { %3217 = vmatmul.mubr.msk.f32.vlgmr.msra.gmra.mrb[12].mxu0 %vm273_vm2, %v1392_v36  ;;  %3228 = vmatmul.mubr.msk.f32.vlgmr.msra.gmra.mrb[12].mxu1 %vm273_vm2, %v1392_v36 }
 0x44f   : > { %3426 = vmatpush3.bf16.msra.mxu0 %v3665_v17  ;;  %3238 = vmatprep.mubr.msk.f32.mxu0 %vm3584_vm1, %v3585_v1 }
 0x450   : > { %3427 = vmatprep.subr.bf16.mxu0 %v3583_v0  ;;  %3432 = vmatpush3.bf16.msra.mxu1 %v3643_v5 }
 0x451   : > { %3433 = vmatprep.subr.bf16.mxu1 %v3583_v0  ;;  %3249 = vmatprep.mubr.msk.f32.mxu1 %vm3584_vm1, %v3585_v1 }
 0x453   : > { %3429 = vmatpush3.bf16.msra.mxu0 %v3675_v20 }
 0x454   : > { %3436 = vmatprep.subr.bf16.mxu0 %v3583_v0  ;;  %3435 = vmatpush3.bf16.msra.mxu1 %v3651_v11 }
 0x455   : > { %3442 = vmatprep.subr.bf16.mxu1 %v3583_v0 }
 0x456   : > { %3239 = vmatmul.mubr.msk.f32.vlgmr.msra.gmra.mrb[14].mxu0 %vm273_vm2, %v1392_v36 }
 0x457   : > { %3438 = vmatpush3.bf16.msra.mxu0 %v3653_v12  ;;  %3260 = vmatprep.mubr.msk.f32.mxu0 %vm3584_vm1, %v3585_v1 }
 0x458   : > { %3439 = vmatprep.subr.bf16.mxu0 %v3583_v0 }
 0x45b   : > { %3441 = vmatpush3.bf16.msra.mxu0 %v3659_v15 }
 0x45c   : > { %3448 = vmatprep.subr.bf16.mxu0 %v3583_v0 }
 0x521   : > { %v1473_v37 = vpop.f32.mrb[12].mxu0  ;;  %v1554_v39 = vpop.f32.mrb[12].mxu1 }
 0x522   : > { %v1474_v41 = vadd.f32 %v3716_v21, %v1473_v37  ;;  %v3218_v42 = vpop.f32.mrb[13].mxu0  ;;  %v3229_v43 = vpop.f32.mrb[13].mxu1  ;;  %v1555_v44 = vadd.f32 %v3719_v24, %v1554_v39 }
 0x523   : > { %v2927_v43 = vld [vmem:[%s3638_s21 + $0x20] sm:$0xff] }
 0x524   : > { %v1642_v45 = vadd.f32 %v1641_v38, %v1474_v41  ;;  %v1652_v48 = vadd.f32 %v2869_v46, %v1555_v44  ;;  %v2240_v41 = vld [vmem:[%s3638_s21 + $0x8] sm:$0xff]  ;;  %v2241_v46 = vld [vmem:[%s3638_s21 + $0x10] sm:$0xff] }
 0x525   : > { %v2928_v44 = vld [vmem:[%s3638_s21 + $0x28] sm:$0xff] }
 0x526   : > { %v2867_v47 = vmul.f32 -1.442695, %v1642_v45  ;;  %v2870_v51 = vmul.f32 -1.442695, %v1652_v48  ;;  %v3473_v45 = vpack.c.bf16 %v2928_v44, %v2927_v43  ;;  %v2939_v43 = vld [vmem:[%s3710_s28 + $0x2] ss:$0 sm:$0xff] }
 0x528   : > { %3535 = vpow2.f32 %v2867_v47  ;;  %v2242_v47 = vld [vmem:[%s3638_s21 + $0x18] sm:$0xff] }
 0x529   : > { %v1635_v49 = vpop.f32.mrb[14].mxu0  ;;  %3537 = vpow2.f32 %v2870_v51  ;;  %v3470_v48 = vpack.c.bf16 %v2242_v47, %v2241_v46  ;;  %v2948_v47 = vld [vmem:[%s2676_s11 + $0x5c] sm:$0xf] }
 0x52a   : > { %v3240_v50 = vpop.f32.mrb[15].mxu0  ;;  %v1636_v56 = vadd.f32 %v3724_v40, %v1635_v49  ;;  %v2930_v49 = vld [vmem:[%s3638_s21 + $0x38] sm:$0xff] }
 0x532   : > { %v3536_v52 = vpop.eup %3535 }
 0x533   : > { %v1646_v53 = vadd.f32 1.0, %v3536_v52  ;;  %v3538_v54 = vpop.eup %3537  ;;  %v2916_v52 = vld [vmem:[%s2660_s7 + $0x18] sm:$0xf] }
 0x534   : > { %v1656_v55 = vadd.f32 1.0, %v3538_v54 }
 0x535   : > { %3539 = vrcp.f32 %v1646_v53 }
 0x536   : > { %3541 = vrcp.f32 %v1656_v55 }
 0x53f   : > { %v3540_v57 = vpop.eup %3539 }
 0x540   : > { %v1662_v59 = vmul.f32 %v3540_v57, %v1636_v56  ;;  %v3542_v61 = vpop.eup %3541 }
 0x541   : > { %v1665_v62 = vsub.f32 1.0, %v3542_v61  ;;  %v1667_v2 = vmul.f32 %v3542_v61, %v1392_v36 }
 0x542   : > { %v1663_v60 = vadd.f32 %v2872_v58, %v1662_v59  ;;  %v2919_v59 = vld [vmem:[%s2660_s7 + $0x38] sm:$0xf] }
 0x544   : > { %3543 = vtanh.f32 %v1663_v60 }
 0x54e   : > { %v3544_v63 = vpop.eup %3543 }
 0x54f   : > { %v1666_v3 = vmul.f32 %v3544_v63, %v1665_v62 }
 0x551   : > { %v1668_v4 = vadd.f32 %v1667_v2, %v1666_v3 }
 0x553   : > { %1671 = vst.msk [vmem:[%s1670_s26] sm:$0xf] %vm258_vm0, %v1668_v4  ;;  %1669 = vst.msk [vmem:[#allocation2] sm:$0xf] %vm258_vm0, %v1668_v4 }
 0x55a   : > { %v1674_v6 = vld [vmem:[#allocation2] sm:$0xf] }
 0x55b   : > { %3250 = vmatmul.mubr.msk.f32.vlgmr.msra.gmra.mrb[14].mxu1 %vm273_vm2, %v1674_v6  ;;  %3261 = vmatmul.mubr.msk.f32.vlgmr.msra.gmra.mrb[16].mxu0 %vm273_vm2, %v1674_v6 }
 0x55c   : > { %3444 = vmatpush3.bf16.msra.mxu1 %v3665_v17  ;;  %3271 = vmatprep.mubr.msk.f32.mxu1 %vm3584_vm1, %v3585_v1 }
 0x55d   : > { %3445 = vmatprep.subr.bf16.mxu1 %v3583_v0  ;;  %3450 = vmatpush3.bf16.msra.mxu0 %v3643_v5 }
 0x55e   : > { %3451 = vmatprep.subr.bf16.mxu0 %v3583_v0  ;;  %3282 = vmatprep.mubr.msk.f32.mxu0 %vm3584_vm1, %v3585_v1 }
 0x560   : > { %3447 = vmatpush3.bf16.msra.mxu1 %v3675_v20 }
 0x561   : > { %3454 = vmatprep.subr.bf16.mxu1 %v3583_v0  ;;  %3453 = vmatpush3.bf16.msra.mxu0 %v3651_v11  ;;  %v2890_v11 = vld [vmem:[%s2644_s29 + $0x14] sm:$0xf] }
 0x562   : > { %3460 = vmatprep.subr.bf16.mxu0 %v3583_v0 }
 0x563   : > { %3272 = vmatmul.mubr.msk.f32.vlgmr.msra.gmra.mrb[16].mxu1 %vm273_vm2, %v1674_v6 }
 0x564   : > { %3456 = vmatpush3.bf16.msra.mxu1 %v3653_v12  ;;  %3293 = vmatprep.mubr.msk.f32.mxu1 %vm3584_vm1, %v3585_v1 }
 0x565   : > { %3457 = vmatprep.subr.bf16.mxu1 %v3583_v0 }
 0x568   : > { %3459 = vmatpush3.bf16.msra.mxu1 %v3659_v15 }
 0x569   : > { %3466 = vmatprep.subr.bf16.mxu1 %v3583_v0 }
 0x62e   : > { %v1755_v5 = vpop.f32.mrb[14].mxu1  ;;  %v1836_v7 = vpop.f32.mrb[16].mxu0 }
 0x62f   : > { %v1756_v8 = vadd.f32 %v3716_v21, %v1755_v5  ;;  %v3251_v9 = vpop.f32.mrb[15].mxu1  ;;  %v3262_v10 = vpop.f32.mrb[17].mxu0  ;;  %v1837_v12 = vadd.f32 %v3719_v24, %v1836_v7 }
 0x631   : > { %v1924_v13 = vadd.f32 %v2890_v11, %v1756_v8  ;;  %v1934_v18 = vadd.f32 %v2893_v14, %v1837_v12  ;;  %v2922_v11 = vld [vmem:[%s2660_s7 + $0x58] sm:$0xf] }
 0x633   : > { %v2891_v16 = vmul.f32 -1.442695, %v1924_v13  ;;  %v2894_v22 = vmul.f32 -1.442695, %v1934_v18  ;;  %v2935_v18 = vld [vmem:[%s3638_s21 + $0x48] sm:$0xff] }
 0x635   : > { %3545 = vpow2.f32 %v2891_v16 }
 0x636   : > { %v1917_v15 = vpop.f32.mrb[16].mxu1  ;;  %3547 = vpow2.f32 %v2894_v22  ;;  %v2937_v22 = vld [vmem:[%s3638_s21 + $0x58] sm:$0xff] }
 0x637   : > { %v3273_v19 = vpop.f32.mrb[17].mxu1  ;;  %v1918_v28 = vadd.f32 %v3724_v40, %v1917_v15 }
 0x638   : > { %v2936_v19 = vld [vmem:[%s3638_s21 + $0x50] sm:$0xff] }
 0x63f   : > { %v3546_v23 = vpop.eup %3545 }
 0x640   : > { %v1928_v25 = vadd.f32 1.0, %v3546_v23  ;;  %v3548_v26 = vpop.eup %3547 }
 0x641   : > { %v1938_v27 = vadd.f32 1.0, %v3548_v26  ;;  %v2925_v26 = vld [vmem:[%s3710_s28] ss:$0 sm:$0xff] }
 0x642   : > { %3549 = vrcp.f32 %v1928_v25  ;;  %v3482_v25 = vpack.c.bf16 %v2937_v22, %v2936_v19 }
 0x643   : > { %3551 = vrcp.f32 %v1938_v27  ;;  %v2932_v27 = vld [vmem:[%s3710_s28 + $0x1] ss:$0 sm:$0xff] }
 0x64c   : > { %v3550_v29 = vpop.eup %3549 }
 0x64d   : > { %v1944_v31 = vmul.f32 %v3550_v29, %v1918_v28  ;;  %v3552_v33 = vpop.eup %3551  ;;  %v2942_v29 = vld [vmem:[%s2676_s11 + $0x1c] sm:$0xf] }
 0x64e   : > { %v1947_v34 = vsub.f32 1.0, %v3552_v33  ;;  %v1949_v36 = vmul.f32 %v3552_v33, %v1674_v6 }
 0x64f   : > { %v1945_v32 = vadd.f32 %v2896_v30, %v1944_v31 }
 0x651   : > { %3553 = vtanh.f32 %v1945_v32 }
 0x65b   : > { %v3554_v35 = vpop.eup %3553 }
 0x65c   : > { %v1948_v37 = vmul.f32 %v3554_v35, %v1947_v34 }
 0x65e   : > { %v1950_v38 = vadd.f32 %v1949_v36, %v1948_v37 }
 0x660   : > { %2898 = vst.msk [vmem:[%s2656_s5 + $0x14] sm:$0xf] %vm258_vm0, %v1950_v38  ;;  %1951 = vst.msk [vmem:[#allocation2] sm:$0xf] %vm258_vm0, %v1950_v38 }
 0x667   : > { %v3908_v39 = vld [vmem:[#allocation2] sm:$0xf] }
 0x668   : > { %3283 = vmatmul.mubr.msk.f32.vlgmr.msra.gmra.mrb[18].mxu0 %vm273_vm2, %v3908_v39  ;;  %3294 = vmatmul.mubr.msk.f32.vlgmr.msra.gmra.mrb[18].mxu1 %vm273_vm2, %v3908_v39 }
 0x669   : > { %3462 = vmatpush3.bf16.msra.mxu0 %v3665_v17  ;;  %3304 = vmatprep.mubr.msk.f32.mxu0 %vm3584_vm1, %v3585_v1  ;;  %v2239_v17 = vld [vmem:[%s3638_s21] sm:$0xff] }
 0x66a   : > { %3463 = vmatprep.subr.bf16.mxu0 %v3583_v0  ;;  %3315 = vmatprep.mubr.msk.f32.mxu1 %vm3584_vm1, %v3585_v1  ;;  %v3467_v42 = vpack.c.bf16 %v2240_v41, %v2239_v17 }
 0x66c   : > { %3468 = vmatpush3.bf16.msra.mxu1 %v3467_v42 }
 0x66d   : > { %3465 = vmatpush3.bf16.msra.mxu0 %v3675_v20  ;;  %v2929_v20 = vld [vmem:[%s3638_s21 + $0x30] sm:$0xff]  ;;  %3469 = vmatprep.subr.bf16.mxu1 %v3583_v0 }
 0x66e   : > { %3472 = vmatprep.subr.bf16.mxu0 %v3583_v0  ;;  %v3476_v50 = vpack.c.bf16 %v2930_v49, %v2929_v20 }
 0x670   : > { %3305 = vmatmul.mubr.msk.f32.vlgmr.msra.gmra.mrb[20].mxu0 %vm273_vm2, %v3908_v39  ;;  %3471 = vmatpush3.bf16.msra.mxu1 %v3470_v48 }
 0x671   : > { %3326 = vmatprep.mubr.msk.f32.mxu0 %vm3584_vm1, %v3585_v1  ;;  %3474 = vmatpush3.bf16.msra.mxu0 %v3473_v45 }
 0x672   : > { %3475 = vmatprep.subr.bf16.mxu0 %v3583_v0  ;;  %3478 = vmatprep.subr.bf16.mxu1 %v3583_v0 }
 0x675   : > { %3477 = vmatpush3.bf16.msra.mxu0 %v3476_v50 }
 0x73b   : > { %v2037_v51 = vpop.f32.mrb[18].mxu0  ;;  %v2118_v53 = vpop.f32.mrb[18].mxu1 }
 0x73c   : > { %v2038_v54 = vadd.f32 %v3716_v21, %v2037_v51  ;;  %v3284_v55 = vpop.f32.mrb[19].mxu0  ;;  %v3295_v56 = vpop.f32.mrb[19].mxu1  ;;  %v2119_v57 = vadd.f32 %v3719_v24, %v2118_v53 }
 0x73e   : > { %v2206_v58 = vadd.f32 %v2916_v52, %v2038_v54  ;;  %v2216_v61 = vadd.f32 %v2919_v59, %v2119_v57 }
 0x740   : > { %v2917_v60 = vmul.f32 -1.442695, %v2206_v58  ;;  %v2920_v2 = vmul.f32 -1.442695, %v2216_v61 }
 0x742   : > { %3555 = vpow2.f32 %v2917_v60 }
 0x743   : > { %v2199_v62 = vpop.f32.mrb[20].mxu0  ;;  %3557 = vpow2.f32 %v2920_v2 }
 0x744   : > { %v3306_v63 = vpop.f32.mrb[21].mxu0  ;;  %v2200_v5 = vadd.f32 %v3724_v40, %v2199_v62  ;;  %v2934_v40 = vld [vmem:[%s3638_s21 + $0x40] sm:$0xff]  ;;  %s2688_s21 = scalar_lea.vmem %s3735_s8, %s2941_s10 }
 0x745   : > { %v3479_v15 = vpack.c.bf16 %v2935_v18, %v2934_v40 }
 0x74c   : > { %v3556_v3 = vpop.eup %3555 }
 0x74d   : > { %v2210_v4 = vadd.f32 1.0, %v3556_v3  ;;  %v3558_v6 = vpop.eup %3557 }
 0x74e   : > { %v2220_v21 = vadd.f32 1.0, %v3558_v6 }
 0x74f   : > { %3559 = vrcp.f32 %v2210_v4 }
 0x750   : > { %3561 = vrcp.f32 %v2220_v21 }
 0x759   : > { %v3560_v24 = vpop.eup %3559 }
 0x75a   : > { %v2226_v7 = vmul.f32 %v3560_v24, %v2200_v5  ;;  %v3562_v9 = vpop.eup %3561 }
 0x75b   : > { %v2229_v10 = vsub.f32 1.0, %v3562_v9  ;;  %v2231_v13 = vmul.f32 %v3562_v9, %v3908_v39 }
 0x75c   : > { %v2227_v8 = vadd.f32 %v2922_v11, %v2226_v7 }
 0x75e   : > { %3563 = vtanh.f32 %v2227_v8 }
 0x768   : > { %v3564_v12 = vpop.eup %3563 }
 0x769   : > { %v2230_v14 = vmul.f32 %v3564_v12, %v2229_v10 }
 0x76b   : > { %v2232_v16 = vadd.f32 %v2231_v13, %v2230_v14 }
 0x76d   : > { %2924 = vst.msk [vmem:[%s2672_s9 + $0x18] sm:$0xf] %vm258_vm0, %v2232_v16  ;;  %2233 = vst.msk [vmem:[#allocation2] sm:$0xf] %vm258_vm0, %v2232_v16 }
 0x774   : > { %v2238_v23 = vld [vmem:[#allocation2] sm:$0xf] }
 0x775   : > { %3316 = vmatmul.mubr.msk.f32.vlgmr.msra.gmra.mrb[20].mxu1 %vm273_vm2, %v2238_v23  ;;  %3327 = vmatmul.mubr.msk.f32.vlgmr.msra.gmra.mrb[22].mxu0 %vm273_vm2, %v2238_v23 }
 0x776   : > { %3480 = vmatpush3.bf16.msra.mxu1 %v3479_v15  ;;  %3337 = vmatprep.mubr.msk.f32.mxu1 %vm3584_vm1, %v3585_v1  ;;  %v2945_v1 = vld [vmem:[%s2676_s11 + $0x3c] sm:$0xf] }
 0x777   : > { %3481 = vmatprep.subr.bf16.mxu1 %v3583_v0 }
 0x77a   : > { %3483 = vmatpush3.bf16.msra.mxu1 %v3482_v25 }
 0x77d   : > { %3338 = vmatmul.mubr.msk.f32.vlgmr.msra.gmra.mrb[22].mxu1 %vm273_vm2, %v2238_v23 }
 0x848   : > { %v2319_v28 = vpop.f32.mrb[20].mxu1  ;;  %v2400_v30 = vpop.f32.mrb[22].mxu0 }
 0x849   : > { %v2320_v31 = vadd.f32 %v2925_v26, %v2319_v28  ;;  %v3317_v32 = vpop.f32.mrb[21].mxu1  ;;  %v3328_v33 = vpop.f32.mrb[23].mxu0  ;;  %v2401_v34 = vadd.f32 %v2932_v27, %v2400_v30 }
 0x84b   : > { %v2488_v35 = vadd.f32 %v2942_v29, %v2320_v31  ;;  %v2498_v0 = vadd.f32 %v2945_v1, %v2401_v34 }
 0x84d   : > { %v2943_v36 = vmul.f32 -1.442695, %v2488_v35  ;;  %v2946_v39 = vmul.f32 -1.442695, %v2498_v0 }
 0x84f   : > { %3565 = vpow2.f32 %v2943_v36 }
 0x850   : > { %v2481_v37 = vpop.f32.mrb[22].mxu1  ;;  %3567 = vpow2.f32 %v2946_v39 }
 0x851   : > { %v3339_v38 = vpop.f32.mrb[23].mxu1  ;;  %v2482_v45 = vadd.f32 %v2939_v43, %v2481_v37 }
 0x859   : > { %v3566_v17 = vpop.eup %3565 }
 0x85a   : > { %v2492_v41 = vadd.f32 1.0, %v3566_v17  ;;  %v3568_v42 = vpop.eup %3567 }
 0x85b   : > { %v2502_v44 = vadd.f32 1.0, %v3568_v42 }
 0x85c   : > { %3569 = vrcp.f32 %v2492_v41 }
 0x85d   : > { %3571 = vrcp.f32 %v2502_v44 }
 0x866   : > { %v3570_v46 = vpop.eup %3569 }
 0x867   : > { %v2508_v20 = vmul.f32 %v3570_v46, %v2482_v45  ;;  %v3572_v49 = vpop.eup %3571 }
 0x868   : > { %v2511_v50 = vsub.f32 1.0, %v3572_v49  ;;  %v2513_v52 = vmul.f32 %v3572_v49, %v2238_v23 }
 0x869   : > { %v2509_v48 = vadd.f32 %v2948_v47, %v2508_v20 }
 0x86b   : > { %3573 = vtanh.f32 %v2509_v48 }
 0x875   : > { %v3574_v51 = vpop.eup %3573 }
 0x876   : > { %v2512_v53 = vmul.f32 %v3574_v51, %v2511_v50 }
 0x878   : > { %v2514_v54 = vadd.f32 %v2513_v52, %v2512_v53 }
 0x87a   : > { %2515 = vst.msk [vmem:[#allocation2] sm:$0xf] %vm258_vm0, %v2514_v54  ;;  %2950 = vst.msk [vmem:[%s2688_s21 + $0x1c] sm:$0xf] %vm258_vm0, %v2514_v54 }
 0x881   : > { %v2518_v55 = vld [vmem:[#allocation2] sm:$0xf] }
 0x882   : > { %2519 = vst.msk [vmem:[%s257_s13] sm:$0xf] %vm258_vm0, %v2518_v55 }
 0x883 PF: > { %s15_s15 = sadd.s32 1, %s3581_s15  }
 0x884   : > { %p12_p5 = scmp.ge.s32.totalorder %s15_s15, 4  }
 0x886   :  { %14 = sbr.rel (!%p12_p5) target bundleno = 1 (0x1), region = 116 }

// kernel: rnn_encoder_forward.3
= control target key start
LH: loop header
LB: loop body
LE: loop exit
PB: predicated region body
PF: predicated region fallthrough
CT: control target
= control target key end

     0   :  { %10 = vsyncpa [#allocation4], 0  ;;  %s4178_s0 = inlined_call_operand.vmem [shape: f32[6,8,4,32], index: 0, kind: input, shape index: {}]   ;;  %s4179_s1 = inlined_call_operand.vmem [shape: f32[6,32,32], index: 1, kind: input, shape index: {}]   ;;  %s4180_s2 = inlined_call_operand.vmem [shape: f32[6,1,32], index: 2, kind: input, shape index: {}]   ;;  %s4181_s3 = inlined_call_operand.hbm [shape: f32[2,8,4,32], index: 3, kind: output, shape index: {0}]   ;;  %s4182_s4 = inlined_call_operand.vmem [shape: f32[2,4,32], index: 4, kind: output, shape index: {1}]  }
   0x1   :  { %12 = vsyncpa [#allocation4 + $0x1], 0  ;;  %s3723_s15 = smov 0   ;;  %s3725_s16 = smov 0  }
   0x2   :  { %s3727_s17 = smov 0   ;;  %s3729_s18 = smov 0  }
   0x3 LB: > { %s3744_s19 = sadd.s32 4294967295, %s3690_s18   ;;  %s2758_s20 = sadd.s32 4294967294, %s3690_s18   ;;  %s3690_s18 = sphi %s3729_s18, %s4188_s18   ;;  %s3686_s17 = sphi %s3727_s17, %s4187_s17   ;;  %s3682_s16 = sphi %s3725_s16, %s4186_s16   ;;  %s3678_s15 = sphi %s3723_s15, %s4185_s15  }
   0x4   : > { %s3748_s21 = sadd.s32 1, %s3690_s18   ;;  %s103_s22 = sadd.s32 1, %s3686_s17 }
   0x5   : > { %s100_s23 = ssub.s32 %s3690_s18, %s3748_s21  ;;  %p113_p0 = scmp.ne.s32.totalorder %s3686_s17, %s3682_s16 }
   0x6   : > { %p101_p1 = scmp.eq.s32.totalorder %s100_s23, 0  ;;  %p114_p2 = scmp.eq.s32.totalorder %s3744_s19, 1 }
   0x7   : > { %p119_p3 = scmp.ne.s32.totalorder %s3682_s16, %s3678_s15  ;;  %p120_p4 = scmp.eq.s32.totalorder %s2758_s20, 1 }
   0x8   : > { %s3759_s24 = scalar_select %p101_p1, %s3686_s17, %s103_s22  }
   0x9   : > { %p3761_p5 = por %p114_p2, %p113_p0  ;;  %p3765_p6 = por %p120_p4, %p119_p3 }
   0xa   : > { %p2761_p7 = scmp.ge.s32.totalorder %s3690_s18, 1  ;;  %p192_p8 = scmp.lt.s32.totalorder %s3690_s18, 3 }
   0xc   : > { %p193_p9 = pnand %p2761_p7, %p192_p8 }
   0xd   : > { %s233_s27 = smul.u32 (!%p193_p9), 3, %s3744_s19  ;;  %vm256_vm0 = vcmask (!%p193_p9), 257024   ;;  %v3692_v0 = vmov (!%p193_p9), 0.0|0.0   ;;  %vm3693_vm1 = vmmov (!%p193_p9), 0   ;;  %v3694_v1 = vmov (!%p193_p9), 0.0   ;;  %s224_s14 = sand.u32 (!%p193_p9), 1, %s3682_s16  }
   0xe   : > { %196 = sbr.rel (%p193_p9) target bundleno = 2196 (0x894), region = 32  ;;  %3360 = vmatprep.subr.bf16.mxu0 (!%p193_p9), %v3692_v0  ;;  %3104 = vmatprep.mubr.msk.f32.mxu0 (!%p193_p9), %vm3693_vm1, %v3694_v1  ;;  %257 = vst.msk [vmem:[#allocation2] sm:$0xf] (!%p193_p9), %vm256_vm0, %v3694_v1  ;;  %vm271_vm2 = vcmask (!%p193_p9), 261120   ;;  %s2762_s20 = sshll.u32 (!%p193_p9), %s224_s14, 5 }
   0xf   : > { %p234_p10 = scmp.lt.s32.totalorder (!%p193_p9), %s233_s27, 5  ;;  %3366 = vmatprep.subr.bf16.mxu1 (!%p193_p9), %v3692_v0  ;;  %3115 = vmatprep.mubr.msk.f32.mxu1 (!%p193_p9), %vm3693_vm1, %v3694_v1  ;;  %s2784_s6 = smul.u32 (!%p193_p9), 28, %s3744_s19 }
  0x10   : > { %s3881_s22 = scalar_lea.vmem (!%p193_p9), [#allocation3], %s2762_s20  ;;  %s2831_s30 = smul.u32 (!%p193_p9), 12, %s3744_s19 }
  0x11   : > { %s542_s23 = scalar_lea.vmem (!%p193_p9), %s3881_s22, %s2784_s6 [#allocation3]  ;;  %s2857_s8 = sshll.u32 (!%p193_p9), %s3744_s19, 2 }
  0x12   : > { %s2632_s7 = scalar_lea.vmem (!%p193_p9), %s3881_s22, %s2831_s30 [#allocation3]  ;;  %s2644_s11 = scalar_lea.vmem (!%p193_p9), %s3881_s22, %s2857_s8 [#allocation3] }
  0x13   : > { %p252_p11 = scmp.lt.s32.totalorder (!%p193_p9), %s3744_s19, 1 }
  0x15   : > { %s4190_s27 = smov (!%p234_p10, %s233_s27), 5  ;;  %v3813_v16 = vld [vmem:[#allocation2] sm:$0xf] }
  0x16   : > { %s2973_s28 = sshll.u32 %s4190_s27, 5  ;;  %s3860_s12 = scalar_lea.vmem %s4180_s2, %s4190_s27 }
  0x17   : > { %s3788_s5 = scalar_lea.vmem %s4179_s1, %s2973_s28  ;;  %s3854_s9 = scalar_lea.vmem %s4178_s0, %s2973_s28  ;;  %v3866_v21 = vld [vmem:[%s3860_s12] ss:$0 sm:$0xff]  ;;  %v3869_v24 = vld [vmem:[%s3860_s12 + $0x1] ss:$0 sm:$0xff]  ;;  %v3874_v40 = vld [vmem:[%s3860_s12 + $0x2] ss:$0 sm:$0xff] }
  0x18   : > { %v260_v2 = vld [vmem:[%s3788_s5] sm:$0xff]  ;;  %v261_v3 = vld [vmem:[%s3788_s5 + $0x8] sm:$0xff]  ;;  %v262_v4 = vld [vmem:[%s3788_s5 + $0x10] sm:$0xff]  ;;  %s512_s13 = scalar_lea.vmem %s3854_s9, %s2784_s6  ;;  %s2805_s27 = smul.u32 20, %s3744_s19 }
  0x19   : > { %v3793_v5 = vpack.c.bf16 %v261_v3, %v260_v2  ;;  %v263_v6 = vld [vmem:[%s3788_s5 + $0x18] sm:$0xff]  ;;  %v2770_v7 = vld [vmem:[%s3788_s5 + $0x20] sm:$0xff]  ;;  %v2771_v8 = vld [vmem:[%s3788_s5 + $0x28] sm:$0xff]  ;;  %s2620_s6 = scalar_lea.vmem %s3854_s9, %s2831_s30  ;;  %s2635_s10 = scalar_lea.vmem %s3854_s9, %s2857_s8 }
  0x1a   : > { %v2772_v9 = vld [vmem:[%s3788_s5 + $0x30] sm:$0xff]  ;;  %v2773_v10 = vld [vmem:[%s3788_s5 + $0x38] sm:$0xff]  ;;  %v3801_v11 = vpack.c.bf16 %v263_v6, %v262_v4  ;;  %v3803_v12 = vpack.c.bf16 %v2771_v8, %v2770_v7  ;;  %v2777_v13 = vld [vmem:[%s3788_s5 + $0x40] sm:$0xff]  ;;  %s2604_s28 = scalar_lea.vmem %s3854_s9, %s2805_s27  ;;  %s2616_s29 = scalar_lea.vmem %s3881_s22, %s2805_s27 [#allocation3] }
  0x1b   : > { %3362 = vmatpush3.bf16.msra.mxu0 %v3793_v5  ;;  %v2778_v14 = vld [vmem:[%s3788_s5 + $0x48] sm:$0xff]  ;;  %v3809_v15 = vpack.c.bf16 %v2773_v10, %v2772_v9  ;;  %v2779_v18 = vld [vmem:[%s3788_s5 + $0x50] sm:$0xff]  ;;  %v2780_v19 = vld [vmem:[%s3788_s5 + $0x58] sm:$0xff] }
  0x1c   : > { %3363 = vmatprep.subr.bf16.mxu0 %v3692_v0  ;;  %3368 = vmatpush3.bf16.msra.mxu1 %v3803_v12  ;;  %v3815_v17 = vpack.c.bf16 %v2778_v14, %v2777_v13  ;;  %v3825_v20 = vpack.c.bf16 %v2780_v19, %v2779_v18  ;;  %v513_v23 = vld [vmem:[%s512_s13] sm:$0xf]  ;;  %v2806_v55 = vld [vmem:[%s2604_s28 + $0x4] sm:$0xf] }
  0x1d   : > { %3369 = vmatprep.subr.bf16.mxu1 %v3692_v0  ;;  %v2786_v28 = vld [vmem:[%s512_s13 + $0x20] sm:$0xf]  ;;  %v2809_v62 = vld [vmem:[%s2604_s28 + $0x24] sm:$0xf] }
  0x1e   : > { %v2788_v44 = vld [vmem:[%s512_s13 + $0x40] sm:$0xf]  ;;  %s1389_s13 = ssub.s32 4, %s3744_s19 }
  0x1f   : > { %3365 = vmatpush3.bf16.msra.mxu0 %v3801_v11  ;;  %s4009_s20 = sshll.u32 %s1389_s13, 2 }
  0x20   : > { %3372 = vmatprep.subr.bf16.mxu0 %v3692_v0  ;;  %3371 = vmatpush3.bf16.msra.mxu1 %v3809_v15  ;;  %s1668_s27 = scalar_lea.vmem %s3881_s22, %s4009_s20 [#allocation3] }
  0x21   : > { %3378 = vmatprep.subr.bf16.mxu1 %v3692_v0 }
  0x22   : > { %3105 = vmatmul.mubr.msk.f32.vlgmr.msra.gmra.mrb[0].mxu0 %vm271_vm2, %v3813_v16 }
  0x23   : > { %3374 = vmatpush3.bf16.msra.mxu0 %v3815_v17  ;;  %3126 = vmatprep.mubr.msk.f32.mxu0 %vm3693_vm1, %v3694_v1 }
  0x24   : > { %3116 = vmatmul.mubr.msk.f32.vlgmr.msra.gmra.mrb[0].mxu1 %vm271_vm2, %v3813_v16  ;;  %3375 = vmatprep.subr.bf16.mxu0 %v3692_v0 }
  0x25   : > { %3380 = vmatpush3.bf16.msra.mxu1 %v3793_v5  ;;  %3137 = vmatprep.mubr.msk.f32.mxu1 %vm3693_vm1, %v3694_v1 }
  0x26   : > { %3381 = vmatprep.subr.bf16.mxu1 %v3692_v0 }
  0x27   : > { %3377 = vmatpush3.bf16.msra.mxu0 %v3825_v20 }
  0x28   : > { %3384 = vmatprep.subr.bf16.mxu0 %v3692_v0 }
  0x29   : > { %3383 = vmatpush3.bf16.msra.mxu1 %v3801_v11 }
  0x2a   : > { %3127 = vmatmul.mubr.msk.f32.vlgmr.msra.gmra.mrb[2].mxu0 %vm271_vm2, %v3813_v16  ;;  %3390 = vmatprep.subr.bf16.mxu1 %v3692_v0 }
  0x2b   : > { %3386 = vmatpush3.bf16.msra.mxu0 %v3803_v12  ;;  %3148 = vmatprep.mubr.msk.f32.mxu0 %vm3693_vm1, %v3694_v1 }
  0x2c   : > { %3387 = vmatprep.subr.bf16.mxu0 %v3692_v0 }
  0x2f   : > { %3389 = vmatpush3.bf16.msra.mxu0 %v3809_v15 }
  0x30   : > { %3396 = vmatprep.subr.bf16.mxu0 %v3692_v0 }
  0xf5   : > { %v341_v22 = vpop.f32.mrb[0].mxu0 }
  0xf6   : > { %v342_v25 = vadd.f32 %v3866_v21, %v341_v22  ;;  %v3106_v26 = vpop.f32.mrb[1].mxu0 }
  0xf7   : > { %v424_v27 = vpop.f32.mrb[0].mxu1 }
  0xf8   : > { %v514_v29 = vadd.f32 %v513_v23, %v342_v25  ;;  %v425_v30 = vadd.f32 %v3869_v24, %v424_v27  ;;  %v3117_v31 = vpop.f32.mrb[1].mxu1 }
  0xf9   : > { %v2832_v31 = vld [vmem:[%s2620_s6 + $0x8] sm:$0xf] }
  0xfa   : > { %v2785_v32 = vmul.f32 -1.442695, %v514_v29  ;;  %v524_v33 = vadd.f32 %v2786_v28, %v425_v30 }
  0xfc   : > { %3548 = vpow2.f32 %v2785_v32  ;;  %v2787_v34 = vmul.f32 -1.442695, %v524_v33 }
  0xfd   : > { %v507_v35 = vpop.f32.mrb[2].mxu0 }
  0xfe   : > { %v3128_v36 = vpop.f32.mrb[3].mxu0  ;;  %3550 = vpow2.f32 %v2787_v34  ;;  %v508_v42 = vadd.f32 %v3874_v40, %v507_v35 }
 0x106   : > { %v3549_v37 = vpop.eup %3548 }
 0x107   : > { %v518_v38 = vadd.f32 1.0, %v3549_v37 }
 0x108   : > { %v3551_v39 = vpop.eup %3550 }
 0x109   : > { %3552 = vrcp.f32 %v518_v38  ;;  %v528_v41 = vadd.f32 1.0, %v3551_v39  ;;  %v2835_v38 = vld [vmem:[%s2620_s6 + $0x28] sm:$0xf] }
 0x10b   : > { %3554 = vrcp.f32 %v528_v41 }
 0x113   : > { %v3553_v43 = vpop.eup %3552 }
 0x114   : > { %v534_v45 = vmul.f32 %v3553_v43, %v508_v42 }
 0x115   : > { %v3555_v47 = vpop.eup %3554 }
 0x116   : > { %v535_v46 = vadd.f32 %v2788_v44, %v534_v45  ;;  %v537_v48 = vsub.f32 1.0, %v3555_v47  ;;  %v539_v50 = vmul.f32 %v3555_v47, %v3813_v16  ;;  %v2812_v16 = vld [vmem:[%s2604_s28 + $0x44] sm:$0xf]  ;;  %s2906_s28 = smul.u32 4294967284, %s3744_s19 }
 0x118   : > { %3556 = vtanh.f32 %v535_v46  ;;  %s2670_s30 = scalar_lea.vmem %s3881_s22, %s2906_s28 [#allocation3] }
 0x122   : > { %v3557_v49 = vpop.eup %3556 }
 0x123   : > { %v538_v51 = vmul.f32 %v3557_v49, %v537_v48 }
 0x125   : > { %v540_v52 = vadd.f32 %v539_v50, %v538_v51  ;;  %v2838_v51 = vld [vmem:[%s2620_s6 + $0x48] sm:$0xf]  ;;  %s2932_s6 = smul.u32 4294967276, %s3744_s19 }
 0x127   : > { %541 = vst.msk [vmem:[#allocation2] sm:$0xf] %vm256_vm0, %v540_v52  ;;  %543 = vst.msk [vmem:[%s542_s23] sm:$0xf] %vm256_vm0, %v540_v52  ;;  %s1638_s23 = scalar_lea.vmem %s3854_s9, %s4009_s20  ;;  %s2686_s8 = scalar_lea.vmem %s3881_s22, %s2932_s6 [#allocation3] }
 0x12e   : > { %v546_v53 = vld [vmem:[#allocation2] sm:$0xf] }
 0x12f   : > { %3138 = vmatmul.mubr.msk.f32.vlgmr.msra.gmra.mrb[2].mxu1 %vm271_vm2, %v546_v53  ;;  %3149 = vmatmul.mubr.msk.f32.vlgmr.msra.gmra.mrb[4].mxu0 %vm271_vm2, %v546_v53 }
 0x130   : > { %3392 = vmatpush3.bf16.msra.mxu1 %v3815_v17  ;;  %3159 = vmatprep.mubr.msk.f32.mxu1 %vm3693_vm1, %v3694_v1 }
 0x131   : > { %3393 = vmatprep.subr.bf16.mxu1 %v3692_v0  ;;  %3398 = vmatpush3.bf16.msra.mxu0 %v3793_v5 }
 0x132   : > { %3399 = vmatprep.subr.bf16.mxu0 %v3692_v0  ;;  %3170 = vmatprep.mubr.msk.f32.mxu0 %vm3693_vm1, %v3694_v1 }
 0x134   : > { %3395 = vmatpush3.bf16.msra.mxu1 %v3825_v20 }
 0x135   : > { %3402 = vmatprep.subr.bf16.mxu1 %v3692_v0  ;;  %3401 = vmatpush3.bf16.msra.mxu0 %v3801_v11 }
 0x136   : > { %3408 = vmatprep.subr.bf16.mxu0 %v3692_v0 }
 0x137   : > { %3160 = vmatmul.mubr.msk.f32.vlgmr.msra.gmra.mrb[4].mxu1 %vm271_vm2, %v546_v53 }
 0x138   : > { %3404 = vmatpush3.bf16.msra.mxu1 %v3803_v12  ;;  %3181 = vmatprep.mubr.msk.f32.mxu1 %vm3693_vm1, %v3694_v1 }
 0x139   : > { %3405 = vmatprep.subr.bf16.mxu1 %v3692_v0 }
 0x13c   : > { %3407 = vmatpush3.bf16.msra.mxu1 %v3809_v15 }
 0x13d   : > { %3414 = vmatprep.subr.bf16.mxu1 %v3692_v0 }
 0x202   : > { %v627_v54 = vpop.f32.mrb[2].mxu1  ;;  %v708_v56 = vpop.f32.mrb[4].mxu0 }
 0x203   : > { %v628_v57 = vadd.f32 %v3866_v21, %v627_v54  ;;  %v3139_v58 = vpop.f32.mrb[3].mxu1  ;;  %v3150_v59 = vpop.f32.mrb[5].mxu0  ;;  %v709_v60 = vadd.f32 %v3869_v24, %v708_v56 }
 0x205   : > { %v796_v61 = vadd.f32 %v2806_v55, %v628_v57  ;;  %v806_v2 = vadd.f32 %v2809_v62, %v709_v60  ;;  %v2858_v62 = vld [vmem:[%s2635_s10 + $0xc] sm:$0xf] }
 0x207   : > { %v2807_v63 = vmul.f32 -1.442695, %v796_v61  ;;  %v2810_v6 = vmul.f32 -1.442695, %v806_v2 }
 0x209   : > { %3558 = vpow2.f32 %v2807_v63 }
 0x20a   : > { %v789_v3 = vpop.f32.mrb[4].mxu1  ;;  %3560 = vpow2.f32 %v2810_v6 }
 0x20b   : > { %v3161_v4 = vpop.f32.mrb[5].mxu1  ;;  %v790_v13 = vadd.f32 %v3874_v40, %v789_v3 }
 0x213   : > { %v3559_v7 = vpop.eup %3558 }
 0x214   : > { %v800_v8 = vadd.f32 1.0, %v3559_v7  ;;  %v3561_v9 = vpop.eup %3560 }
 0x215   : > { %v810_v10 = vadd.f32 1.0, %v3561_v9 }
 0x216   : > { %3562 = vrcp.f32 %v800_v8  ;;  %v2861_v8 = vld [vmem:[%s2635_s10 + $0x2c] sm:$0xf] }
 0x217   : > { %3564 = vrcp.f32 %v810_v10 }
 0x220   : > { %v3563_v14 = vpop.eup %3562 }
 0x221   : > { %v816_v18 = vmul.f32 %v3563_v14, %v790_v13  ;;  %v3565_v22 = vpop.eup %3564 }
 0x222   : > { %v819_v23 = vsub.f32 1.0, %v3565_v22  ;;  %v821_v26 = vmul.f32 %v3565_v22, %v546_v53 }
 0x223   : > { %v817_v19 = vadd.f32 %v2812_v16, %v816_v18 }
 0x225   : > { %3566 = vtanh.f32 %v817_v19 }
 0x22f   : > { %v3567_v25 = vpop.eup %3566 }
 0x230   : > { %v820_v27 = vmul.f32 %v3567_v25, %v819_v23 }
 0x232   : > { %v822_v28 = vadd.f32 %v821_v26, %v820_v27  ;;  %v2864_v27 = vld [vmem:[%s2635_s10 + $0x4c] sm:$0xf]  ;;  %s2958_s10 = smul.u32 4294967268, %s3744_s19 }
 0x234   : > { %823 = vst.msk [vmem:[#allocation2] sm:$0xf] %vm256_vm0, %v822_v28  ;;  %2814 = vst.msk [vmem:[%s2616_s29 + $0x4] sm:$0xf] %vm256_vm0, %v822_v28  ;;  %s2658_s29 = scalar_lea.vmem %s3854_s9, %s2906_s28  ;;  %s2702_s13 = scalar_lea.vmem %s3881_s22, %s2958_s10 [#allocation3] }
 0x235   : > { %s3695_s28 = smov [#allocation3]  }
 0x23b   : > { %v828_v29 = vld [vmem:[#allocation2] sm:$0xf] }
 0x23c   : > { %3171 = vmatmul.mubr.msk.f32.vlgmr.msra.gmra.mrb[6].mxu0 %vm271_vm2, %v828_v29  ;;  %3182 = vmatmul.mubr.msk.f32.vlgmr.msra.gmra.mrb[6].mxu1 %vm271_vm2, %v828_v29 }
 0x23d   : > { %3410 = vmatpush3.bf16.msra.mxu0 %v3815_v17  ;;  %3192 = vmatprep.mubr.msk.f32.mxu0 %vm3693_vm1, %v3694_v1 }
 0x23e   : > { %3411 = vmatprep.subr.bf16.mxu0 %v3692_v0  ;;  %3416 = vmatpush3.bf16.msra.mxu1 %v3793_v5 }
 0x23f   : > { %3417 = vmatprep.subr.bf16.mxu1 %v3692_v0  ;;  %3203 = vmatprep.mubr.msk.f32.mxu1 %vm3693_vm1, %v3694_v1 }
 0x241   : > { %3413 = vmatpush3.bf16.msra.mxu0 %v3825_v20 }
 0x242   : > { %3420 = vmatprep.subr.bf16.mxu0 %v3692_v0  ;;  %3419 = vmatpush3.bf16.msra.mxu1 %v3801_v11 }
 0x243   : > { %3426 = vmatprep.subr.bf16.mxu1 %v3692_v0 }
 0x244   : > { %3193 = vmatmul.mubr.msk.f32.vlgmr.msra.gmra.mrb[8].mxu0 %vm271_vm2, %v828_v29 }
 0x245   : > { %3422 = vmatpush3.bf16.msra.mxu0 %v3803_v12  ;;  %3214 = vmatprep.mubr.msk.f32.mxu0 %vm3693_vm1, %v3694_v1 }
 0x246   : > { %3423 = vmatprep.subr.bf16.mxu0 %v3692_v0 }
 0x249   : > { %3425 = vmatpush3.bf16.msra.mxu0 %v3809_v15 }
 0x24a   : > { %3432 = vmatprep.subr.bf16.mxu0 %v3692_v0 }
 0x30f   : > { %v909_v30 = vpop.f32.mrb[6].mxu0  ;;  %v990_v32 = vpop.f32.mrb[6].mxu1 }
 0x310   : > { %v910_v33 = vadd.f32 %v3866_v21, %v909_v30  ;;  %v3172_v34 = vpop.f32.mrb[7].mxu0  ;;  %v3183_v35 = vpop.f32.mrb[7].mxu1  ;;  %v991_v36 = vadd.f32 %v3869_v24, %v990_v32 }
 0x312   : > { %v1078_v37 = vadd.f32 %v2832_v31, %v910_v33  ;;  %v1088_v41 = vadd.f32 %v2835_v38, %v991_v36  ;;  %v1639_v38 = vld [vmem:[%s1638_s23] sm:$0xf] }
 0x314   : > { %v2833_v39 = vmul.f32 -1.442695, %v1078_v37  ;;  %v2836_v44 = vmul.f32 -1.442695, %v1088_v41 }
 0x316   : > { %3568 = vpow2.f32 %v2833_v39 }
 0x317   : > { %v1071_v42 = vpop.f32.mrb[8].mxu0  ;;  %3570 = vpow2.f32 %v2836_v44 }
 0x318   : > { %v3194_v43 = vpop.f32.mrb[9].mxu0  ;;  %v1072_v49 = vadd.f32 %v3874_v40, %v1071_v42 }
 0x320   : > { %v3569_v45 = vpop.eup %3568 }
 0x321   : > { %v1082_v46 = vadd.f32 1.0, %v3569_v45  ;;  %v3571_v47 = vpop.eup %3570 }
 0x322   : > { %v1092_v48 = vadd.f32 1.0, %v3571_v47 }
 0x323   : > { %3572 = vrcp.f32 %v1082_v46  ;;  %v2886_v46 = vld [vmem:[%s1638_s23 + $0x20] sm:$0xf] }
 0x324   : > { %3574 = vrcp.f32 %v1092_v48 }
 0x32d   : > { %v3573_v50 = vpop.eup %3572 }
 0x32e   : > { %v1098_v52 = vmul.f32 %v3573_v50, %v1072_v49  ;;  %v3575_v54 = vpop.eup %3574 }
 0x32f   : > { %v1101_v55 = vsub.f32 1.0, %v3575_v54  ;;  %v1103_v57 = vmul.f32 %v3575_v54, %v828_v29 }
 0x330   : > { %v1099_v53 = vadd.f32 %v2838_v51, %v1098_v52 }
 0x332   : > { %3576 = vtanh.f32 %v1099_v53 }
 0x33c   : > { %v3577_v56 = vpop.eup %3576 }
 0x33d   : > { %v1102_v58 = vmul.f32 %v3577_v56, %v1101_v55 }
 0x33f   : > { %v1104_v59 = vadd.f32 %v1103_v57, %v1102_v58  ;;  %v2889_v58 = vld [vmem:[%s1638_s23 + $0x40] sm:$0xf] }
 0x341   : > { %1105 = vst.msk [vmem:[#allocation2] sm:$0xf] %vm256_vm0, %v1104_v59  ;;  %2840 = vst.msk [vmem:[%s2632_s7 + $0x8] sm:$0xf] %vm256_vm0, %v1104_v59  ;;  %s2674_s7 = scalar_lea.vmem %s3854_s9, %s2932_s6 }
 0x348   : > { %v1109_v60 = vld [vmem:[#allocation2] sm:$0xf] }
 0x349   : > { %3204 = vmatmul.mubr.msk.f32.vlgmr.msra.gmra.mrb[8].mxu1 %vm271_vm2, %v1109_v60  ;;  %3215 = vmatmul.mubr.msk.f32.vlgmr.msra.gmra.mrb[10].mxu0 %vm271_vm2, %v1109_v60 }
 0x34a   : > { %3428 = vmatpush3.bf16.msra.mxu1 %v3815_v17  ;;  %3225 = vmatprep.mubr.msk.f32.mxu1 %vm3693_vm1, %v3694_v1 }
 0x34b   : > { %3429 = vmatprep.subr.bf16.mxu1 %v3692_v0  ;;  %3434 = vmatpush3.bf16.msra.mxu0 %v3793_v5 }
 0x34c   : > { %3435 = vmatprep.subr.bf16.mxu0 %v3692_v0  ;;  %3236 = vmatprep.mubr.msk.f32.mxu0 %vm3693_vm1, %v3694_v1 }
 0x34e   : > { %3431 = vmatpush3.bf16.msra.mxu1 %v3825_v20 }
 0x34f   : > { %3438 = vmatprep.subr.bf16.mxu1 %v3692_v0  ;;  %3437 = vmatpush3.bf16.msra.mxu0 %v3801_v11 }
 0x350   : > { %3444 = vmatprep.subr.bf16.mxu0 %v3692_v0 }
 0x351   : > { %3226 = vmatmul.mubr.msk.f32.vlgmr.msra.gmra.mrb[10].mxu1 %vm271_vm2, %v1109_v60 }
 0x352   : > { %3440 = vmatpush3.bf16.msra.mxu1 %v3803_v12  ;;  %3247 = vmatprep.mubr.msk.f32.mxu1 %vm3693_vm1, %v3694_v1 }
 0x353   : > { %3441 = vmatprep.subr.bf16.mxu1 %v3692_v0 }
 0x356   : > { %3443 = vmatpush3.bf16.msra.mxu1 %v3809_v15 }
 0x357   : > { %3450 = vmatprep.subr.bf16.mxu1 %v3692_v0 }
 0x41c   : > { %v1190_v61 = vpop.f32.mrb[8].mxu1  ;;  %v1271_v63 = vpop.f32.mrb[10].mxu0 }
 0x41d   : > { %v1191_v2 = vadd.f32 %v3866_v21, %v1190_v61  ;;  %v3205_v3 = vpop.f32.mrb[9].mxu1  ;;  %v3216_v4 = vpop.f32.mrb[11].mxu0  ;;  %v1272_v6 = vadd.f32 %v3869_v24, %v1271_v63 }
 0x41f   : > { %v1359_v7 = vadd.f32 %v2858_v62, %v1191_v2  ;;  %v1369_v10 = vadd.f32 %v2861_v8, %v1272_v6 }
 0x421   : > { %v2859_v9 = vmul.f32 -1.442695, %v1359_v7  ;;  %v2862_v16 = vmul.f32 -1.442695, %v1369_v10 }
 0x423   : > { %3578 = vpow2.f32 %v2859_v9 }
 0x424   : > { %v1352_v13 = vpop.f32.mrb[10].mxu1  ;;  %3580 = vpow2.f32 %v2862_v16 }
 0x425   : > { %v3227_v14 = vpop.f32.mrb[11].mxu1  ;;  %v1353_v25 = vadd.f32 %v3874_v40, %v1352_v13 }
 0x426   : > { %v2910_v14 = vld [vmem:[%s2658_s29 + $0x34] sm:$0xf] }
 0x42d   : > { %v3579_v18 = vpop.eup %3578 }
 0x42e   : > { %v1363_v19 = vadd.f32 1.0, %v3579_v18  ;;  %v3581_v22 = vpop.eup %3580 }
 0x42f   : > { %v1373_v23 = vadd.f32 1.0, %v3581_v22 }
 0x430   : > { %3582 = vrcp.f32 %v1363_v19 }
 0x431   : > { %3584 = vrcp.f32 %v1373_v23 }
 0x43a   : > { %v3583_v26 = vpop.eup %3582 }
 0x43b   : > { %v1379_v28 = vmul.f32 %v3583_v26, %v1353_v25  ;;  %v3585_v30 = vpop.eup %3584 }
 0x43c   : > { %v1382_v31 = vsub.f32 1.0, %v3585_v30  ;;  %v1384_v33 = vmul.f32 %v3585_v30, %v1109_v60  ;;  %v2913_v30 = vld [vmem:[%s2658_s29 + $0x54] sm:$0xf] }
 0x43d   : > { %v1380_v29 = vadd.f32 %v2864_v27, %v1379_v28 }
 0x43f   : > { %3586 = vtanh.f32 %v1380_v29 }
 0x449   : > { %v3587_v32 = vpop.eup %3586 }
 0x44a   : > { %v1383_v34 = vmul.f32 %v3587_v32, %v1382_v31 }
 0x44c   : > { %v1385_v35 = vadd.f32 %v1384_v33, %v1383_v34 }
 0x44e   : > { %1386 = vst.msk [vmem:[#allocation2] sm:$0xf] %vm256_vm0, %v1385_v35  ;;  %2866 = vst.msk [vmem:[%s2644_s11 + $0xc] sm:$0xf] %vm256_vm0, %v1385_v35  ;;  %s2690_s11 = scalar_lea.vmem %s3854_s9, %s2958_s10  ;;  %s2536_s9 = sshll.u32 %s3881_s22, 4  ;;  %s4126_s9 = int_to_ptr.vmem [resolvable:$true] %s2536_s9 }
 0x44f   : > { %s4132_s22 = scalar_lea.sflag [#allocation4], %s224_s14 }
 0x455   : > { %v1390_v36 = vld [vmem:[#allocation2] sm:$0xf] }
 0x456   : > { %3237 = vmatmul.mubr.msk.f32.vlgmr.msra.gmra.mrb[12].mxu0 %vm271_vm2, %v1390_v36  ;;  %3248 = vmatmul.mubr.msk.f32.vlgmr.msra.gmra.mrb[12].mxu1 %vm271_vm2, %v1390_v36 }
 0x457   : > { %3446 = vmatpush3.bf16.msra.mxu0 %v3815_v17  ;;  %3258 = vmatprep.mubr.msk.f32.mxu0 %vm3693_vm1, %v3694_v1 }
 0x458   : > { %3447 = vmatprep.subr.bf16.mxu0 %v3692_v0  ;;  %3452 = vmatpush3.bf16.msra.mxu1 %v3793_v5 }
 0x459   : > { %3453 = vmatprep.subr.bf16.mxu1 %v3692_v0  ;;  %3269 = vmatprep.mubr.msk.f32.mxu1 %vm3693_vm1, %v3694_v1 }
 0x45b   : > { %3449 = vmatpush3.bf16.msra.mxu0 %v3825_v20 }
 0x45c   : > { %3456 = vmatprep.subr.bf16.mxu0 %v3692_v0  ;;  %3455 = vmatpush3.bf16.msra.mxu1 %v3801_v11 }
 0x45d   : > { %3462 = vmatprep.subr.bf16.mxu1 %v3692_v0 }
 0x45e   : > { %3259 = vmatmul.mubr.msk.f32.vlgmr.msra.gmra.mrb[14].mxu0 %vm271_vm2, %v1390_v36 }
 0x45f   : > { %3458 = vmatpush3.bf16.msra.mxu0 %v3803_v12  ;;  %3280 = vmatprep.mubr.msk.f32.mxu0 %vm3693_vm1, %v3694_v1 }
 0x460   : > { %3459 = vmatprep.subr.bf16.mxu0 %v3692_v0 }
 0x463   : > { %3461 = vmatpush3.bf16.msra.mxu0 %v3809_v15 }
 0x464   : > { %3468 = vmatprep.subr.bf16.mxu0 %v3692_v0 }
 0x529   : > { %v1471_v37 = vpop.f32.mrb[12].mxu0  ;;  %v1552_v39 = vpop.f32.mrb[12].mxu1 }
 0x52a   : > { %v1472_v41 = vadd.f32 %v3866_v21, %v1471_v37  ;;  %v3238_v42 = vpop.f32.mrb[13].mxu0  ;;  %v3249_v43 = vpop.f32.mrb[13].mxu1  ;;  %v1553_v44 = vadd.f32 %v3869_v24, %v1552_v39 }
 0x52b   : > { %v2944_v43 = vld [vmem:[%s3788_s5 + $0x20] sm:$0xff] }
 0x52c   : > { %v1640_v45 = vadd.f32 %v1639_v38, %v1472_v41  ;;  %v1650_v48 = vadd.f32 %v2886_v46, %v1553_v44  ;;  %v2238_v41 = vld [vmem:[%s3788_s5 + $0x8] sm:$0xff]  ;;  %v2239_v46 = vld [vmem:[%s3788_s5 + $0x10] sm:$0xff] }
 0x52d   : > { %v2945_v44 = vld [vmem:[%s3788_s5 + $0x28] sm:$0xff] }
 0x52e   : > { %v2884_v47 = vmul.f32 -1.442695, %v1640_v45  ;;  %v2887_v51 = vmul.f32 -1.442695, %v1650_v48  ;;  %v3493_v45 = vpack.c.bf16 %v2945_v44, %v2944_v43  ;;  %v2956_v43 = vld [vmem:[%s3860_s12 + $0x2] ss:$0 sm:$0xff] }
 0x530   : > { %3588 = vpow2.f32 %v2884_v47  ;;  %v2240_v47 = vld [vmem:[%s3788_s5 + $0x18] sm:$0xff] }
 0x531   : > { %v1633_v49 = vpop.f32.mrb[14].mxu0  ;;  %3590 = vpow2.f32 %v2887_v51  ;;  %v3490_v48 = vpack.c.bf16 %v2240_v47, %v2239_v46  ;;  %v2965_v47 = vld [vmem:[%s2690_s11 + $0x5c] sm:$0xf] }
 0x532   : > { %v3260_v50 = vpop.f32.mrb[15].mxu0  ;;  %v1634_v56 = vadd.f32 %v3874_v40, %v1633_v49  ;;  %v2947_v49 = vld [vmem:[%s3788_s5 + $0x38] sm:$0xff] }
 0x53a   : > { %v3589_v52 = vpop.eup %3588 }
 0x53b   : > { %v1644_v53 = vadd.f32 1.0, %v3589_v52  ;;  %v3591_v54 = vpop.eup %3590  ;;  %v2933_v52 = vld [vmem:[%s2674_s7 + $0x18] sm:$0xf] }
 0x53c   : > { %v1654_v55 = vadd.f32 1.0, %v3591_v54 }
 0x53d   : > { %3592 = vrcp.f32 %v1644_v53 }
 0x53e   : > { %3594 = vrcp.f32 %v1654_v55 }
 0x547   : > { %v3593_v57 = vpop.eup %3592 }
 0x548   : > { %v1660_v59 = vmul.f32 %v3593_v57, %v1634_v56  ;;  %v3595_v61 = vpop.eup %3594 }
 0x549   : > { %v1663_v62 = vsub.f32 1.0, %v3595_v61  ;;  %v1665_v2 = vmul.f32 %v3595_v61, %v1390_v36 }
 0x54a   : > { %v1661_v60 = vadd.f32 %v2889_v58, %v1660_v59  ;;  %v2936_v59 = vld [vmem:[%s2674_s7 + $0x38] sm:$0xf] }
 0x54c   : > { %3596 = vtanh.f32 %v1661_v60 }
 0x556   : > { %v3597_v63 = vpop.eup %3596 }
 0x557   : > { %v1664_v3 = vmul.f32 %v3597_v63, %v1663_v62 }
 0x559   : > { %v1666_v4 = vadd.f32 %v1665_v2, %v1664_v3 }
 0x55b   : > { %1667 = vst.msk [vmem:[#allocation2] sm:$0xf] %vm256_vm0, %v1666_v4  ;;  %1669 = vst.msk [vmem:[%s1668_s27] sm:$0xf] %vm256_vm0, %v1666_v4  ;;  %s3628_s27 = scalar_lea.vmem %s4126_s9, 512 }
 0x55c   : > { %p3629_p12 = scmp.ne.s32.totalorder %s4126_s9, %s3628_s27 }
 0x55e   : > { %p3630_p13 = pnand %p3629_p12, %p3761_p5 }
 0x560   : > { %p3631_p0 = pneg %p3630_p13 }
 0x562   : > { %v1672_v6 = vld [vmem:[#allocation2] sm:$0xf] }
 0x563   : > { %3270 = vmatmul.mubr.msk.f32.vlgmr.msra.gmra.mrb[14].mxu1 %vm271_vm2, %v1672_v6  ;;  %3281 = vmatmul.mubr.msk.f32.vlgmr.msra.gmra.mrb[16].mxu0 %vm271_vm2, %v1672_v6 }
 0x564   : > { %3464 = vmatpush3.bf16.msra.mxu1 %v3815_v17  ;;  %3291 = vmatprep.mubr.msk.f32.mxu1 %vm3693_vm1, %v3694_v1 }
 0x565   : > { %3465 = vmatprep.subr.bf16.mxu1 %v3692_v0  ;;  %3470 = vmatpush3.bf16.msra.mxu0 %v3793_v5 }
 0x566   : > { %3471 = vmatprep.subr.bf16.mxu0 %v3692_v0  ;;  %3302 = vmatprep.mubr.msk.f32.mxu0 %vm3693_vm1, %v3694_v1 }
 0x568   : > { %3467 = vmatpush3.bf16.msra.mxu1 %v3825_v20 }
 0x569   : > { %3474 = vmatprep.subr.bf16.mxu1 %v3692_v0  ;;  %3473 = vmatpush3.bf16.msra.mxu0 %v3801_v11  ;;  %v2907_v11 = vld [vmem:[%s2658_s29 + $0x14] sm:$0xf]  ;;  %s3632_s29 = sshll.u32 %s3695_s28, 4  ;;  %s3633_s29 = int_to_ptr.vmem [resolvable:$false] %s3632_s29 }
 0x56a   : > { %3480 = vmatprep.subr.bf16.mxu0 %v3692_v0  ;;  %p3635_p1 = scmp.lt.s32.totalorder %s4126_s9, %s3633_s29 }
 0x56b   : > { %3292 = vmatmul.mubr.msk.f32.vlgmr.msra.gmra.mrb[16].mxu1 %vm271_vm2, %v1672_v6 }
 0x56c   : > { %3476 = vmatpush3.bf16.msra.mxu1 %v3803_v12  ;;  %3313 = vmatprep.mubr.msk.f32.mxu1 %vm3693_vm1, %v3694_v1 }
 0x56d   : > { %3477 = vmatprep.subr.bf16.mxu1 %v3692_v0 }
 0x570   : > { %3479 = vmatpush3.bf16.msra.mxu1 %v3809_v15 }
 0x571   : > { %3486 = vmatprep.subr.bf16.mxu1 %v3692_v0 }
 0x636   : > { %v1753_v5 = vpop.f32.mrb[14].mxu1  ;;  %v1834_v7 = vpop.f32.mrb[16].mxu0 }
 0x637   : > { %v1754_v8 = vadd.f32 %v3866_v21, %v1753_v5  ;;  %v3271_v9 = vpop.f32.mrb[15].mxu1  ;;  %v3282_v10 = vpop.f32.mrb[17].mxu0  ;;  %v1835_v12 = vadd.f32 %v3869_v24, %v1834_v7 }
 0x639   : > { %v1922_v13 = vadd.f32 %v2907_v11, %v1754_v8  ;;  %v1932_v18 = vadd.f32 %v2910_v14, %v1835_v12  ;;  %v2939_v11 = vld [vmem:[%s2674_s7 + $0x58] sm:$0xf] }
 0x63b   : > { %v2908_v16 = vmul.f32 -1.442695, %v1922_v13  ;;  %v2911_v22 = vmul.f32 -1.442695, %v1932_v18  ;;  %v2952_v18 = vld [vmem:[%s3788_s5 + $0x48] sm:$0xff] }
 0x63d   : > { %3598 = vpow2.f32 %v2908_v16 }
 0x63e   : > { %v1915_v15 = vpop.f32.mrb[16].mxu1  ;;  %3600 = vpow2.f32 %v2911_v22  ;;  %v2954_v22 = vld [vmem:[%s3788_s5 + $0x58] sm:$0xff] }
 0x63f   : > { %v3293_v19 = vpop.f32.mrb[17].mxu1  ;;  %v1916_v28 = vadd.f32 %v3874_v40, %v1915_v15 }
 0x640   : > { %v2953_v19 = vld [vmem:[%s3788_s5 + $0x50] sm:$0xff] }
 0x647   : > { %v3599_v23 = vpop.eup %3598 }
 0x648   : > { %v1926_v25 = vadd.f32 1.0, %v3599_v23  ;;  %v3601_v26 = vpop.eup %3600 }
 0x649   : > { %v1936_v27 = vadd.f32 1.0, %v3601_v26  ;;  %v2942_v26 = vld [vmem:[%s3860_s12] ss:$0 sm:$0xff] }
 0x64a   : > { %3602 = vrcp.f32 %v1926_v25  ;;  %v3502_v25 = vpack.c.bf16 %v2954_v22, %v2953_v19 }
 0x64b   : > { %3604 = vrcp.f32 %v1936_v27  ;;  %v2949_v27 = vld [vmem:[%s3860_s12 + $0x1] ss:$0 sm:$0xff] }
 0x654   : > { %v3603_v29 = vpop.eup %3602 }
 0x655   : > { %v1942_v31 = vmul.f32 %v3603_v29, %v1916_v28  ;;  %v3605_v33 = vpop.eup %3604  ;;  %v2959_v29 = vld [vmem:[%s2690_s11 + $0x1c] sm:$0xf] }
 0x656   : > { %v1945_v34 = vsub.f32 1.0, %v3605_v33  ;;  %v1947_v36 = vmul.f32 %v3605_v33, %v1672_v6 }
 0x657   : > { %v1943_v32 = vadd.f32 %v2913_v30, %v1942_v31 }
 0x659   : > { %3606 = vtanh.f32 %v1943_v32 }
 0x663   : > { %v3607_v35 = vpop.eup %3606 }
 0x664   : > { %v1946_v37 = vmul.f32 %v3607_v35, %v1945_v34 }
 0x666   : > { %v1948_v38 = vadd.f32 %v1947_v36, %v1946_v37 }
 0x668   : > { %1949 = vst.msk [vmem:[#allocation2] sm:$0xf] %vm256_vm0, %v1948_v38  ;;  %2915 = vst.msk [vmem:[%s2670_s30 + $0x14] sm:$0xf] %vm256_vm0, %v1948_v38  ;;  %s3634_s30 = scalar_lea.vmem %s3633_s29, 1024 }
 0x669   : > { %p3636_p2 = scmp.lt.s32.totalorder %s3634_s30, %s3628_s27 }
 0x66b   : > { %p3637_p3 = por %p3636_p2, %p3635_p1 }
 0x66d   : > { %p3638_p4 = pnand %p3637_p3, %p3631_p0 }
 0x66f   : > { %v4053_v39 = vld [vmem:[#allocation2] sm:$0xf] }
 0x670   : > { %3303 = vmatmul.mubr.msk.f32.vlgmr.msra.gmra.mrb[18].mxu0 %vm271_vm2, %v4053_v39  ;;  %3314 = vmatmul.mubr.msk.f32.vlgmr.msra.gmra.mrb[18].mxu1 %vm271_vm2, %v4053_v39 }
 0x671   : > { %3482 = vmatpush3.bf16.msra.mxu0 %v3815_v17  ;;  %3324 = vmatprep.mubr.msk.f32.mxu0 %vm3693_vm1, %v3694_v1  ;;  %v2237_v17 = vld [vmem:[%s3788_s5] sm:$0xff] }
 0x672   : > { %3483 = vmatprep.subr.bf16.mxu0 %v3692_v0  ;;  %3335 = vmatprep.mubr.msk.f32.mxu1 %vm3693_vm1, %v3694_v1  ;;  %v3487_v42 = vpack.c.bf16 %v2238_v41, %v2237_v17 }
 0x674   : > { %3488 = vmatpush3.bf16.msra.mxu1 %v3487_v42 }
 0x675   : > { %3485 = vmatpush3.bf16.msra.mxu0 %v3825_v20  ;;  %v2946_v20 = vld [vmem:[%s3788_s5 + $0x30] sm:$0xff]  ;;  %3489 = vmatprep.subr.bf16.mxu1 %v3692_v0 }
 0x676   : > { %3492 = vmatprep.subr.bf16.mxu0 %v3692_v0  ;;  %v3496_v50 = vpack.c.bf16 %v2947_v49, %v2946_v20 }
 0x678   : > { %3325 = vmatmul.mubr.msk.f32.vlgmr.msra.gmra.mrb[20].mxu0 %vm271_vm2, %v4053_v39  ;;  %3491 = vmatpush3.bf16.msra.mxu1 %v3490_v48 }
 0x679   : > { %3346 = vmatprep.mubr.msk.f32.mxu0 %vm3693_vm1, %v3694_v1  ;;  %3494 = vmatpush3.bf16.msra.mxu0 %v3493_v45 }
 0x67a   : > { %3495 = vmatprep.subr.bf16.mxu0 %v3692_v0  ;;  %3498 = vmatprep.subr.bf16.mxu1 %v3692_v0 }
 0x67d   : > { %3497 = vmatpush3.bf16.msra.mxu0 %v3496_v50 }
 0x743   : > { %v2035_v51 = vpop.f32.mrb[18].mxu0  ;;  %v2116_v53 = vpop.f32.mrb[18].mxu1 }
 0x744   : > { %v2036_v54 = vadd.f32 %v3866_v21, %v2035_v51  ;;  %v3304_v55 = vpop.f32.mrb[19].mxu0  ;;  %v3315_v56 = vpop.f32.mrb[19].mxu1  ;;  %v2117_v57 = vadd.f32 %v3869_v24, %v2116_v53 }
 0x746   : > { %v2204_v58 = vadd.f32 %v2933_v52, %v2036_v54  ;;  %v2214_v61 = vadd.f32 %v2936_v59, %v2117_v57 }
 0x748   : > { %v2934_v60 = vmul.f32 -1.442695, %v2204_v58  ;;  %v2937_v2 = vmul.f32 -1.442695, %v2214_v61 }
 0x74a   : > { %3608 = vpow2.f32 %v2934_v60 }
 0x74b   : > { %v2197_v62 = vpop.f32.mrb[20].mxu0  ;;  %3610 = vpow2.f32 %v2937_v2 }
 0x74c   : > { %v3326_v63 = vpop.f32.mrb[21].mxu0  ;;  %v2198_v5 = vadd.f32 %v3874_v40, %v2197_v62  ;;  %v2951_v40 = vld [vmem:[%s3788_s5 + $0x40] sm:$0xff]  ;;  %s2975_s5 = sshll.u32 %s3744_s19, 9  ;;  %s4192_s19 = smov (!%p252_p11, %s3744_s19), 1 }
 0x74d   : > { %v3499_v15 = vpack.c.bf16 %v2952_v18, %v2951_v40  ;;  %s4124_s23 = scalar_lea.hbm %s4181_s3, %s2975_s5 }
 0x754   : > { %v3609_v3 = vpop.eup %3608 }
 0x755   : > { %v2208_v4 = vadd.f32 1.0, %v3609_v3  ;;  %v3611_v6 = vpop.eup %3610 }
 0x756   : > { %v2218_v21 = vadd.f32 1.0, %v3611_v6 }
 0x757   : > { %3612 = vrcp.f32 %v2208_v4 }
 0x758   : > { %3614 = vrcp.f32 %v2218_v21 }
 0x761   : > { %v3613_v24 = vpop.eup %3612 }
 0x762   : > { %v2224_v7 = vmul.f32 %v3613_v24, %v2198_v5  ;;  %v3615_v9 = vpop.eup %3614 }
 0x763   : > { %v2227_v10 = vsub.f32 1.0, %v3615_v9  ;;  %v2229_v13 = vmul.f32 %v3615_v9, %v4053_v39 }
 0x764   : > { %v2225_v8 = vadd.f32 %v2939_v11, %v2224_v7 }
 0x766   : > { %3616 = vtanh.f32 %v2225_v8 }
 0x770   : > { %v3617_v12 = vpop.eup %3616 }
 0x771   : > { %v2228_v14 = vmul.f32 %v3617_v12, %v2227_v10 }
 0x773   : > { %v2230_v16 = vadd.f32 %v2229_v13, %v2228_v14 }
 0x775   : > { %2231 = vst.msk [vmem:[#allocation2] sm:$0xf] %vm256_vm0, %v2230_v16  ;;  %2941 = vst.msk [vmem:[%s2686_s8 + $0x18] sm:$0xf] %vm256_vm0, %v2230_v16 }
 0x77c   : > { %v2236_v23 = vld [vmem:[#allocation2] sm:$0xf] }
 0x77d   : > { %3336 = vmatmul.mubr.msk.f32.vlgmr.msra.gmra.mrb[20].mxu1 %vm271_vm2, %v2236_v23  ;;  %3347 = vmatmul.mubr.msk.f32.vlgmr.msra.gmra.mrb[22].mxu0 %vm271_vm2, %v2236_v23 }
 0x77e   : > { %3500 = vmatpush3.bf16.msra.mxu1 %v3499_v15  ;;  %3357 = vmatprep.mubr.msk.f32.mxu1 %vm3693_vm1, %v3694_v1  ;;  %v2962_v1 = vld [vmem:[%s2690_s11 + $0x3c] sm:$0xf] }
 0x77f   : > { %3501 = vmatprep.subr.bf16.mxu1 %v3692_v0 }
 0x782   : > { %3503 = vmatpush3.bf16.msra.mxu1 %v3502_v25 }
 0x785   : > { %3358 = vmatmul.mubr.msk.f32.vlgmr.msra.gmra.mrb[22].mxu1 %vm271_vm2, %v2236_v23 }
 0x850   : > { %v2317_v28 = vpop.f32.mrb[20].mxu1  ;;  %v2398_v30 = vpop.f32.mrb[22].mxu0 }
 0x851   : > { %v2318_v31 = vadd.f32 %v2942_v26, %v2317_v28  ;;  %v3337_v32 = vpop.f32.mrb[21].mxu1  ;;  %v3348_v33 = vpop.f32.mrb[23].mxu0  ;;  %v2399_v34 = vadd.f32 %v2949_v27, %v2398_v30 }
 0x853   : > { %v2486_v35 = vadd.f32 %v2959_v29, %v2318_v31  ;;  %v2496_v0 = vadd.f32 %v2962_v1, %v2399_v34 }
 0x855   : > { %v2960_v36 = vmul.f32 -1.442695, %v2486_v35  ;;  %v2963_v39 = vmul.f32 -1.442695, %v2496_v0 }
 0x857   : > { %3618 = vpow2.f32 %v2960_v36 }
 0x858   : > { %v2479_v37 = vpop.f32.mrb[22].mxu1  ;;  %3620 = vpow2.f32 %v2963_v39 }
 0x859   : > { %v3359_v38 = vpop.f32.mrb[23].mxu1  ;;  %v2480_v45 = vadd.f32 %v2956_v43, %v2479_v37 }
 0x861   : > { %v3619_v17 = vpop.eup %3618 }
 0x862   : > { %v2490_v41 = vadd.f32 1.0, %v3619_v17  ;;  %v3621_v42 = vpop.eup %3620 }
 0x863   : > { %v2500_v44 = vadd.f32 1.0, %v3621_v42 }
 0x864   : > { %3622 = vrcp.f32 %v2490_v41 }
 0x865   : > { %3624 = vrcp.f32 %v2500_v44 }
 0x86e   : > { %v3623_v46 = vpop.eup %3622 }
 0x86f   : > { %v2506_v20 = vmul.f32 %v3623_v46, %v2480_v45  ;;  %v3625_v49 = vpop.eup %3624 }
 0x870   : > { %v2509_v50 = vsub.f32 1.0, %v3625_v49  ;;  %v2511_v52 = vmul.f32 %v3625_v49, %v2236_v23 }
 0x871   : > { %v2507_v48 = vadd.f32 %v2965_v47, %v2506_v20 }
 0x873   : > { %3626 = vtanh.f32 %v2507_v48 }
 0x87d   : > { %v3627_v51 = vpop.eup %3626 }
 0x87e   : > { %v2510_v53 = vmul.f32 %v3627_v51, %v2509_v50 }
 0x880   : > { %v2512_v54 = vadd.f32 %v2511_v52, %v2510_v53 }
 0x882   : > { %2513 = vst.msk [vmem:[#allocation2] sm:$0xf] %vm256_vm0, %v2512_v54  ;;  %2967 = vst.msk [vmem:[%s2702_s13 + $0x1c] sm:$0xf] %vm256_vm0, %v2512_v54 }
 0x883   : > { %3641 = shalt.err (!%p3638_p4)
}
 0x884   : > { %s3642_s14 = scalar_lea.hbm %s4124_s23, 512  ;;  %s3646_s8 = scalar_lea.hbm %s4181_s3, 1024 }
 0x885   : > { %p3643_p7 = scmp.ne.s32.totalorder %s4124_s23, %s3642_s14  ;;  %p3647_p10 = scmp.lt.u32.totalorder %s4124_s23, %s4181_s3 }
 0x886   : > { %p3648_p11 = scmp.lt.u32.totalorder %s3646_s8, %s3642_s14  ;;  %p3650_p13 = scmp.lt.u32.totalorder %s3642_s14, %s4124_s23 }
 0x887   : > { %p3644_p8 = pnand %p3643_p7, %p3761_p5 }
 0x888   : > { %p3649_p12 = por %p3648_p11, %p3647_p10 }
 0x889   : > { %p3645_p9 = pneg %p3644_p8 }
 0x88a   : > { %p3651_p0 = por %p3650_p13, %p3649_p12 }
 0x88c   : > { %p3652_p1 = pnand %p3651_p0, %p3645_p9 }
 0x88e   : > { %3655 = shalt.err (!%p3652_p1)
}
 0x88f   : > { %s3696_s5 = smov 64   ;;  %s3697_s13 = smov 4   ;;  %v2516_v55 = vld [vmem:[#allocation2] sm:$0xf] }
 0x890   : > { %3504 = dma.vmem_to_hbm [thread:$0]  (%p3761_p5), %s4126_s9, 512, %s4124_s23, %s4132_s22, %s3696_s5, %s3696_s5, %s3697_s13  }
 0x891   : > { %s2767_s12 = sshll.u32 %s4192_s19, 2 }
 0x892   : > { %s255_s28 = scalar_lea.vmem %s4182_s4, %s2767_s12 }
 0x893   : > { %2517 = vst.msk [vmem:[%s255_s28] sm:$0xf] %vm256_vm0, %v2516_v55 }
 0x894 PF: > { %p3510_p2 = scmp.ge.s32.totalorder %s3690_s18, 2  ;;  %s2554_s29 = sand.u32 1, %s3678_s15  }
 0x895   : > { %s2555_s30 = scalar_lea.sflag [#allocation4], %s2554_s29 }
 0x896   : > { %p3507_p3 = pnand %p3510_p2, %p3765_p6 }
 0x898   : > { %3673 = dma.done.wait (!%p3507_p3), %s2555_s30, 512  }
 0x899   : > { %3675 = vsyncadd (!%p3507_p3), %s2555_s30, 4294966784  ;;  %p15_p5 = scmp.ge.s32.totalorder %s3748_s21, 4   ;;  %s4185_s15 = smov %s3682_s16 }
 0x89a   : > { %s4186_s16 = smov %s3686_s17  ;;  %s4187_s17 = smov %s3759_s24 }
 0x89b   : > { %s4188_s18 = smov %s3748_s21  ;;  %17 = sbr.rel (!%p15_p5) target bundleno = 3 (0x3), region = 121 }
 0x8a2   :  { %2567 = vsyncpa [#allocation4], 1 }
 0x8a3   :  { %2569 = vsyncpa [#allocation4 + $0x1], 1 }

</bundles_post_ra>
